<compile_context>
chip_gen: v6e
topology: v6e:2x2x1
jax: 0.10.0
libtpu: 0.0.40
codegen_flags: <defaults>
</compile_context>

<pallas_src>
import functools

import jax
import jax.numpy as jnp
from jax.experimental import pallas as pl
from jax.experimental.pallas import tpu as pltpu


# --------------------------------------------------------------------------
# Weight-slab layout (shared by wrapper + kernel); every offset is 8-aligned.
# --------------------------------------------------------------------------
def _slab_layout(H, coef, LW):
    sizes = {"cw": LW, "wih1": LW, "whh1": H, "wih2": H, "whh2": H, "bias": 8,
             "bw1": H, "sw1": coef * H, "bw2": LW, "sw2": coef * LW}
    offs, r = {}, 0
    for k, n in sizes.items():
        offs[k] = r
        r += n
    return sizes, offs, r


# --------------------------------------------------------------------------
# Fused forward kernel
# --------------------------------------------------------------------------
def _fused_kernel(xc_ref, w_ref, o_ref, *, Bp, T, H, sord, knots, sizes, offs):
    f32, bf16 = jnp.float32, jnp.bfloat16
    LW = 4 * H                      # lane width (= 128 for H = 32)
    R = T * Bp                      # rows per pooled-position parity (time-major)

    def W(name):                    # static slab slice -> zero-cost VMEM window
        s, n = offs[name], sizes[name]
        return w_ref[s:s + n, :]

    bias = W("bias")
    cb, b1, b2 = bias[0:1, :], bias[1:2, :], bias[2:3, :]

    # ---------------- Conv1d + ReLU + MaxPool1d(2, 2): ONE matmul ----------------
    # xc rows [0, R) are im2col rows for the even conv output positions, [R, 2R) for the
    # odd ones, so the pool is a max of the two sublane halves (distinct vregs -> free).
    yeo = jnp.dot(xc_ref[...], W("cw"), preferred_element_type=f32)        # (2R, LW)
    feat = jnp.maximum(jnp.maximum(yeo[:R, :], yeo[R:, :]) + cb, 0.0)      # (R, LW)

    # ---------------- 2-layer LSTM (batch_first, zero init state), wavefronted ----------------
    xp1 = jnp.dot(feat, W("wih1"), preferred_element_type=f32) + b1        # (R, 4H) hoisted

    # Recurrent operands in bf16 (MXU-native); accumulation stays f32.
    whh1b = W("whh1").astype(bf16)
    wih2b = W("wih2").astype(bf16)
    whh2b = W("whh2").astype(bf16)

    def cell(gates, c):
        # g-gate columns were pre-scaled by 2 in the wrapper, so ONE sigmoid pass over all
        # 4H lanes gives i, f, o directly and g via tanh(x) = 2*sigmoid(2x) - 1.
        s = jax.nn.sigmoid(gates)
        i, f, o = s[:, 0:H], s[:, H:2 * H], s[:, 3 * H:4 * H]
        g = 2.0 * s[:, 2 * H:3 * H] - 1.0
        c = f * c + i * g
        return o * jnp.tanh(c), c

    h1 = jnp.zeros((Bp, H), f32); c1 = jnp.zeros((Bp, H), f32)
    h2 = jnp.zeros((Bp, H), f32); c2 = jnp.zeros((Bp, H), f32)
    for t in range(T):              # static unroll; t*Bp slices are 8-sublane aligned
        g1 = xp1[t * Bp:(t + 1) * Bp, :] + jnp.dot(
            h1.astype(bf16), whh1b, preferred_element_type=f32)
        h1, c1 = cell(g1, c1)
        # Wavefront: layer-2 step t issues as soon as h1[t] exists; it is off layer-1's
        # dependency chain, so the scheduler overlaps it with layer-1 step t+1.
        g2 = (b2 + jnp.dot(h1.astype(bf16), wih2b, preferred_element_type=f32)
                 + jnp.dot(h2.astype(bf16), whh2b, preferred_element_type=f32))
        h2, c2 = cell(g2, c2)

    # ---------------- KAN head: 2x KANLinear ----------------
    def silu(v):
        return v * jax.nn.sigmoid(v)

    def bsplines(v):
        # Uniform knots and all recursion denominators are Python floats baked at trace
        # time -> pure scalar-constant VPU FMAs, no in-kernel vector divides/reciprocals.
        nk = len(knots)
        b = [((v >= knots[j]) & (v < knots[j + 1])).astype(f32) for j in range(nk - 1)]
        for p in range(1, sord + 1):
            b = [(v - knots[j]) * (1.0 / (knots[j + p] - knots[j])) * b[j]
                 + (knots[j + p + 1] - v) * (1.0 / (knots[j + p + 1] - knots[j + 1])) * b[j + 1]
                 for j in range(nk - 1 - p)]
        return b                    # coef arrays shaped like v

    def kan_linear(v, bw_name, sw_name, din):
        # spline = sum_c basis_c @ W_c : per-coefficient accumulating dots (no lane concat
        # of sub-128-lane planes; maps to MRB in-place accumulation on v7x).
        acc = jnp.dot(silu(v), W(bw_name), preferred_element_type=f32)
        s0 = offs[sw_name]
        for c, bc in enumerate(bsplines(v)):
            swc = w_ref[s0 + c * din:s0 + (c + 1) * din, :]
            acc = acc + jnp.dot(bc, swc, preferred_element_type=f32)
        return acc

    y = kan_linear(h2, "bw1", "sw1", H)     # (Bp, 128)
    y = kan_linear(y, "bw2", "sw2", LW)     # (Bp, 128); columns >= out_dim are zero
    o_ref[...] = y.astype(o_ref.dtype)


# --------------------------------------------------------------------------
# Wrapper: layout prep (im2col, slab packing) + single pallas_call
# --------------------------------------------------------------------------
def cnn_lstm_forward(params, x, *, grid_size=5, spline_order=3, grid_range=(-1.0, 1.0)):
    f32 = jnp.float32
    B, Cin, L = x.shape
    Cout, _, K = params["conv_w"].shape
    H = params["lstm"][0]["whh"].shape[1]
    LW = 4 * H
    T = L // 2
    Bp = ((B + 7) // 8) * 8                         # pad batch to full sublane groups
    coef = grid_size + spline_order
    out_dim = params["kan"][-1]["base_w"].shape[0]

    assert len(params["lstm"]) == 2, "fused kernel assumes num_layers == 2"
    assert LW == 128, "slab layout assumes 4*hidden == 128 lanes"
    assert params["kan"][0]["base_w"].shape[0] == LW and params["kan"][1]["base_w"].shape[1] == LW
    assert out_dim <= LW and K % 2 == 1 and K * Cin <= LW
    assert params["kan"][0]["spline_w"].shape[-1] == coef

    # ---- im2col: even/odd pooled positions stacked on sublanes, time-major, Bp rows ----
    xb = jnp.pad(x.astype(f32), ((0, Bp - B), (0, 0), (0, 0)))
    pad = K // 2
    x_blc = jnp.transpose(jnp.pad(xb, ((0, 0), (0, 0), (pad, pad))), (0, 2, 1))
    cols = jnp.concatenate([x_blc[:, k:k + L, :] for k in range(K)], axis=-1)   # (Bp, L, K*Cin)
    xe = jnp.transpose(cols[:, 0:2 * T:2, :], (1, 0, 2)).reshape(T * Bp, K * Cin)
    xo = jnp.transpose(cols[:, 1:2 * T:2, :], (1, 0, 2)).reshape(T * Bp, K * Cin)
    xc = jnp.pad(jnp.concatenate([xe, xo], axis=0), ((0, 0), (0, LW - K * Cin)))  # (2*T*Bp, 128)

    # ---- parameter slab (all blocks 128 lanes wide, 8-aligned row offsets) ----
    cw = jnp.transpose(params["conv_w"], (2, 1, 0)).reshape(K * Cin, Cout).astype(f32)

    # Pre-scale the g-gate block by 2 so the kernel needs a single sigmoid pass per step.
    gscale = jnp.concatenate([jnp.ones((1, 2 * H), f32), jnp.full((1, H), 2.0, f32),
                              jnp.ones((1, H), f32)], axis=1)

    def lstm_mats(l):
        wih_t = l["wih"].T.astype(f32) * gscale                     # (din, 4H)
        whh_t = l["whh"].T.astype(f32) * gscale                     # (H, 4H)
        b = (l["bih"] + l["bhh"]).reshape(1, LW).astype(f32) * gscale
        return wih_t, whh_t, b

    wih1, whh1, b1 = lstm_mats(params["lstm"][0])
    wih2, whh2, b2 = lstm_mats(params["lstm"][1])

    def kan_mats(l, dout_pad):
        bw = l["base_w"].T.astype(f32)                              # (din, dout)
        scaled = l["spline_w"] * l["scaler"][..., None]             # (dout, din, coef)
        sw = jnp.transpose(scaled, (2, 1, 0)).reshape(coef * bw.shape[0], -1).astype(f32)
        if dout_pad > bw.shape[1]:
            bw = jnp.pad(bw, ((0, 0), (0, dout_pad - bw.shape[1])))
            sw = jnp.pad(sw, ((0, 0), (0, dout_pad - sw.shape[1])))
        return bw, sw

    bw1, sw1 = kan_mats(params["kan"][0], LW)
    bw2, sw2 = kan_mats(params["kan"][1], LW)

    bias_blk = jnp.zeros((8, LW), f32)
    bias_blk = bias_blk.at[0, :Cout].set(params["conv_b"].astype(f32))
    bias_blk = bias_blk.at[1, :].set(b1[0])
    bias_blk = bias_blk.at[2, :].set(b2[0])

    def pad_rows(a, rows):
        return jnp.pad(a, ((0, rows - a.shape[0]), (0, LW - a.shape[1])))

    sizes, offs, total_rows = _slab_layout(H, coef, LW)
    blocks = {"cw": pad_rows(cw, LW), "wih1": pad_rows(wih1, LW), "whh1": whh1,
              "wih2": wih2, "whh2": whh2, "bias": bias_blk,
              "bw1": bw1, "sw1": sw1, "bw2": pad_rows(bw2, LW), "sw2": sw2}
    for k in sizes:
        assert blocks[k].shape == (sizes[k], LW), (k, blocks[k].shape)
    w_slab = jnp.concatenate([blocks[k] for k in offs], axis=0)     # (total_rows, 128)
    assert w_slab.shape == (total_rows, LW)

    # Uniform B-spline knots as trace-time Python constants (efficient-kan default grid).
    gmin, gmax = grid_range
    hstep = (gmax - gmin) / grid_size
    knots = tuple(float(gmin + (k - spline_order) * hstep)
                  for k in range(grid_size + 2 * spline_order + 1))

    kern = functools.partial(_fused_kernel, Bp=Bp, T=T, H=H, sord=spline_order,
                             knots=knots, sizes=sizes, offs=offs)
    vmem = pl.BlockSpec(memory_space=pltpu.MemorySpace.VMEM)
    out = pl.pallas_call(
        kern,
        out_shape=jax.ShapeDtypeStruct((Bp, LW), jnp.float32),
        in_specs=[vmem, vmem],
        out_specs=vmem,
    )(xc, w_slab)
    return out[:B, :out_dim]


# --------------------------------------------------------------------------
# Deterministic parameter init (synthetic; PyTorch-shaped tensors)
# --------------------------------------------------------------------------
def init_params(key, input_channels, conv_out, K, hidden, num_layers, output_size,
                grid_size=5, spline_order=3):
    keys = jax.random.split(key, 32)
    ki = iter(keys)
    p = {}
    p["conv_w"] = jax.random.normal(next(ki), (conv_out, input_channels, K), jnp.float32) * 0.1
    p["conv_b"] = jax.random.normal(next(ki), (conv_out,), jnp.float32) * 0.1

    p["lstm"] = []
    for l in range(num_layers):
        din = conv_out if l == 0 else hidden
        p["lstm"].append(dict(
            wih=jax.random.normal(next(ki), (4 * hidden, din), jnp.float32) * 0.1,
            whh=jax.random.normal(next(ki), (4 * hidden, hidden), jnp.float32) * 0.1,
            bih=jax.random.normal(next(ki), (4 * hidden,), jnp.float32) * 0.1,
            bhh=jax.random.normal(next(ki), (4 * hidden,), jnp.float32) * 0.1))

    # KAN([hidden, 128, output_size]) -- efficient-kan defaults.
    coef = grid_size + spline_order
    dims = [hidden, 128, output_size]
    p["kan"] = []
    for l in range(len(dims) - 1):
        din, dout = dims[l], dims[l + 1]
        p["kan"].append(dict(
            base_w=jax.random.normal(next(ki), (dout, din), jnp.float32) * 0.1,
            spline_w=jax.random.normal(next(ki), (dout, din, coef), jnp.float32) * 0.1,
            scaler=jax.random.normal(next(ki), (dout, din), jnp.float32) * 0.1 + 1.0))
    return p


if __name__ == "__main__":
    B = 2
    input_channels = 4
    conv_out_channels = 8
    kernel_size = 3
    hidden_size = 32
    num_layers = 2
    output_size = 10
    seq_length = 16

    key = jax.random.PRNGKey(0)
    kx, kp = jax.random.split(key)
    x = jax.random.normal(kx, (B, input_channels, seq_length), jnp.float32)
    params = init_params(kp, input_channels, conv_out_channels, kernel_size,
                         hidden_size, num_layers, output_size)

    fwd = jax.jit(cnn_lstm_forward)
    out = jax.block_until_ready(fwd(params, x))
    assert out.shape == (B, output_size), out.shape
    assert bool(jnp.all(jnp.isfinite(out)))
    print("KERNEL_OK")
</pallas_src>

<mosaic_0001>
module attributes {stable_mosaic.version = 11 : i64} {
  func.func @_fused_kernel(%arg0: memref<128x128xf32, #tpu.memory_space<vmem>>, %arg1: memref<1800x128xf32, #tpu.memory_space<vmem>>, %arg2: memref<8x128xf32, #tpu.memory_space<vmem>>) attributes {dimension_semantics = [], scalar_prefetch = 0 : i64, scratch_operands = 0 : i64, tpu.core_type = #tpu.core_type<tc>} {
    %c352 = arith.constant 352 : index
    %c0 = arith.constant 0 : index
    %0 = vector.load %arg1[%c352, %c0] : memref<1800x128xf32, #tpu.memory_space<vmem>>, vector<8x128xf32>
    %1 = vector.extract_strided_slice %0 {offsets = [0, 0], sizes = [1, 128], strides = [1, 1]} : vector<8x128xf32> to vector<1x128xf32>
    %2 = vector.extract_strided_slice %0 {offsets = [1, 0], sizes = [1, 128], strides = [1, 1]} : vector<8x128xf32> to vector<1x128xf32>
    %3 = vector.extract_strided_slice %0 {offsets = [2, 0], sizes = [1, 128], strides = [1, 1]} : vector<8x128xf32> to vector<1x128xf32>
    %c0_0 = arith.constant 0 : index
    %c0_1 = arith.constant 0 : index
    %4 = vector.load %arg0[%c0_0, %c0_1] : memref<128x128xf32, #tpu.memory_space<vmem>>, vector<128x128xf32>
    %c0_2 = arith.constant 0 : index
    %c0_3 = arith.constant 0 : index
    %5 = vector.load %arg1[%c0_2, %c0_3] : memref<1800x128xf32, #tpu.memory_space<vmem>>, vector<128x128xf32>
    %cst = arith.constant dense<0.000000e+00> : vector<128x128xf32>
    %6 = tpu.matmul %4, %5, %cst {dimension_numbers = #tpu.dot_dimension_numbers<[1], [0], [0], [1], [0, 0, 1, 1], [], []>} : vector<128x128xf32>, vector<128x128xf32>, vector<128x128xf32> -> vector<128x128xf32>
    %7 = vector.extract_strided_slice %6 {offsets = [0, 0], sizes = [64, 128], strides = [1, 1]} : vector<128x128xf32> to vector<64x128xf32>
    %8 = vector.extract_strided_slice %6 {offsets = [64, 0], sizes = [64, 128], strides = [1, 1]} : vector<128x128xf32> to vector<64x128xf32>
    %9 = arith.maximumf %7, %8 : vector<64x128xf32>
    %10 = vector.broadcast %1 : vector<1x128xf32> to vector<64x128xf32>
    %11 = arith.addf %9, %10 : vector<64x128xf32>
    %cst_4 = arith.constant 0.000000e+00 : f32
    %12 = vector.broadcast %cst_4 : f32 to vector<64x128xf32>
    %13 = arith.maximumf %11, %12 : vector<64x128xf32>
    %c128 = arith.constant 128 : index
    %c0_5 = arith.constant 0 : index
    %14 = vector.load %arg1[%c128, %c0_5] : memref<1800x128xf32, #tpu.memory_space<vmem>>, vector<128x128xf32>
    %cst_6 = arith.constant dense<0.000000e+00> : vector<64x128xf32>
    %15 = tpu.matmul %13, %14, %cst_6 {dimension_numbers = #tpu.dot_dimension_numbers<[1], [0], [0], [1], [0, 0, 1, 1], [], []>} : vector<64x128xf32>, vector<128x128xf32>, vector<64x128xf32> -> vector<64x128xf32>
    %16 = vector.broadcast %2 : vector<1x128xf32> to vector<64x128xf32>
    %17 = arith.addf %15, %16 : vector<64x128xf32>
    %c256 = arith.constant 256 : index
    %c0_7 = arith.constant 0 : index
    %18 = vector.load %arg1[%c256, %c0_7] : memref<1800x128xf32, #tpu.memory_space<vmem>>, vector<32x128xf32>
    %19 = arith.truncf %18 : vector<32x128xf32> to vector<32x128xbf16>
    %c288 = arith.constant 288 : index
    %c0_8 = arith.constant 0 : index
    %20 = vector.load %arg1[%c288, %c0_8] : memref<1800x128xf32, #tpu.memory_space<vmem>>, vector<32x128xf32>
    %21 = arith.truncf %20 : vector<32x128xf32> to vector<32x128xbf16>
    %c320 = arith.constant 320 : index
    %c0_9 = arith.constant 0 : index
    %22 = vector.load %arg1[%c320, %c0_9] : memref<1800x128xf32, #tpu.memory_space<vmem>>, vector<32x128xf32>
    %23 = arith.truncf %22 : vector<32x128xf32> to vector<32x128xbf16>
    %cst_10 = arith.constant 0.000000e+00 : f32
    %24 = vector.broadcast %cst_10 : f32 to vector<8x32xf32>
    %cst_11 = arith.constant 0.000000e+00 : f32
    %25 = vector.broadcast %cst_11 : f32 to vector<8x32xf32>
    %cst_12 = arith.constant 0.000000e+00 : f32
    %26 = vector.broadcast %cst_12 : f32 to vector<8x32xf32>
    %cst_13 = arith.constant 0.000000e+00 : f32
    %27 = vector.broadcast %cst_13 : f32 to vector<8x32xf32>
    %28 = vector.extract_strided_slice %17 {offsets = [0, 0], sizes = [8, 128], strides = [1, 1]} : vector<64x128xf32> to vector<8x128xf32>
    %29 = arith.truncf %24 : vector<8x32xf32> to vector<8x32xbf16>
    %cst_14 = arith.constant dense<0.000000e+00> : vector<8x128xf32>
    %30 = tpu.matmul %29, %19, %cst_14 {dimension_numbers = #tpu.dot_dimension_numbers<[1], [0], [0], [1], [0, 0, 1, 1], [], []>} : vector<8x32xbf16>, vector<32x128xbf16>, vector<8x128xf32> -> vector<8x128xf32>
    %31 = arith.addf %28, %30 : vector<8x128xf32>
    %32 = arith.negf %31 : vector<8x128xf32>
    %33 = math.exp %32 : vector<8x128xf32>
    %cst_15 = arith.constant 1.000000e+00 : f32
    %34 = vector.broadcast %cst_15 : f32 to vector<8x128xf32>
    %35 = arith.addf %34, %33 : vector<8x128xf32>
    %36 = arith.divf %34, %35 : vector<8x128xf32>
    %37 = vector.extract_strided_slice %36 {offsets = [0, 0], sizes = [8, 32], strides = [1, 1]} : vector<8x128xf32> to vector<8x32xf32>
    %38 = vector.extract_strided_slice %36 {offsets = [0, 32], sizes = [8, 32], strides = [1, 1]} : vector<8x128xf32> to vector<8x32xf32>
    %39 = vector.extract_strided_slice %36 {offsets = [0, 96], sizes = [8, 32], strides = [1, 1]} : vector<8x128xf32> to vector<8x32xf32>
    %40 = vector.extract_strided_slice %36 {offsets = [0, 64], sizes = [8, 32], strides = [1, 1]} : vector<8x128xf32> to vector<8x32xf32>
    %cst_16 = arith.constant 2.000000e+00 : f32
    %41 = vector.broadcast %cst_16 : f32 to vector<8x32xf32>
    %42 = arith.mulf %41, %40 : vector<8x32xf32>
    %cst_17 = arith.constant 1.000000e+00 : f32
    %43 = vector.broadcast %cst_17 : f32 to vector<8x32xf32>
    %44 = arith.subf %42, %43 : vector<8x32xf32>
    %45 = arith.mulf %38, %25 : vector<8x32xf32>
    %46 = arith.mulf %37, %44 : vector<8x32xf32>
    %47 = arith.addf %45, %46 : vector<8x32xf32>
    %48 = math.tanh %47 : vector<8x32xf32>
    %49 = arith.mulf %39, %48 : vector<8x32xf32>
    %50 = arith.truncf %49 : vector<8x32xf32> to vector<8x32xbf16>
    %cst_18 = arith.constant dense<0.000000e+00> : vector<8x128xf32>
    %51 = tpu.matmul %50, %21, %cst_18 {dimension_numbers = #tpu.dot_dimension_numbers<[1], [0], [0], [1], [0, 0, 1, 1], [], []>} : vector<8x32xbf16>, vector<32x128xbf16>, vector<8x128xf32> -> vector<8x128xf32>
    %52 = vector.broadcast %3 : vector<1x128xf32> to vector<8x128xf32>
    %53 = arith.addf %52, %51 : vector<8x128xf32>
    %54 = arith.truncf %26 : vector<8x32xf32> to vector<8x32xbf16>
    %cst_19 = arith.constant dense<0.000000e+00> : vector<8x128xf32>
    %55 = tpu.matmul %54, %23, %cst_19 {dimension_numbers = #tpu.dot_dimension_numbers<[1], [0], [0], [1], [0, 0, 1, 1], [], []>} : vector<8x32xbf16>, vector<32x128xbf16>, vector<8x128xf32> -> vector<8x128xf32>
    %56 = arith.addf %53, %55 : vector<8x128xf32>
    %57 = arith.negf %56 : vector<8x128xf32>
    %58 = math.exp %57 : vector<8x128xf32>
    %cst_20 = arith.constant 1.000000e+00 : f32
    %59 = vector.broadcast %cst_20 : f32 to vector<8x128xf32>
    %60 = arith.addf %59, %58 : vector<8x128xf32>
    %61 = arith.divf %59, %60 : vector<8x128xf32>
    %62 = vector.extract_strided_slice %61 {offsets = [0, 0], sizes = [8, 32], strides = [1, 1]} : vector<8x128xf32> to vector<8x32xf32>
    %63 = vector.extract_strided_slice %61 {offsets = [0, 32], sizes = [8, 32], strides = [1, 1]} : vector<8x128xf32> to vector<8x32xf32>
    %64 = vector.extract_strided_slice %61 {offsets = [0, 96], sizes = [8, 32], strides = [1, 1]} : vector<8x128xf32> to vector<8x32xf32>
    %65 = vector.extract_strided_slice %61 {offsets = [0, 64], sizes = [8, 32], strides = [1, 1]} : vector<8x128xf32> to vector<8x32xf32>
    %cst_21 = arith.constant 2.000000e+00 : f32
    %66 = vector.broadcast %cst_21 : f32 to vector<8x32xf32>
    %67 = arith.mulf %66, %65 : vector<8x32xf32>
    %cst_22 = arith.constant 1.000000e+00 : f32
    %68 = vector.broadcast %cst_22 : f32 to vector<8x32xf32>
    %69 = arith.subf %67, %68 : vector<8x32xf32>
    %70 = arith.mulf %63, %27 : vector<8x32xf32>
    %71 = arith.mulf %62, %69 : vector<8x32xf32>
    %72 = arith.addf %70, %71 : vector<8x32xf32>
    %73 = math.tanh %72 : vector<8x32xf32>
    %74 = arith.mulf %64, %73 : vector<8x32xf32>
    %75 = vector.extract_strided_slice %17 {offsets = [8, 0], sizes = [8, 128], strides = [1, 1]} : vector<64x128xf32> to vector<8x128xf32>
    %76 = arith.truncf %49 : vector<8x32xf32> to vector<8x32xbf16>
    %cst_23 = arith.constant dense<0.000000e+00> : vector<8x128xf32>
    %77 = tpu.matmul %76, %19, %cst_23 {dimension_numbers = #tpu.dot_dimension_numbers<[1], [0], [0], [1], [0, 0, 1, 1], [], []>} : vector<8x32xbf16>, vector<32x128xbf16>, vector<8x128xf32> -> vector<8x128xf32>
    %78 = arith.addf %75, %77 : vector<8x128xf32>
    %79 = arith.negf %78 : vector<8x128xf32>
    %80 = math.exp %79 : vector<8x128xf32>
    %cst_24 = arith.constant 1.000000e+00 : f32
    %81 = vector.broadcast %cst_24 : f32 to vector<8x128xf32>
    %82 = arith.addf %81, %80 : vector<8x128xf32>
    %83 = arith.divf %81, %82 : vector<8x128xf32>
    %84 = vector.extract_strided_slice %83 {offsets = [0, 0], sizes = [8, 32], strides = [1, 1]} : vector<8x128xf32> to vector<8x32xf32>
    %85 = vector.extract_strided_slice %83 {offsets = [0, 32], sizes = [8, 32], strides = [1, 1]} : vector<8x128xf32> to vector<8x32xf32>
    %86 = vector.extract_strided_slice %83 {offsets = [0, 96], sizes = [8, 32], strides = [1, 1]} : vector<8x128xf32> to vector<8x32xf32>
    %87 = vector.extract_strided_slice %83 {offsets = [0, 64], sizes = [8, 32], strides = [1, 1]} : vector<8x128xf32> to vector<8x32xf32>
    %cst_25 = arith.constant 2.000000e+00 : f32
    %88 = vector.broadcast %cst_25 : f32 to vector<8x32xf32>
    %89 = arith.mulf %88, %87 : vector<8x32xf32>
    %cst_26 = arith.constant 1.000000e+00 : f32
    %90 = vector.broadcast %cst_26 : f32 to vector<8x32xf32>
    %91 = arith.subf %89, %90 : vector<8x32xf32>
    %92 = arith.mulf %85, %47 : vector<8x32xf32>
    %93 = arith.mulf %84, %91 : vector<8x32xf32>
    %94 = arith.addf %92, %93 : vector<8x32xf32>
    %95 = math.tanh %94 : vector<8x32xf32>
    %96 = arith.mulf %86, %95 : vector<8x32xf32>
    %97 = arith.truncf %96 : vector<8x32xf32> to vector<8x32xbf16>
    %cst_27 = arith.constant dense<0.000000e+00> : vector<8x128xf32>
    %98 = tpu.matmul %97, %21, %cst_27 {dimension_numbers = #tpu.dot_dimension_numbers<[1], [0], [0], [1], [0, 0, 1, 1], [], []>} : vector<8x32xbf16>, vector<32x128xbf16>, vector<8x128xf32> -> vector<8x128xf32>
    %99 = vector.broadcast %3 : vector<1x128xf32> to vector<8x128xf32>
    %100 = arith.addf %99, %98 : vector<8x128xf32>
    %101 = arith.truncf %74 : vector<8x32xf32> to vector<8x32xbf16>
    %cst_28 = arith.constant dense<0.000000e+00> : vector<8x128xf32>
    %102 = tpu.matmul %101, %23, %cst_28 {dimension_numbers = #tpu.dot_dimension_numbers<[1], [0], [0], [1], [0, 0, 1, 1], [], []>} : vector<8x32xbf16>, vector<32x128xbf16>, vector<8x128xf32> -> vector<8x128xf32>
    %103 = arith.addf %100, %102 : vector<8x128xf32>
    %104 = arith.negf %103 : vector<8x128xf32>
    %105 = math.exp %104 : vector<8x128xf32>
    %cst_29 = arith.constant 1.000000e+00 : f32
    %106 = vector.broadcast %cst_29 : f32 to vector<8x128xf32>
    %107 = arith.addf %106, %105 : vector<8x128xf32>
    %108 = arith.divf %106, %107 : vector<8x128xf32>
    %109 = vector.extract_strided_slice %108 {offsets = [0, 0], sizes = [8, 32], strides = [1, 1]} : vector<8x128xf32> to vector<8x32xf32>
    %110 = vector.extract_strided_slice %108 {offsets = [0, 32], sizes = [8, 32], strides = [1, 1]} : vector<8x128xf32> to vector<8x32xf32>
    %111 = vector.extract_strided_slice %108 {offsets = [0, 96], sizes = [8, 32], strides = [1, 1]} : vector<8x128xf32> to vector<8x32xf32>
    %112 = vector.extract_strided_slice %108 {offsets = [0, 64], sizes = [8, 32], strides = [1, 1]} : vector<8x128xf32> to vector<8x32xf32>
    %cst_30 = arith.constant 2.000000e+00 : f32
    %113 = vector.broadcast %cst_30 : f32 to vector<8x32xf32>
    %114 = arith.mulf %113, %112 : vector<8x32xf32>
    %cst_31 = arith.constant 1.000000e+00 : f32
    %115 = vector.broadcast %cst_31 : f32 to vector<8x32xf32>
    %116 = arith.subf %114, %115 : vector<8x32xf32>
    %117 = arith.mulf %110, %72 : vector<8x32xf32>
    %118 = arith.mulf %109, %116 : vector<8x32xf32>
    %119 = arith.addf %117, %118 : vector<8x32xf32>
    %120 = math.tanh %119 : vector<8x32xf32>
    %121 = arith.mulf %111, %120 : vector<8x32xf32>
    %122 = vector.extract_strided_slice %17 {offsets = [16, 0], sizes = [8, 128], strides = [1, 1]} : vector<64x128xf32> to vector<8x128xf32>
    %123 = arith.truncf %96 : vector<8x32xf32> to vector<8x32xbf16>
    %cst_32 = arith.constant dense<0.000000e+00> : vector<8x128xf32>
    %124 = tpu.matmul %123, %19, %cst_32 {dimension_numbers = #tpu.dot_dimension_numbers<[1], [0], [0], [1], [0, 0, 1, 1], [], []>} : vector<8x32xbf16>, vector<32x128xbf16>, vector<8x128xf32> -> vector<8x128xf32>
    %125 = arith.addf %122, %124 : vector<8x128xf32>
    %126 = arith.negf %125 : vector<8x128xf32>
    %127 = math.exp %126 : vector<8x128xf32>
    %cst_33 = arith.constant 1.000000e+00 : f32
    %128 = vector.broadcast %cst_33 : f32 to vector<8x128xf32>
    %129 = arith.addf %128, %127 : vector<8x128xf32>
    %130 = arith.divf %128, %129 : vector<8x128xf32>
    %131 = vector.extract_strided_slice %130 {offsets = [0, 0], sizes = [8, 32], strides = [1, 1]} : vector<8x128xf32> to vector<8x32xf32>
    %132 = vector.extract_strided_slice %130 {offsets = [0, 32], sizes = [8, 32], strides = [1, 1]} : vector<8x128xf32> to vector<8x32xf32>
    %133 = vector.extract_strided_slice %130 {offsets = [0, 96], sizes = [8, 32], strides = [1, 1]} : vector<8x128xf32> to vector<8x32xf32>
    %134 = vector.extract_strided_slice %130 {offsets = [0, 64], sizes = [8, 32], strides = [1, 1]} : vector<8x128xf32> to vector<8x32xf32>
    %cst_34 = arith.constant 2.000000e+00 : f32
    %135 = vector.broadcast %cst_34 : f32 to vector<8x32xf32>
    %136 = arith.mulf %135, %134 : vector<8x32xf32>
    %cst_35 = arith.constant 1.000000e+00 : f32
    %137 = vector.broadcast %cst_35 : f32 to vector<8x32xf32>
    %138 = arith.subf %136, %137 : vector<8x32xf32>
    %139 = arith.mulf %132, %94 : vector<8x32xf32>
    %140 = arith.mulf %131, %138 : vector<8x32xf32>
    %141 = arith.addf %139, %140 : vector<8x32xf32>
    %142 = math.tanh %141 : vector<8x32xf32>
    %143 = arith.mulf %133, %142 : vector<8x32xf32>
    %144 = arith.truncf %143 : vector<8x32xf32> to vector<8x32xbf16>
    %cst_36 = arith.constant dense<0.000000e+00> : vector<8x128xf32>
    %145 = tpu.matmul %144, %21, %cst_36 {dimension_numbers = #tpu.dot_dimension_numbers<[1], [0], [0], [1], [0, 0, 1, 1], [], []>} : vector<8x32xbf16>, vector<32x128xbf16>, vector<8x128xf32> -> vector<8x128xf32>
    %146 = vector.broadcast %3 : vector<1x128xf32> to vector<8x128xf32>
    %147 = arith.addf %146, %145 : vector<8x128xf32>
    %148 = arith.truncf %121 : vector<8x32xf32> to vector<8x32xbf16>
    %cst_37 = arith.constant dense<0.000000e+00> : vector<8x128xf32>
    %149 = tpu.matmul %148, %23, %cst_37 {dimension_numbers = #tpu.dot_dimension_numbers<[1], [0], [0], [1], [0, 0, 1, 1], [], []>} : vector<8x32xbf16>, vector<32x128xbf16>, vector<8x128xf32> -> vector<8x128xf32>
    %150 = arith.addf %147, %149 : vector<8x128xf32>
    %151 = arith.negf %150 : vector<8x128xf32>
    %152 = math.exp %151 : vector<8x128xf32>
    %cst_38 = arith.constant 1.000000e+00 : f32
    %153 = vector.broadcast %cst_38 : f32 to vector<8x128xf32>
    %154 = arith.addf %153, %152 : vector<8x128xf32>
    %155 = arith.divf %153, %154 : vector<8x128xf32>
    %156 = vector.extract_strided_slice %155 {offsets = [0, 0], sizes = [8, 32], strides = [1, 1]} : vector<8x128xf32> to vector<8x32xf32>
    %157 = vector.extract_strided_slice %155 {offsets = [0, 32], sizes = [8, 32], strides = [1, 1]} : vector<8x128xf32> to vector<8x32xf32>
    %158 = vector.extract_strided_slice %155 {offsets = [0, 96], sizes = [8, 32], strides = [1, 1]} : vector<8x128xf32> to vector<8x32xf32>
    %159 = vector.extract_strided_slice %155 {offsets = [0, 64], sizes = [8, 32], strides = [1, 1]} : vector<8x128xf32> to vector<8x32xf32>
    %cst_39 = arith.constant 2.000000e+00 : f32
    %160 = vector.broadcast %cst_39 : f32 to vector<8x32xf32>
    %161 = arith.mulf %160, %159 : vector<8x32xf32>
    %cst_40 = arith.constant 1.000000e+00 : f32
    %162 = vector.broadcast %cst_40 : f32 to vector<8x32xf32>
    %163 = arith.subf %161, %162 : vector<8x32xf32>
    %164 = arith.mulf %157, %119 : vector<8x32xf32>
    %165 = arith.mulf %156, %163 : vector<8x32xf32>
    %166 = arith.addf %164, %165 : vector<8x32xf32>
    %167 = math.tanh %166 : vector<8x32xf32>
    %168 = arith.mulf %158, %167 : vector<8x32xf32>
    %169 = vector.extract_strided_slice %17 {offsets = [24, 0], sizes = [8, 128], strides = [1, 1]} : vector<64x128xf32> to vector<8x128xf32>
    %170 = arith.truncf %143 : vector<8x32xf32> to vector<8x32xbf16>
    %cst_41 = arith.constant dense<0.000000e+00> : vector<8x128xf32>
    %171 = tpu.matmul %170, %19, %cst_41 {dimension_numbers = #tpu.dot_dimension_numbers<[1], [0], [0], [1], [0, 0, 1, 1], [], []>} : vector<8x32xbf16>, vector<32x128xbf16>, vector<8x128xf32> -> vector<8x128xf32>
    %172 = arith.addf %169, %171 : vector<8x128xf32>
    %173 = arith.negf %172 : vector<8x128xf32>
    %174 = math.exp %173 : vector<8x128xf32>
    %cst_42 = arith.constant 1.000000e+00 : f32
    %175 = vector.broadcast %cst_42 : f32 to vector<8x128xf32>
    %176 = arith.addf %175, %174 : vector<8x128xf32>
    %177 = arith.divf %175, %176 : vector<8x128xf32>
    %178 = vector.extract_strided_slice %177 {offsets = [0, 0], sizes = [8, 32], strides = [1, 1]} : vector<8x128xf32> to vector<8x32xf32>
    %179 = vector.extract_strided_slice %177 {offsets = [0, 32], sizes = [8, 32], strides = [1, 1]} : vector<8x128xf32> to vector<8x32xf32>
    %180 = vector.extract_strided_slice %177 {offsets = [0, 96], sizes = [8, 32], strides = [1, 1]} : vector<8x128xf32> to vector<8x32xf32>
    %181 = vector.extract_strided_slice %177 {offsets = [0, 64], sizes = [8, 32], strides = [1, 1]} : vector<8x128xf32> to vector<8x32xf32>
    %cst_43 = arith.constant 2.000000e+00 : f32
    %182 = vector.broadcast %cst_43 : f32 to vector<8x32xf32>
    %183 = arith.mulf %182, %181 : vector<8x32xf32>
    %cst_44 = arith.constant 1.000000e+00 : f32
    %184 = vector.broadcast %cst_44 : f32 to vector<8x32xf32>
    %185 = arith.subf %183, %184 : vector<8x32xf32>
    %186 = arith.mulf %179, %141 : vector<8x32xf32>
    %187 = arith.mulf %178, %185 : vector<8x32xf32>
    %188 = arith.addf %186, %187 : vector<8x32xf32>
    %189 = math.tanh %188 : vector<8x32xf32>
    %190 = arith.mulf %180, %189 : vector<8x32xf32>
    %191 = arith.truncf %190 : vector<8x32xf32> to vector<8x32xbf16>
    %cst_45 = arith.constant dense<0.000000e+00> : vector<8x128xf32>
    %192 = tpu.matmul %191, %21, %cst_45 {dimension_numbers = #tpu.dot_dimension_numbers<[1], [0], [0], [1], [0, 0, 1, 1], [], []>} : vector<8x32xbf16>, vector<32x128xbf16>, vector<8x128xf32> -> vector<8x128xf32>
    %193 = vector.broadcast %3 : vector<1x128xf32> to vector<8x128xf32>
    %194 = arith.addf %193, %192 : vector<8x128xf32>
    %195 = arith.truncf %168 : vector<8x32xf32> to vector<8x32xbf16>
    %cst_46 = arith.constant dense<0.000000e+00> : vector<8x128xf32>
    %196 = tpu.matmul %195, %23, %cst_46 {dimension_numbers = #tpu.dot_dimension_numbers<[1], [0], [0], [1], [0, 0, 1, 1], [], []>} : vector<8x32xbf16>, vector<32x128xbf16>, vector<8x128xf32> -> vector<8x128xf32>
    %197 = arith.addf %194, %196 : vector<8x128xf32>
    %198 = arith.negf %197 : vector<8x128xf32>
    %199 = math.exp %198 : vector<8x128xf32>
    %cst_47 = arith.constant 1.000000e+00 : f32
    %200 = vector.broadcast %cst_47 : f32 to vector<8x128xf32>
    %201 = arith.addf %200, %199 : vector<8x128xf32>
    %202 = arith.divf %200, %201 : vector<8x128xf32>
    %203 = vector.extract_strided_slice %202 {offsets = [0, 0], sizes = [8, 32], strides = [1, 1]} : vector<8x128xf32> to vector<8x32xf32>
    %204 = vector.extract_strided_slice %202 {offsets = [0, 32], sizes = [8, 32], strides = [1, 1]} : vector<8x128xf32> to vector<8x32xf32>
    %205 = vector.extract_strided_slice %202 {offsets = [0, 96], sizes = [8, 32], strides = [1, 1]} : vector<8x128xf32> to vector<8x32xf32>
    %206 = vector.extract_strided_slice %202 {offsets = [0, 64], sizes = [8, 32], strides = [1, 1]} : vector<8x128xf32> to vector<8x32xf32>
    %cst_48 = arith.constant 2.000000e+00 : f32
    %207 = vector.broadcast %cst_48 : f32 to vector<8x32xf32>
    %208 = arith.mulf %207, %206 : vector<8x32xf32>
    %cst_49 = arith.constant 1.000000e+00 : f32
    %209 = vector.broadcast %cst_49 : f32 to vector<8x32xf32>
    %210 = arith.subf %208, %209 : vector<8x32xf32>
    %211 = arith.mulf %204, %166 : vector<8x32xf32>
    %212 = arith.mulf %203, %210 : vector<8x32xf32>
    %213 = arith.addf %211, %212 : vector<8x32xf32>
    %214 = math.tanh %213 : vector<8x32xf32>
    %215 = arith.mulf %205, %214 : vector<8x32xf32>
    %216 = vector.extract_strided_slice %17 {offsets = [32, 0], sizes = [8, 128], strides = [1, 1]} : vector<64x128xf32> to vector<8x128xf32>
    %217 = arith.truncf %190 : vector<8x32xf32> to vector<8x32xbf16>
    %cst_50 = arith.constant dense<0.000000e+00> : vector<8x128xf32>
    %218 = tpu.matmul %217, %19, %cst_50 {dimension_numbers = #tpu.dot_dimension_numbers<[1], [0], [0], [1], [0, 0, 1, 1], [], []>} : vector<8x32xbf16>, vector<32x128xbf16>, vector<8x128xf32> -> vector<8x128xf32>
    %219 = arith.addf %216, %218 : vector<8x128xf32>
    %220 = arith.negf %219 : vector<8x128xf32>
    %221 = math.exp %220 : vector<8x128xf32>
    %cst_51 = arith.constant 1.000000e+00 : f32
    %222 = vector.broadcast %cst_51 : f32 to vector<8x128xf32>
    %223 = arith.addf %222, %221 : vector<8x128xf32>
    %224 = arith.divf %222, %223 : vector<8x128xf32>
    %225 = vector.extract_strided_slice %224 {offsets = [0, 0], sizes = [8, 32], strides = [1, 1]} : vector<8x128xf32> to vector<8x32xf32>
    %226 = vector.extract_strided_slice %224 {offsets = [0, 32], sizes = [8, 32], strides = [1, 1]} : vector<8x128xf32> to vector<8x32xf32>
    %227 = vector.extract_strided_slice %224 {offsets = [0, 96], sizes = [8, 32], strides = [1, 1]} : vector<8x128xf32> to vector<8x32xf32>
    %228 = vector.extract_strided_slice %224 {offsets = [0, 64], sizes = [8, 32], strides = [1, 1]} : vector<8x128xf32> to vector<8x32xf32>
    %cst_52 = arith.constant 2.000000e+00 : f32
    %229 = vector.broadcast %cst_52 : f32 to vector<8x32xf32>
    %230 = arith.mulf %229, %228 : vector<8x32xf32>
    %cst_53 = arith.constant 1.000000e+00 : f32
    %231 = vector.broadcast %cst_53 : f32 to vector<8x32xf32>
    %232 = arith.subf %230, %231 : vector<8x32xf32>
    %233 = arith.mulf %226, %188 : vector<8x32xf32>
    %234 = arith.mulf %225, %232 : vector<8x32xf32>
    %235 = arith.addf %233, %234 : vector<8x32xf32>
    %236 = math.tanh %235 : vector<8x32xf32>
    %237 = arith.mulf %227, %236 : vector<8x32xf32>
    %238 = arith.truncf %237 : vector<8x32xf32> to vector<8x32xbf16>
    %cst_54 = arith.constant dense<0.000000e+00> : vector<8x128xf32>
    %239 = tpu.matmul %238, %21, %cst_54 {dimension_numbers = #tpu.dot_dimension_numbers<[1], [0], [0], [1], [0, 0, 1, 1], [], []>} : vector<8x32xbf16>, vector<32x128xbf16>, vector<8x128xf32> -> vector<8x128xf32>
    %240 = vector.broadcast %3 : vector<1x128xf32> to vector<8x128xf32>
    %241 = arith.addf %240, %239 : vector<8x128xf32>
    %242 = arith.truncf %215 : vector<8x32xf32> to vector<8x32xbf16>
    %cst_55 = arith.constant dense<0.000000e+00> : vector<8x128xf32>
    %243 = tpu.matmul %242, %23, %cst_55 {dimension_numbers = #tpu.dot_dimension_numbers<[1], [0], [0], [1], [0, 0, 1, 1], [], []>} : vector<8x32xbf16>, vector<32x128xbf16>, vector<8x128xf32> -> vector<8x128xf32>
    %244 = arith.addf %241, %243 : vector<8x128xf32>
    %245 = arith.negf %244 : vector<8x128xf32>
    %246 = math.exp %245 : vector<8x128xf32>
    %cst_56 = arith.constant 1.000000e+00 : f32
    %247 = vector.broadcast %cst_56 : f32 to vector<8x128xf32>
    %248 = arith.addf %247, %246 : vector<8x128xf32>
    %249 = arith.divf %247, %248 : vector<8x128xf32>
    %250 = vector.extract_strided_slice %249 {offsets = [0, 0], sizes = [8, 32], strides = [1, 1]} : vector<8x128xf32> to vector<8x32xf32>
    %251 = vector.extract_strided_slice %249 {offsets = [0, 32], sizes = [8, 32], strides = [1, 1]} : vector<8x128xf32> to vector<8x32xf32>
    %252 = vector.extract_strided_slice %249 {offsets = [0, 96], sizes = [8, 32], strides = [1, 1]} : vector<8x128xf32> to vector<8x32xf32>
    %253 = vector.extract_strided_slice %249 {offsets = [0, 64], sizes = [8, 32], strides = [1, 1]} : vector<8x128xf32> to vector<8x32xf32>
    %cst_57 = arith.constant 2.000000e+00 : f32
    %254 = vector.broadcast %cst_57 : f32 to vector<8x32xf32>
    %255 = arith.mulf %254, %253 : vector<8x32xf32>
    %cst_58 = arith.constant 1.000000e+00 : f32
    %256 = vector.broadcast %cst_58 : f32 to vector<8x32xf32>
    %257 = arith.subf %255, %256 : vector<8x32xf32>
    %258 = arith.mulf %251, %213 : vector<8x32xf32>
    %259 = arith.mulf %250, %257 : vector<8x32xf32>
    %260 = arith.addf %258, %259 : vector<8x32xf32>
    %261 = math.tanh %260 : vector<8x32xf32>
    %262 = arith.mulf %252, %261 : vector<8x32xf32>
    %263 = vector.extract_strided_slice %17 {offsets = [40, 0], sizes = [8, 128], strides = [1, 1]} : vector<64x128xf32> to vector<8x128xf32>
    %264 = arith.truncf %237 : vector<8x32xf32> to vector<8x32xbf16>
    %cst_59 = arith.constant dense<0.000000e+00> : vector<8x128xf32>
    %265 = tpu.matmul %264, %19, %cst_59 {dimension_numbers = #tpu.dot_dimension_numbers<[1], [0], [0], [1], [0, 0, 1, 1], [], []>} : vector<8x32xbf16>, vector<32x128xbf16>, vector<8x128xf32> -> vector<8x128xf32>
    %266 = arith.addf %263, %265 : vector<8x128xf32>
    %267 = arith.negf %266 : vector<8x128xf32>
    %268 = math.exp %267 : vector<8x128xf32>
    %cst_60 = arith.constant 1.000000e+00 : f32
    %269 = vector.broadcast %cst_60 : f32 to vector<8x128xf32>
    %270 = arith.addf %269, %268 : vector<8x128xf32>
    %271 = arith.divf %269, %270 : vector<8x128xf32>
    %272 = vector.extract_strided_slice %271 {offsets = [0, 0], sizes = [8, 32], strides = [1, 1]} : vector<8x128xf32> to vector<8x32xf32>
    %273 = vector.extract_strided_slice %271 {offsets = [0, 32], sizes = [8, 32], strides = [1, 1]} : vector<8x128xf32> to vector<8x32xf32>
    %274 = vector.extract_strided_slice %271 {offsets = [0, 96], sizes = [8, 32], strides = [1, 1]} : vector<8x128xf32> to vector<8x32xf32>
    %275 = vector.extract_strided_slice %271 {offsets = [0, 64], sizes = [8, 32], strides = [1, 1]} : vector<8x128xf32> to vector<8x32xf32>
    %cst_61 = arith.constant 2.000000e+00 : f32
    %276 = vector.broadcast %cst_61 : f32 to vector<8x32xf32>
    %277 = arith.mulf %276, %275 : vector<8x32xf32>
    %cst_62 = arith.constant 1.000000e+00 : f32
    %278 = vector.broadcast %cst_62 : f32 to vector<8x32xf32>
    %279 = arith.subf %277, %278 : vector<8x32xf32>
    %280 = arith.mulf %273, %235 : vector<8x32xf32>
    %281 = arith.mulf %272, %279 : vector<8x32xf32>
    %282 = arith.addf %280, %281 : vector<8x32xf32>
    %283 = math.tanh %282 : vector<8x32xf32>
    %284 = arith.mulf %274, %283 : vector<8x32xf32>
    %285 = arith.truncf %284 : vector<8x32xf32> to vector<8x32xbf16>
    %cst_63 = arith.constant dense<0.000000e+00> : vector<8x128xf32>
    %286 = tpu.matmul %285, %21, %cst_63 {dimension_numbers = #tpu.dot_dimension_numbers<[1], [0], [0], [1], [0, 0, 1, 1], [], []>} : vector<8x32xbf16>, vector<32x128xbf16>, vector<8x128xf32> -> vector<8x128xf32>
    %287 = vector.broadcast %3 : vector<1x128xf32> to vector<8x128xf32>
    %288 = arith.addf %287, %286 : vector<8x128xf32>
    %289 = arith.truncf %262 : vector<8x32xf32> to vector<8x32xbf16>
    %cst_64 = arith.constant dense<0.000000e+00> : vector<8x128xf32>
    %290 = tpu.matmul %289, %23, %cst_64 {dimension_numbers = #tpu.dot_dimension_numbers<[1], [0], [0], [1], [0, 0, 1, 1], [], []>} : vector<8x32xbf16>, vector<32x128xbf16>, vector<8x128xf32> -> vector<8x128xf32>
    %291 = arith.addf %288, %290 : vector<8x128xf32>
    %292 = arith.negf %291 : vector<8x128xf32>
    %293 = math.exp %292 : vector<8x128xf32>
    %cst_65 = arith.constant 1.000000e+00 : f32
    %294 = vector.broadcast %cst_65 : f32 to vector<8x128xf32>
    %295 = arith.addf %294, %293 : vector<8x128xf32>
    %296 = arith.divf %294, %295 : vector<8x128xf32>
    %297 = vector.extract_strided_slice %296 {offsets = [0, 0], sizes = [8, 32], strides = [1, 1]} : vector<8x128xf32> to vector<8x32xf32>
    %298 = vector.extract_strided_slice %296 {offsets = [0, 32], sizes = [8, 32], strides = [1, 1]} : vector<8x128xf32> to vector<8x32xf32>
    %299 = vector.extract_strided_slice %296 {offsets = [0, 96], sizes = [8, 32], strides = [1, 1]} : vector<8x128xf32> to vector<8x32xf32>
    %300 = vector.extract_strided_slice %296 {offsets = [0, 64], sizes = [8, 32], strides = [1, 1]} : vector<8x128xf32> to vector<8x32xf32>
    %cst_66 = arith.constant 2.000000e+00 : f32
    %301 = vector.broadcast %cst_66 : f32 to vector<8x32xf32>
    %302 = arith.mulf %301, %300 : vector<8x32xf32>
    %cst_67 = arith.constant 1.000000e+00 : f32
    %303 = vector.broadcast %cst_67 : f32 to vector<8x32xf32>
    %304 = arith.subf %302, %303 : vector<8x32xf32>
    %305 = arith.mulf %298, %260 : vector<8x32xf32>
    %306 = arith.mulf %297, %304 : vector<8x32xf32>
    %307 = arith.addf %305, %306 : vector<8x32xf32>
    %308 = math.tanh %307 : vector<8x32xf32>
    %309 = arith.mulf %299, %308 : vector<8x32xf32>
    %310 = vector.extract_strided_slice %17 {offsets = [48, 0], sizes = [8, 128], strides = [1, 1]} : vector<64x128xf32> to vector<8x128xf32>
    %311 = arith.truncf %284 : vector<8x32xf32> to vector<8x32xbf16>
    %cst_68 = arith.constant dense<0.000000e+00> : vector<8x128xf32>
    %312 = tpu.matmul %311, %19, %cst_68 {dimension_numbers = #tpu.dot_dimension_numbers<[1], [0], [0], [1], [0, 0, 1, 1], [], []>} : vector<8x32xbf16>, vector<32x128xbf16>, vector<8x128xf32> -> vector<8x128xf32>
    %313 = arith.addf %310, %312 : vector<8x128xf32>
    %314 = arith.negf %313 : vector<8x128xf32>
    %315 = math.exp %314 : vector<8x128xf32>
    %cst_69 = arith.constant 1.000000e+00 : f32
    %316 = vector.broadcast %cst_69 : f32 to vector<8x128xf32>
    %317 = arith.addf %316, %315 : vector<8x128xf32>
    %318 = arith.divf %316, %317 : vector<8x128xf32>
    %319 = vector.extract_strided_slice %318 {offsets = [0, 0], sizes = [8, 32], strides = [1, 1]} : vector<8x128xf32> to vector<8x32xf32>
    %320 = vector.extract_strided_slice %318 {offsets = [0, 32], sizes = [8, 32], strides = [1, 1]} : vector<8x128xf32> to vector<8x32xf32>
    %321 = vector.extract_strided_slice %318 {offsets = [0, 96], sizes = [8, 32], strides = [1, 1]} : vector<8x128xf32> to vector<8x32xf32>
    %322 = vector.extract_strided_slice %318 {offsets = [0, 64], sizes = [8, 32], strides = [1, 1]} : vector<8x128xf32> to vector<8x32xf32>
    %cst_70 = arith.constant 2.000000e+00 : f32
    %323 = vector.broadcast %cst_70 : f32 to vector<8x32xf32>
    %324 = arith.mulf %323, %322 : vector<8x32xf32>
    %cst_71 = arith.constant 1.000000e+00 : f32
    %325 = vector.broadcast %cst_71 : f32 to vector<8x32xf32>
    %326 = arith.subf %324, %325 : vector<8x32xf32>
    %327 = arith.mulf %320, %282 : vector<8x32xf32>
    %328 = arith.mulf %319, %326 : vector<8x32xf32>
    %329 = arith.addf %327, %328 : vector<8x32xf32>
    %330 = math.tanh %329 : vector<8x32xf32>
    %331 = arith.mulf %321, %330 : vector<8x32xf32>
    %332 = arith.truncf %331 : vector<8x32xf32> to vector<8x32xbf16>
    %cst_72 = arith.constant dense<0.000000e+00> : vector<8x128xf32>
    %333 = tpu.matmul %332, %21, %cst_72 {dimension_numbers = #tpu.dot_dimension_numbers<[1], [0], [0], [1], [0, 0, 1, 1], [], []>} : vector<8x32xbf16>, vector<32x128xbf16>, vector<8x128xf32> -> vector<8x128xf32>
    %334 = vector.broadcast %3 : vector<1x128xf32> to vector<8x128xf32>
    %335 = arith.addf %334, %333 : vector<8x128xf32>
    %336 = arith.truncf %309 : vector<8x32xf32> to vector<8x32xbf16>
    %cst_73 = arith.constant dense<0.000000e+00> : vector<8x128xf32>
    %337 = tpu.matmul %336, %23, %cst_73 {dimension_numbers = #tpu.dot_dimension_numbers<[1], [0], [0], [1], [0, 0, 1, 1], [], []>} : vector<8x32xbf16>, vector<32x128xbf16>, vector<8x128xf32> -> vector<8x128xf32>
    %338 = arith.addf %335, %337 : vector<8x128xf32>
    %339 = arith.negf %338 : vector<8x128xf32>
    %340 = math.exp %339 : vector<8x128xf32>
    %cst_74 = arith.constant 1.000000e+00 : f32
    %341 = vector.broadcast %cst_74 : f32 to vector<8x128xf32>
    %342 = arith.addf %341, %340 : vector<8x128xf32>
    %343 = arith.divf %341, %342 : vector<8x128xf32>
    %344 = vector.extract_strided_slice %343 {offsets = [0, 0], sizes = [8, 32], strides = [1, 1]} : vector<8x128xf32> to vector<8x32xf32>
    %345 = vector.extract_strided_slice %343 {offsets = [0, 32], sizes = [8, 32], strides = [1, 1]} : vector<8x128xf32> to vector<8x32xf32>
    %346 = vector.extract_strided_slice %343 {offsets = [0, 96], sizes = [8, 32], strides = [1, 1]} : vector<8x128xf32> to vector<8x32xf32>
    %347 = vector.extract_strided_slice %343 {offsets = [0, 64], sizes = [8, 32], strides = [1, 1]} : vector<8x128xf32> to vector<8x32xf32>
    %cst_75 = arith.constant 2.000000e+00 : f32
    %348 = vector.broadcast %cst_75 : f32 to vector<8x32xf32>
    %349 = arith.mulf %348, %347 : vector<8x32xf32>
    %cst_76 = arith.constant 1.000000e+00 : f32
    %350 = vector.broadcast %cst_76 : f32 to vector<8x32xf32>
    %351 = arith.subf %349, %350 : vector<8x32xf32>
    %352 = arith.mulf %345, %307 : vector<8x32xf32>
    %353 = arith.mulf %344, %351 : vector<8x32xf32>
    %354 = arith.addf %352, %353 : vector<8x32xf32>
    %355 = math.tanh %354 : vector<8x32xf32>
    %356 = arith.mulf %346, %355 : vector<8x32xf32>
    %357 = vector.extract_strided_slice %17 {offsets = [56, 0], sizes = [8, 128], strides = [1, 1]} : vector<64x128xf32> to vector<8x128xf32>
    %358 = arith.truncf %331 : vector<8x32xf32> to vector<8x32xbf16>
    %cst_77 = arith.constant dense<0.000000e+00> : vector<8x128xf32>
    %359 = tpu.matmul %358, %19, %cst_77 {dimension_numbers = #tpu.dot_dimension_numbers<[1], [0], [0], [1], [0, 0, 1, 1], [], []>} : vector<8x32xbf16>, vector<32x128xbf16>, vector<8x128xf32> -> vector<8x128xf32>
    %360 = arith.addf %357, %359 : vector<8x128xf32>
    %361 = arith.negf %360 : vector<8x128xf32>
    %362 = math.exp %361 : vector<8x128xf32>
    %cst_78 = arith.constant 1.000000e+00 : f32
    %363 = vector.broadcast %cst_78 : f32 to vector<8x128xf32>
    %364 = arith.addf %363, %362 : vector<8x128xf32>
    %365 = arith.divf %363, %364 : vector<8x128xf32>
    %366 = vector.extract_strided_slice %365 {offsets = [0, 0], sizes = [8, 32], strides = [1, 1]} : vector<8x128xf32> to vector<8x32xf32>
    %367 = vector.extract_strided_slice %365 {offsets = [0, 32], sizes = [8, 32], strides = [1, 1]} : vector<8x128xf32> to vector<8x32xf32>
    %368 = vector.extract_strided_slice %365 {offsets = [0, 96], sizes = [8, 32], strides = [1, 1]} : vector<8x128xf32> to vector<8x32xf32>
    %369 = vector.extract_strided_slice %365 {offsets = [0, 64], sizes = [8, 32], strides = [1, 1]} : vector<8x128xf32> to vector<8x32xf32>
    %cst_79 = arith.constant 2.000000e+00 : f32
    %370 = vector.broadcast %cst_79 : f32 to vector<8x32xf32>
    %371 = arith.mulf %370, %369 : vector<8x32xf32>
    %cst_80 = arith.constant 1.000000e+00 : f32
    %372 = vector.broadcast %cst_80 : f32 to vector<8x32xf32>
    %373 = arith.subf %371, %372 : vector<8x32xf32>
    %374 = arith.mulf %367, %329 : vector<8x32xf32>
    %375 = arith.mulf %366, %373 : vector<8x32xf32>
    %376 = arith.addf %374, %375 : vector<8x32xf32>
    %377 = math.tanh %376 : vector<8x32xf32>
    %378 = arith.mulf %368, %377 : vector<8x32xf32>
    %379 = arith.truncf %378 : vector<8x32xf32> to vector<8x32xbf16>
    %cst_81 = arith.constant dense<0.000000e+00> : vector<8x128xf32>
    %380 = tpu.matmul %379, %21, %cst_81 {dimension_numbers = #tpu.dot_dimension_numbers<[1], [0], [0], [1], [0, 0, 1, 1], [], []>} : vector<8x32xbf16>, vector<32x128xbf16>, vector<8x128xf32> -> vector<8x128xf32>
    %381 = vector.broadcast %3 : vector<1x128xf32> to vector<8x128xf32>
    %382 = arith.addf %381, %380 : vector<8x128xf32>
    %383 = arith.truncf %356 : vector<8x32xf32> to vector<8x32xbf16>
    %cst_82 = arith.constant dense<0.000000e+00> : vector<8x128xf32>
    %384 = tpu.matmul %383, %23, %cst_82 {dimension_numbers = #tpu.dot_dimension_numbers<[1], [0], [0], [1], [0, 0, 1, 1], [], []>} : vector<8x32xbf16>, vector<32x128xbf16>, vector<8x128xf32> -> vector<8x128xf32>
    %385 = arith.addf %382, %384 : vector<8x128xf32>
    %386 = arith.negf %385 : vector<8x128xf32>
    %387 = math.exp %386 : vector<8x128xf32>
    %cst_83 = arith.constant 1.000000e+00 : f32
    %388 = vector.broadcast %cst_83 : f32 to vector<8x128xf32>
    %389 = arith.addf %388, %387 : vector<8x128xf32>
    %390 = arith.divf %388, %389 : vector<8x128xf32>
    %391 = vector.extract_strided_slice %390 {offsets = [0, 0], sizes = [8, 32], strides = [1, 1]} : vector<8x128xf32> to vector<8x32xf32>
    %392 = vector.extract_strided_slice %390 {offsets = [0, 32], sizes = [8, 32], strides = [1, 1]} : vector<8x128xf32> to vector<8x32xf32>
    %393 = vector.extract_strided_slice %390 {offsets = [0, 96], sizes = [8, 32], strides = [1, 1]} : vector<8x128xf32> to vector<8x32xf32>
    %394 = vector.extract_strided_slice %390 {offsets = [0, 64], sizes = [8, 32], strides = [1, 1]} : vector<8x128xf32> to vector<8x32xf32>
    %cst_84 = arith.constant 2.000000e+00 : f32
    %395 = vector.broadcast %cst_84 : f32 to vector<8x32xf32>
    %396 = arith.mulf %395, %394 : vector<8x32xf32>
    %cst_85 = arith.constant 1.000000e+00 : f32
    %397 = vector.broadcast %cst_85 : f32 to vector<8x32xf32>
    %398 = arith.subf %396, %397 : vector<8x32xf32>
    %399 = arith.mulf %392, %354 : vector<8x32xf32>
    %400 = arith.mulf %391, %398 : vector<8x32xf32>
    %401 = arith.addf %399, %400 : vector<8x32xf32>
    %402 = math.tanh %401 : vector<8x32xf32>
    %403 = arith.mulf %393, %402 : vector<8x32xf32>
    %404 = arith.negf %403 : vector<8x32xf32>
    %405 = math.exp %404 : vector<8x32xf32>
    %cst_86 = arith.constant 1.000000e+00 : f32
    %406 = vector.broadcast %cst_86 : f32 to vector<8x32xf32>
    %407 = arith.addf %406, %405 : vector<8x32xf32>
    %408 = arith.divf %406, %407 : vector<8x32xf32>
    %409 = arith.mulf %403, %408 : vector<8x32xf32>
    %c360 = arith.constant 360 : index
    %c0_87 = arith.constant 0 : index
    %410 = vector.load %arg1[%c360, %c0_87] : memref<1800x128xf32, #tpu.memory_space<vmem>>, vector<32x128xf32>
    %cst_88 = arith.constant dense<0.000000e+00> : vector<8x128xf32>
    %411 = tpu.matmul %409, %410, %cst_88 {dimension_numbers = #tpu.dot_dimension_numbers<[1], [0], [0], [1], [0, 0, 1, 1], [], []>} : vector<8x32xf32>, vector<32x128xf32>, vector<8x128xf32> -> vector<8x128xf32>
    %cst_89 = arith.constant -2.200000e+00 : f32
    %412 = vector.broadcast %cst_89 : f32 to vector<8x32xf32>
    %413 = arith.cmpf oge, %403, %412 : vector<8x32xf32>
    %cst_90 = arith.constant -1.800000e+00 : f32
    %414 = vector.broadcast %cst_90 : f32 to vector<8x32xf32>
    %415 = arith.cmpf olt, %403, %414 : vector<8x32xf32>
    %416 = arith.andi %413, %415 : vector<8x32xi1>
    %417 = arith.extui %416 : vector<8x32xi1> to vector<8x32xi32>
    %418 = arith.sitofp %417 : vector<8x32xi32> to vector<8x32xf32>
    %cst_91 = arith.constant -1.800000e+00 : f32
    %419 = vector.broadcast %cst_91 : f32 to vector<8x32xf32>
    %420 = arith.cmpf oge, %403, %419 : vector<8x32xf32>
    %cst_92 = arith.constant -1.400000e+00 : f32
    %421 = vector.broadcast %cst_92 : f32 to vector<8x32xf32>
    %422 = arith.cmpf olt, %403, %421 : vector<8x32xf32>
    %423 = arith.andi %420, %422 : vector<8x32xi1>
    %424 = arith.extui %423 : vector<8x32xi1> to vector<8x32xi32>
    %425 = arith.sitofp %424 : vector<8x32xi32> to vector<8x32xf32>
    %cst_93 = arith.constant -1.400000e+00 : f32
    %426 = vector.broadcast %cst_93 : f32 to vector<8x32xf32>
    %427 = arith.cmpf oge, %403, %426 : vector<8x32xf32>
    %cst_94 = arith.constant -1.000000e+00 : f32
    %428 = vector.broadcast %cst_94 : f32 to vector<8x32xf32>
    %429 = arith.cmpf olt, %403, %428 : vector<8x32xf32>
    %430 = arith.andi %427, %429 : vector<8x32xi1>
    %431 = arith.extui %430 : vector<8x32xi1> to vector<8x32xi32>
    %432 = arith.sitofp %431 : vector<8x32xi32> to vector<8x32xf32>
    %cst_95 = arith.constant -1.000000e+00 : f32
    %433 = vector.broadcast %cst_95 : f32 to vector<8x32xf32>
    %434 = arith.cmpf oge, %403, %433 : vector<8x32xf32>
    %cst_96 = arith.constant -6.000000e-01 : f32
    %435 = vector.broadcast %cst_96 : f32 to vector<8x32xf32>
    %436 = arith.cmpf olt, %403, %435 : vector<8x32xf32>
    %437 = arith.andi %434, %436 : vector<8x32xi1>
    %438 = arith.extui %437 : vector<8x32xi1> to vector<8x32xi32>
    %439 = arith.sitofp %438 : vector<8x32xi32> to vector<8x32xf32>
    %cst_97 = arith.constant -6.000000e-01 : f32
    %440 = vector.broadcast %cst_97 : f32 to vector<8x32xf32>
    %441 = arith.cmpf oge, %403, %440 : vector<8x32xf32>
    %cst_98 = arith.constant -2.000000e-01 : f32
    %442 = vector.broadcast %cst_98 : f32 to vector<8x32xf32>
    %443 = arith.cmpf olt, %403, %442 : vector<8x32xf32>
    %444 = arith.andi %441, %443 : vector<8x32xi1>
    %445 = arith.extui %444 : vector<8x32xi1> to vector<8x32xi32>
    %446 = arith.sitofp %445 : vector<8x32xi32> to vector<8x32xf32>
    %cst_99 = arith.constant -2.000000e-01 : f32
    %447 = vector.broadcast %cst_99 : f32 to vector<8x32xf32>
    %448 = arith.cmpf oge, %403, %447 : vector<8x32xf32>
    %cst_100 = arith.constant 2.000000e-01 : f32
    %449 = vector.broadcast %cst_100 : f32 to vector<8x32xf32>
    %450 = arith.cmpf olt, %403, %449 : vector<8x32xf32>
    %451 = arith.andi %448, %450 : vector<8x32xi1>
    %452 = arith.extui %451 : vector<8x32xi1> to vector<8x32xi32>
    %453 = arith.sitofp %452 : vector<8x32xi32> to vector<8x32xf32>
    %cst_101 = arith.constant 2.000000e-01 : f32
    %454 = vector.broadcast %cst_101 : f32 to vector<8x32xf32>
    %455 = arith.cmpf oge, %403, %454 : vector<8x32xf32>
    %cst_102 = arith.constant 6.000000e-01 : f32
    %456 = vector.broadcast %cst_102 : f32 to vector<8x32xf32>
    %457 = arith.cmpf olt, %403, %456 : vector<8x32xf32>
    %458 = arith.andi %455, %457 : vector<8x32xi1>
    %459 = arith.extui %458 : vector<8x32xi1> to vector<8x32xi32>
    %460 = arith.sitofp %459 : vector<8x32xi32> to vector<8x32xf32>
    %cst_103 = arith.constant 6.000000e-01 : f32
    %461 = vector.broadcast %cst_103 : f32 to vector<8x32xf32>
    %462 = arith.cmpf oge, %403, %461 : vector<8x32xf32>
    %cst_104 = arith.constant 1.000000e+00 : f32
    %463 = vector.broadcast %cst_104 : f32 to vector<8x32xf32>
    %464 = arith.cmpf olt, %403, %463 : vector<8x32xf32>
    %465 = arith.andi %462, %464 : vector<8x32xi1>
    %466 = arith.extui %465 : vector<8x32xi1> to vector<8x32xi32>
    %467 = arith.sitofp %466 : vector<8x32xi32> to vector<8x32xf32>
    %cst_105 = arith.constant 1.000000e+00 : f32
    %468 = vector.broadcast %cst_105 : f32 to vector<8x32xf32>
    %469 = arith.cmpf oge, %403, %468 : vector<8x32xf32>
    %cst_106 = arith.constant 1.400000e+00 : f32
    %470 = vector.broadcast %cst_106 : f32 to vector<8x32xf32>
    %471 = arith.cmpf olt, %403, %470 : vector<8x32xf32>
    %472 = arith.andi %469, %471 : vector<8x32xi1>
    %473 = arith.extui %472 : vector<8x32xi1> to vector<8x32xi32>
    %474 = arith.sitofp %473 : vector<8x32xi32> to vector<8x32xf32>
    %cst_107 = arith.constant 1.400000e+00 : f32
    %475 = vector.broadcast %cst_107 : f32 to vector<8x32xf32>
    %476 = arith.cmpf oge, %403, %475 : vector<8x32xf32>
    %cst_108 = arith.constant 1.800000e+00 : f32
    %477 = vector.broadcast %cst_108 : f32 to vector<8x32xf32>
    %478 = arith.cmpf olt, %403, %477 : vector<8x32xf32>
    %479 = arith.andi %476, %478 : vector<8x32xi1>
    %480 = arith.extui %479 : vector<8x32xi1> to vector<8x32xi32>
    %481 = arith.sitofp %480 : vector<8x32xi32> to vector<8x32xf32>
    %cst_109 = arith.constant 1.800000e+00 : f32
    %482 = vector.broadcast %cst_109 : f32 to vector<8x32xf32>
    %483 = arith.cmpf oge, %403, %482 : vector<8x32xf32>
    %cst_110 = arith.constant 2.200000e+00 : f32
    %484 = vector.broadcast %cst_110 : f32 to vector<8x32xf32>
    %485 = arith.cmpf olt, %403, %484 : vector<8x32xf32>
    %486 = arith.andi %483, %485 : vector<8x32xi1>
    %487 = arith.extui %486 : vector<8x32xi1> to vector<8x32xi32>
    %488 = arith.sitofp %487 : vector<8x32xi32> to vector<8x32xf32>
    %cst_111 = arith.constant -2.200000e+00 : f32
    %489 = vector.broadcast %cst_111 : f32 to vector<8x32xf32>
    %490 = arith.subf %403, %489 : vector<8x32xf32>
    %cst_112 = arith.constant 2.500000e+00 : f32
    %491 = vector.broadcast %cst_112 : f32 to vector<8x32xf32>
    %492 = arith.mulf %490, %491 : vector<8x32xf32>
    %493 = arith.mulf %492, %418 : vector<8x32xf32>
    %cst_113 = arith.constant -1.400000e+00 : f32
    %494 = vector.broadcast %cst_113 : f32 to vector<8x32xf32>
    %495 = arith.subf %494, %403 : vector<8x32xf32>
    %cst_114 = arith.constant 2.500000e+00 : f32
    %496 = vector.broadcast %cst_114 : f32 to vector<8x32xf32>
    %497 = arith.mulf %495, %496 : vector<8x32xf32>
    %498 = arith.mulf %497, %425 : vector<8x32xf32>
    %499 = arith.addf %493, %498 : vector<8x32xf32>
    %cst_115 = arith.constant -1.800000e+00 : f32
    %500 = vector.broadcast %cst_115 : f32 to vector<8x32xf32>
    %501 = arith.subf %403, %500 : vector<8x32xf32>
    %cst_116 = arith.constant 2.500000e+00 : f32
    %502 = vector.broadcast %cst_116 : f32 to vector<8x32xf32>
    %503 = arith.mulf %501, %502 : vector<8x32xf32>
    %504 = arith.mulf %503, %425 : vector<8x32xf32>
    %cst_117 = arith.constant -1.000000e+00 : f32
    %505 = vector.broadcast %cst_117 : f32 to vector<8x32xf32>
    %506 = arith.subf %505, %403 : vector<8x32xf32>
    %cst_118 = arith.constant 2.500000e+00 : f32
    %507 = vector.broadcast %cst_118 : f32 to vector<8x32xf32>
    %508 = arith.mulf %506, %507 : vector<8x32xf32>
    %509 = arith.mulf %508, %432 : vector<8x32xf32>
    %510 = arith.addf %504, %509 : vector<8x32xf32>
    %cst_119 = arith.constant -1.400000e+00 : f32
    %511 = vector.broadcast %cst_119 : f32 to vector<8x32xf32>
    %512 = arith.subf %403, %511 : vector<8x32xf32>
    %cst_120 = arith.constant 2.500000e+00 : f32
    %513 = vector.broadcast %cst_120 : f32 to vector<8x32xf32>
    %514 = arith.mulf %512, %513 : vector<8x32xf32>
    %515 = arith.mulf %514, %432 : vector<8x32xf32>
    %cst_121 = arith.constant -6.000000e-01 : f32
    %516 = vector.broadcast %cst_121 : f32 to vector<8x32xf32>
    %517 = arith.subf %516, %403 : vector<8x32xf32>
    %cst_122 = arith.constant 2.500000e+00 : f32
    %518 = vector.broadcast %cst_122 : f32 to vector<8x32xf32>
    %519 = arith.mulf %517, %518 : vector<8x32xf32>
    %520 = arith.mulf %519, %439 : vector<8x32xf32>
    %521 = arith.addf %515, %520 : vector<8x32xf32>
    %cst_123 = arith.constant -1.000000e+00 : f32
    %522 = vector.broadcast %cst_123 : f32 to vector<8x32xf32>
    %523 = arith.subf %403, %522 : vector<8x32xf32>
    %cst_124 = arith.constant 2.500000e+00 : f32
    %524 = vector.broadcast %cst_124 : f32 to vector<8x32xf32>
    %525 = arith.mulf %523, %524 : vector<8x32xf32>
    %526 = arith.mulf %525, %439 : vector<8x32xf32>
    %cst_125 = arith.constant -2.000000e-01 : f32
    %527 = vector.broadcast %cst_125 : f32 to vector<8x32xf32>
    %528 = arith.subf %527, %403 : vector<8x32xf32>
    %cst_126 = arith.constant 2.500000e+00 : f32
    %529 = vector.broadcast %cst_126 : f32 to vector<8x32xf32>
    %530 = arith.mulf %528, %529 : vector<8x32xf32>
    %531 = arith.mulf %530, %446 : vector<8x32xf32>
    %532 = arith.addf %526, %531 : vector<8x32xf32>
    %cst_127 = arith.constant -6.000000e-01 : f32
    %533 = vector.broadcast %cst_127 : f32 to vector<8x32xf32>
    %534 = arith.subf %403, %533 : vector<8x32xf32>
    %cst_128 = arith.constant 2.500000e+00 : f32
    %535 = vector.broadcast %cst_128 : f32 to vector<8x32xf32>
    %536 = arith.mulf %534, %535 : vector<8x32xf32>
    %537 = arith.mulf %536, %446 : vector<8x32xf32>
    %cst_129 = arith.constant 2.000000e-01 : f32
    %538 = vector.broadcast %cst_129 : f32 to vector<8x32xf32>
    %539 = arith.subf %538, %403 : vector<8x32xf32>
    %cst_130 = arith.constant 2.500000e+00 : f32
    %540 = vector.broadcast %cst_130 : f32 to vector<8x32xf32>
    %541 = arith.mulf %539, %540 : vector<8x32xf32>
    %542 = arith.mulf %541, %453 : vector<8x32xf32>
    %543 = arith.addf %537, %542 : vector<8x32xf32>
    %cst_131 = arith.constant -2.000000e-01 : f32
    %544 = vector.broadcast %cst_131 : f32 to vector<8x32xf32>
    %545 = arith.subf %403, %544 : vector<8x32xf32>
    %cst_132 = arith.constant 2.500000e+00 : f32
    %546 = vector.broadcast %cst_132 : f32 to vector<8x32xf32>
    %547 = arith.mulf %545, %546 : vector<8x32xf32>
    %548 = arith.mulf %547, %453 : vector<8x32xf32>
    %cst_133 = arith.constant 6.000000e-01 : f32
    %549 = vector.broadcast %cst_133 : f32 to vector<8x32xf32>
    %550 = arith.subf %549, %403 : vector<8x32xf32>
    %cst_134 = arith.constant 2.500000e+00 : f32
    %551 = vector.broadcast %cst_134 : f32 to vector<8x32xf32>
    %552 = arith.mulf %550, %551 : vector<8x32xf32>
    %553 = arith.mulf %552, %460 : vector<8x32xf32>
    %554 = arith.addf %548, %553 : vector<8x32xf32>
    %cst_135 = arith.constant 2.000000e-01 : f32
    %555 = vector.broadcast %cst_135 : f32 to vector<8x32xf32>
    %556 = arith.subf %403, %555 : vector<8x32xf32>
    %cst_136 = arith.constant 2.500000e+00 : f32
    %557 = vector.broadcast %cst_136 : f32 to vector<8x32xf32>
    %558 = arith.mulf %556, %557 : vector<8x32xf32>
    %559 = arith.mulf %558, %460 : vector<8x32xf32>
    %cst_137 = arith.constant 1.000000e+00 : f32
    %560 = vector.broadcast %cst_137 : f32 to vector<8x32xf32>
    %561 = arith.subf %560, %403 : vector<8x32xf32>
    %cst_138 = arith.constant 2.500000e+00 : f32
    %562 = vector.broadcast %cst_138 : f32 to vector<8x32xf32>
    %563 = arith.mulf %561, %562 : vector<8x32xf32>
    %564 = arith.mulf %563, %467 : vector<8x32xf32>
    %565 = arith.addf %559, %564 : vector<8x32xf32>
    %cst_139 = arith.constant 6.000000e-01 : f32
    %566 = vector.broadcast %cst_139 : f32 to vector<8x32xf32>
    %567 = arith.subf %403, %566 : vector<8x32xf32>
    %cst_140 = arith.constant 2.500000e+00 : f32
    %568 = vector.broadcast %cst_140 : f32 to vector<8x32xf32>
    %569 = arith.mulf %567, %568 : vector<8x32xf32>
    %570 = arith.mulf %569, %467 : vector<8x32xf32>
    %cst_141 = arith.constant 1.400000e+00 : f32
    %571 = vector.broadcast %cst_141 : f32 to vector<8x32xf32>
    %572 = arith.subf %571, %403 : vector<8x32xf32>
    %cst_142 = arith.constant 2.500000e+00 : f32
    %573 = vector.broadcast %cst_142 : f32 to vector<8x32xf32>
    %574 = arith.mulf %572, %573 : vector<8x32xf32>
    %575 = arith.mulf %574, %474 : vector<8x32xf32>
    %576 = arith.addf %570, %575 : vector<8x32xf32>
    %cst_143 = arith.constant 1.000000e+00 : f32
    %577 = vector.broadcast %cst_143 : f32 to vector<8x32xf32>
    %578 = arith.subf %403, %577 : vector<8x32xf32>
    %cst_144 = arith.constant 2.500000e+00 : f32
    %579 = vector.broadcast %cst_144 : f32 to vector<8x32xf32>
    %580 = arith.mulf %578, %579 : vector<8x32xf32>
    %581 = arith.mulf %580, %474 : vector<8x32xf32>
    %cst_145 = arith.constant 1.800000e+00 : f32
    %582 = vector.broadcast %cst_145 : f32 to vector<8x32xf32>
    %583 = arith.subf %582, %403 : vector<8x32xf32>
    %cst_146 = arith.constant 2.500000e+00 : f32
    %584 = vector.broadcast %cst_146 : f32 to vector<8x32xf32>
    %585 = arith.mulf %583, %584 : vector<8x32xf32>
    %586 = arith.mulf %585, %481 : vector<8x32xf32>
    %587 = arith.addf %581, %586 : vector<8x32xf32>
    %cst_147 = arith.constant 1.400000e+00 : f32
    %588 = vector.broadcast %cst_147 : f32 to vector<8x32xf32>
    %589 = arith.subf %403, %588 : vector<8x32xf32>
    %cst_148 = arith.constant 2.500000e+00 : f32
    %590 = vector.broadcast %cst_148 : f32 to vector<8x32xf32>
    %591 = arith.mulf %589, %590 : vector<8x32xf32>
    %592 = arith.mulf %591, %481 : vector<8x32xf32>
    %cst_149 = arith.constant 2.200000e+00 : f32
    %593 = vector.broadcast %cst_149 : f32 to vector<8x32xf32>
    %594 = arith.subf %593, %403 : vector<8x32xf32>
    %cst_150 = arith.constant 2.500000e+00 : f32
    %595 = vector.broadcast %cst_150 : f32 to vector<8x32xf32>
    %596 = arith.mulf %594, %595 : vector<8x32xf32>
    %597 = arith.mulf %596, %488 : vector<8x32xf32>
    %598 = arith.addf %592, %597 : vector<8x32xf32>
    %cst_151 = arith.constant -2.200000e+00 : f32
    %599 = vector.broadcast %cst_151 : f32 to vector<8x32xf32>
    %600 = arith.subf %403, %599 : vector<8x32xf32>
    %cst_152 = arith.constant 1.250000e+00 : f32
    %601 = vector.broadcast %cst_152 : f32 to vector<8x32xf32>
    %602 = arith.mulf %600, %601 : vector<8x32xf32>
    %603 = arith.mulf %602, %499 : vector<8x32xf32>
    %cst_153 = arith.constant -1.000000e+00 : f32
    %604 = vector.broadcast %cst_153 : f32 to vector<8x32xf32>
    %605 = arith.subf %604, %403 : vector<8x32xf32>
    %cst_154 = arith.constant 1.250000e+00 : f32
    %606 = vector.broadcast %cst_154 : f32 to vector<8x32xf32>
    %607 = arith.mulf %605, %606 : vector<8x32xf32>
    %608 = arith.mulf %607, %510 : vector<8x32xf32>
    %609 = arith.addf %603, %608 : vector<8x32xf32>
    %cst_155 = arith.constant -1.800000e+00 : f32
    %610 = vector.broadcast %cst_155 : f32 to vector<8x32xf32>
    %611 = arith.subf %403, %610 : vector<8x32xf32>
    %cst_156 = arith.constant 1.250000e+00 : f32
    %612 = vector.broadcast %cst_156 : f32 to vector<8x32xf32>
    %613 = arith.mulf %611, %612 : vector<8x32xf32>
    %614 = arith.mulf %613, %510 : vector<8x32xf32>
    %cst_157 = arith.constant -6.000000e-01 : f32
    %615 = vector.broadcast %cst_157 : f32 to vector<8x32xf32>
    %616 = arith.subf %615, %403 : vector<8x32xf32>
    %cst_158 = arith.constant 1.250000e+00 : f32
    %617 = vector.broadcast %cst_158 : f32 to vector<8x32xf32>
    %618 = arith.mulf %616, %617 : vector<8x32xf32>
    %619 = arith.mulf %618, %521 : vector<8x32xf32>
    %620 = arith.addf %614, %619 : vector<8x32xf32>
    %cst_159 = arith.constant -1.400000e+00 : f32
    %621 = vector.broadcast %cst_159 : f32 to vector<8x32xf32>
    %622 = arith.subf %403, %621 : vector<8x32xf32>
    %cst_160 = arith.constant 1.250000e+00 : f32
    %623 = vector.broadcast %cst_160 : f32 to vector<8x32xf32>
    %624 = arith.mulf %622, %623 : vector<8x32xf32>
    %625 = arith.mulf %624, %521 : vector<8x32xf32>
    %cst_161 = arith.constant -2.000000e-01 : f32
    %626 = vector.broadcast %cst_161 : f32 to vector<8x32xf32>
    %627 = arith.subf %626, %403 : vector<8x32xf32>
    %cst_162 = arith.constant 1.250000e+00 : f32
    %628 = vector.broadcast %cst_162 : f32 to vector<8x32xf32>
    %629 = arith.mulf %627, %628 : vector<8x32xf32>
    %630 = arith.mulf %629, %532 : vector<8x32xf32>
    %631 = arith.addf %625, %630 : vector<8x32xf32>
    %cst_163 = arith.constant -1.000000e+00 : f32
    %632 = vector.broadcast %cst_163 : f32 to vector<8x32xf32>
    %633 = arith.subf %403, %632 : vector<8x32xf32>
    %cst_164 = arith.constant 1.250000e+00 : f32
    %634 = vector.broadcast %cst_164 : f32 to vector<8x32xf32>
    %635 = arith.mulf %633, %634 : vector<8x32xf32>
    %636 = arith.mulf %635, %532 : vector<8x32xf32>
    %cst_165 = arith.constant 2.000000e-01 : f32
    %637 = vector.broadcast %cst_165 : f32 to vector<8x32xf32>
    %638 = arith.subf %637, %403 : vector<8x32xf32>
    %cst_166 = arith.constant 1.250000e+00 : f32
    %639 = vector.broadcast %cst_166 : f32 to vector<8x32xf32>
    %640 = arith.mulf %638, %639 : vector<8x32xf32>
    %641 = arith.mulf %640, %543 : vector<8x32xf32>
    %642 = arith.addf %636, %641 : vector<8x32xf32>
    %cst_167 = arith.constant -6.000000e-01 : f32
    %643 = vector.broadcast %cst_167 : f32 to vector<8x32xf32>
    %644 = arith.subf %403, %643 : vector<8x32xf32>
    %cst_168 = arith.constant 1.250000e+00 : f32
    %645 = vector.broadcast %cst_168 : f32 to vector<8x32xf32>
    %646 = arith.mulf %644, %645 : vector<8x32xf32>
    %647 = arith.mulf %646, %543 : vector<8x32xf32>
    %cst_169 = arith.constant 6.000000e-01 : f32
    %648 = vector.broadcast %cst_169 : f32 to vector<8x32xf32>
    %649 = arith.subf %648, %403 : vector<8x32xf32>
    %cst_170 = arith.constant 1.250000e+00 : f32
    %650 = vector.broadcast %cst_170 : f32 to vector<8x32xf32>
    %651 = arith.mulf %649, %650 : vector<8x32xf32>
    %652 = arith.mulf %651, %554 : vector<8x32xf32>
    %653 = arith.addf %647, %652 : vector<8x32xf32>
    %cst_171 = arith.constant -2.000000e-01 : f32
    %654 = vector.broadcast %cst_171 : f32 to vector<8x32xf32>
    %655 = arith.subf %403, %654 : vector<8x32xf32>
    %cst_172 = arith.constant 1.250000e+00 : f32
    %656 = vector.broadcast %cst_172 : f32 to vector<8x32xf32>
    %657 = arith.mulf %655, %656 : vector<8x32xf32>
    %658 = arith.mulf %657, %554 : vector<8x32xf32>
    %cst_173 = arith.constant 1.000000e+00 : f32
    %659 = vector.broadcast %cst_173 : f32 to vector<8x32xf32>
    %660 = arith.subf %659, %403 : vector<8x32xf32>
    %cst_174 = arith.constant 1.250000e+00 : f32
    %661 = vector.broadcast %cst_174 : f32 to vector<8x32xf32>
    %662 = arith.mulf %660, %661 : vector<8x32xf32>
    %663 = arith.mulf %662, %565 : vector<8x32xf32>
    %664 = arith.addf %658, %663 : vector<8x32xf32>
    %cst_175 = arith.constant 2.000000e-01 : f32
    %665 = vector.broadcast %cst_175 : f32 to vector<8x32xf32>
    %666 = arith.subf %403, %665 : vector<8x32xf32>
    %cst_176 = arith.constant 1.250000e+00 : f32
    %667 = vector.broadcast %cst_176 : f32 to vector<8x32xf32>
    %668 = arith.mulf %666, %667 : vector<8x32xf32>
    %669 = arith.mulf %668, %565 : vector<8x32xf32>
    %cst_177 = arith.constant 1.400000e+00 : f32
    %670 = vector.broadcast %cst_177 : f32 to vector<8x32xf32>
    %671 = arith.subf %670, %403 : vector<8x32xf32>
    %cst_178 = arith.constant 1.250000e+00 : f32
    %672 = vector.broadcast %cst_178 : f32 to vector<8x32xf32>
    %673 = arith.mulf %671, %672 : vector<8x32xf32>
    %674 = arith.mulf %673, %576 : vector<8x32xf32>
    %675 = arith.addf %669, %674 : vector<8x32xf32>
    %cst_179 = arith.constant 6.000000e-01 : f32
    %676 = vector.broadcast %cst_179 : f32 to vector<8x32xf32>
    %677 = arith.subf %403, %676 : vector<8x32xf32>
    %cst_180 = arith.constant 1.250000e+00 : f32
    %678 = vector.broadcast %cst_180 : f32 to vector<8x32xf32>
    %679 = arith.mulf %677, %678 : vector<8x32xf32>
    %680 = arith.mulf %679, %576 : vector<8x32xf32>
    %cst_181 = arith.constant 1.800000e+00 : f32
    %681 = vector.broadcast %cst_181 : f32 to vector<8x32xf32>
    %682 = arith.subf %681, %403 : vector<8x32xf32>
    %cst_182 = arith.constant 1.250000e+00 : f32
    %683 = vector.broadcast %cst_182 : f32 to vector<8x32xf32>
    %684 = arith.mulf %682, %683 : vector<8x32xf32>
    %685 = arith.mulf %684, %587 : vector<8x32xf32>
    %686 = arith.addf %680, %685 : vector<8x32xf32>
    %cst_183 = arith.constant 1.000000e+00 : f32
    %687 = vector.broadcast %cst_183 : f32 to vector<8x32xf32>
    %688 = arith.subf %403, %687 : vector<8x32xf32>
    %cst_184 = arith.constant 1.250000e+00 : f32
    %689 = vector.broadcast %cst_184 : f32 to vector<8x32xf32>
    %690 = arith.mulf %688, %689 : vector<8x32xf32>
    %691 = arith.mulf %690, %587 : vector<8x32xf32>
    %cst_185 = arith.constant 2.200000e+00 : f32
    %692 = vector.broadcast %cst_185 : f32 to vector<8x32xf32>
    %693 = arith.subf %692, %403 : vector<8x32xf32>
    %cst_186 = arith.constant 1.250000e+00 : f32
    %694 = vector.broadcast %cst_186 : f32 to vector<8x32xf32>
    %695 = arith.mulf %693, %694 : vector<8x32xf32>
    %696 = arith.mulf %695, %598 : vector<8x32xf32>
    %697 = arith.addf %691, %696 : vector<8x32xf32>
    %cst_187 = arith.constant -2.200000e+00 : f32
    %698 = vector.broadcast %cst_187 : f32 to vector<8x32xf32>
    %699 = arith.subf %403, %698 : vector<8x32xf32>
    %cst_188 = arith.constant 0.833333313 : f32
    %700 = vector.broadcast %cst_188 : f32 to vector<8x32xf32>
    %701 = arith.mulf %699, %700 : vector<8x32xf32>
    %702 = arith.mulf %701, %609 : vector<8x32xf32>
    %cst_189 = arith.constant -6.000000e-01 : f32
    %703 = vector.broadcast %cst_189 : f32 to vector<8x32xf32>
    %704 = arith.subf %703, %403 : vector<8x32xf32>
    %cst_190 = arith.constant 0.833333313 : f32
    %705 = vector.broadcast %cst_190 : f32 to vector<8x32xf32>
    %706 = arith.mulf %704, %705 : vector<8x32xf32>
    %707 = arith.mulf %706, %620 : vector<8x32xf32>
    %708 = arith.addf %702, %707 : vector<8x32xf32>
    %cst_191 = arith.constant -1.800000e+00 : f32
    %709 = vector.broadcast %cst_191 : f32 to vector<8x32xf32>
    %710 = arith.subf %403, %709 : vector<8x32xf32>
    %cst_192 = arith.constant 0.833333313 : f32
    %711 = vector.broadcast %cst_192 : f32 to vector<8x32xf32>
    %712 = arith.mulf %710, %711 : vector<8x32xf32>
    %713 = arith.mulf %712, %620 : vector<8x32xf32>
    %cst_193 = arith.constant -2.000000e-01 : f32
    %714 = vector.broadcast %cst_193 : f32 to vector<8x32xf32>
    %715 = arith.subf %714, %403 : vector<8x32xf32>
    %cst_194 = arith.constant 0.833333313 : f32
    %716 = vector.broadcast %cst_194 : f32 to vector<8x32xf32>
    %717 = arith.mulf %715, %716 : vector<8x32xf32>
    %718 = arith.mulf %717, %631 : vector<8x32xf32>
    %719 = arith.addf %713, %718 : vector<8x32xf32>
    %cst_195 = arith.constant -1.400000e+00 : f32
    %720 = vector.broadcast %cst_195 : f32 to vector<8x32xf32>
    %721 = arith.subf %403, %720 : vector<8x32xf32>
    %cst_196 = arith.constant 0.833333313 : f32
    %722 = vector.broadcast %cst_196 : f32 to vector<8x32xf32>
    %723 = arith.mulf %721, %722 : vector<8x32xf32>
    %724 = arith.mulf %723, %631 : vector<8x32xf32>
    %cst_197 = arith.constant 2.000000e-01 : f32
    %725 = vector.broadcast %cst_197 : f32 to vector<8x32xf32>
    %726 = arith.subf %725, %403 : vector<8x32xf32>
    %cst_198 = arith.constant 0.833333313 : f32
    %727 = vector.broadcast %cst_198 : f32 to vector<8x32xf32>
    %728 = arith.mulf %726, %727 : vector<8x32xf32>
    %729 = arith.mulf %728, %642 : vector<8x32xf32>
    %730 = arith.addf %724, %729 : vector<8x32xf32>
    %cst_199 = arith.constant -1.000000e+00 : f32
    %731 = vector.broadcast %cst_199 : f32 to vector<8x32xf32>
    %732 = arith.subf %403, %731 : vector<8x32xf32>
    %cst_200 = arith.constant 0.833333313 : f32
    %733 = vector.broadcast %cst_200 : f32 to vector<8x32xf32>
    %734 = arith.mulf %732, %733 : vector<8x32xf32>
    %735 = arith.mulf %734, %642 : vector<8x32xf32>
    %cst_201 = arith.constant 6.000000e-01 : f32
    %736 = vector.broadcast %cst_201 : f32 to vector<8x32xf32>
    %737 = arith.subf %736, %403 : vector<8x32xf32>
    %cst_202 = arith.constant 0.833333313 : f32
    %738 = vector.broadcast %cst_202 : f32 to vector<8x32xf32>
    %739 = arith.mulf %737, %738 : vector<8x32xf32>
    %740 = arith.mulf %739, %653 : vector<8x32xf32>
    %741 = arith.addf %735, %740 : vector<8x32xf32>
    %cst_203 = arith.constant -6.000000e-01 : f32
    %742 = vector.broadcast %cst_203 : f32 to vector<8x32xf32>
    %743 = arith.subf %403, %742 : vector<8x32xf32>
    %cst_204 = arith.constant 0.833333313 : f32
    %744 = vector.broadcast %cst_204 : f32 to vector<8x32xf32>
    %745 = arith.mulf %743, %744 : vector<8x32xf32>
    %746 = arith.mulf %745, %653 : vector<8x32xf32>
    %cst_205 = arith.constant 1.000000e+00 : f32
    %747 = vector.broadcast %cst_205 : f32 to vector<8x32xf32>
    %748 = arith.subf %747, %403 : vector<8x32xf32>
    %cst_206 = arith.constant 0.833333313 : f32
    %749 = vector.broadcast %cst_206 : f32 to vector<8x32xf32>
    %750 = arith.mulf %748, %749 : vector<8x32xf32>
    %751 = arith.mulf %750, %664 : vector<8x32xf32>
    %752 = arith.addf %746, %751 : vector<8x32xf32>
    %cst_207 = arith.constant -2.000000e-01 : f32
    %753 = vector.broadcast %cst_207 : f32 to vector<8x32xf32>
    %754 = arith.subf %403, %753 : vector<8x32xf32>
    %cst_208 = arith.constant 0.833333313 : f32
    %755 = vector.broadcast %cst_208 : f32 to vector<8x32xf32>
    %756 = arith.mulf %754, %755 : vector<8x32xf32>
    %757 = arith.mulf %756, %664 : vector<8x32xf32>
    %cst_209 = arith.constant 1.400000e+00 : f32
    %758 = vector.broadcast %cst_209 : f32 to vector<8x32xf32>
    %759 = arith.subf %758, %403 : vector<8x32xf32>
    %cst_210 = arith.constant 0.833333313 : f32
    %760 = vector.broadcast %cst_210 : f32 to vector<8x32xf32>
    %761 = arith.mulf %759, %760 : vector<8x32xf32>
    %762 = arith.mulf %761, %675 : vector<8x32xf32>
    %763 = arith.addf %757, %762 : vector<8x32xf32>
    %cst_211 = arith.constant 2.000000e-01 : f32
    %764 = vector.broadcast %cst_211 : f32 to vector<8x32xf32>
    %765 = arith.subf %403, %764 : vector<8x32xf32>
    %cst_212 = arith.constant 0.833333313 : f32
    %766 = vector.broadcast %cst_212 : f32 to vector<8x32xf32>
    %767 = arith.mulf %765, %766 : vector<8x32xf32>
    %768 = arith.mulf %767, %675 : vector<8x32xf32>
    %cst_213 = arith.constant 1.800000e+00 : f32
    %769 = vector.broadcast %cst_213 : f32 to vector<8x32xf32>
    %770 = arith.subf %769, %403 : vector<8x32xf32>
    %cst_214 = arith.constant 0.833333313 : f32
    %771 = vector.broadcast %cst_214 : f32 to vector<8x32xf32>
    %772 = arith.mulf %770, %771 : vector<8x32xf32>
    %773 = arith.mulf %772, %686 : vector<8x32xf32>
    %774 = arith.addf %768, %773 : vector<8x32xf32>
    %cst_215 = arith.constant 6.000000e-01 : f32
    %775 = vector.broadcast %cst_215 : f32 to vector<8x32xf32>
    %776 = arith.subf %403, %775 : vector<8x32xf32>
    %cst_216 = arith.constant 0.833333313 : f32
    %777 = vector.broadcast %cst_216 : f32 to vector<8x32xf32>
    %778 = arith.mulf %776, %777 : vector<8x32xf32>
    %779 = arith.mulf %778, %686 : vector<8x32xf32>
    %cst_217 = arith.constant 2.200000e+00 : f32
    %780 = vector.broadcast %cst_217 : f32 to vector<8x32xf32>
    %781 = arith.subf %780, %403 : vector<8x32xf32>
    %cst_218 = arith.constant 0.833333313 : f32
    %782 = vector.broadcast %cst_218 : f32 to vector<8x32xf32>
    %783 = arith.mulf %781, %782 : vector<8x32xf32>
    %784 = arith.mulf %783, %697 : vector<8x32xf32>
    %785 = arith.addf %779, %784 : vector<8x32xf32>
    %c392 = arith.constant 392 : index
    %c0_219 = arith.constant 0 : index
    %786 = vector.load %arg1[%c392, %c0_219] : memref<1800x128xf32, #tpu.memory_space<vmem>>, vector<32x128xf32>
    %cst_220 = arith.constant dense<0.000000e+00> : vector<8x128xf32>
    %787 = tpu.matmul %708, %786, %cst_220 {dimension_numbers = #tpu.dot_dimension_numbers<[1], [0], [0], [1], [0, 0, 1, 1], [], []>} : vector<8x32xf32>, vector<32x128xf32>, vector<8x128xf32> -> vector<8x128xf32>
    %788 = arith.addf %411, %787 : vector<8x128xf32>
    %c424 = arith.constant 424 : index
    %c0_221 = arith.constant 0 : index
    %789 = vector.load %arg1[%c424, %c0_221] : memref<1800x128xf32, #tpu.memory_space<vmem>>, vector<32x128xf32>
    %cst_222 = arith.constant dense<0.000000e+00> : vector<8x128xf32>
    %790 = tpu.matmul %719, %789, %cst_222 {dimension_numbers = #tpu.dot_dimension_numbers<[1], [0], [0], [1], [0, 0, 1, 1], [], []>} : vector<8x32xf32>, vector<32x128xf32>, vector<8x128xf32> -> vector<8x128xf32>
    %791 = arith.addf %788, %790 : vector<8x128xf32>
    %c456 = arith.constant 456 : index
    %c0_223 = arith.constant 0 : index
    %792 = vector.load %arg1[%c456, %c0_223] : memref<1800x128xf32, #tpu.memory_space<vmem>>, vector<32x128xf32>
    %cst_224 = arith.constant dense<0.000000e+00> : vector<8x128xf32>
    %793 = tpu.matmul %730, %792, %cst_224 {dimension_numbers = #tpu.dot_dimension_numbers<[1], [0], [0], [1], [0, 0, 1, 1], [], []>} : vector<8x32xf32>, vector<32x128xf32>, vector<8x128xf32> -> vector<8x128xf32>
    %794 = arith.addf %791, %793 : vector<8x128xf32>
    %c488 = arith.constant 488 : index
    %c0_225 = arith.constant 0 : index
    %795 = vector.load %arg1[%c488, %c0_225] : memref<1800x128xf32, #tpu.memory_space<vmem>>, vector<32x128xf32>
    %cst_226 = arith.constant dense<0.000000e+00> : vector<8x128xf32>
    %796 = tpu.matmul %741, %795, %cst_226 {dimension_numbers = #tpu.dot_dimension_numbers<[1], [0], [0], [1], [0, 0, 1, 1], [], []>} : vector<8x32xf32>, vector<32x128xf32>, vector<8x128xf32> -> vector<8x128xf32>
    %797 = arith.addf %794, %796 : vector<8x128xf32>
    %c520 = arith.constant 520 : index
    %c0_227 = arith.constant 0 : index
    %798 = vector.load %arg1[%c520, %c0_227] : memref<1800x128xf32, #tpu.memory_space<vmem>>, vector<32x128xf32>
    %cst_228 = arith.constant dense<0.000000e+00> : vector<8x128xf32>
    %799 = tpu.matmul %752, %798, %cst_228 {dimension_numbers = #tpu.dot_dimension_numbers<[1], [0], [0], [1], [0, 0, 1, 1], [], []>} : vector<8x32xf32>, vector<32x128xf32>, vector<8x128xf32> -> vector<8x128xf32>
    %800 = arith.addf %797, %799 : vector<8x128xf32>
    %c552 = arith.constant 552 : index
    %c0_229 = arith.constant 0 : index
    %801 = vector.load %arg1[%c552, %c0_229] : memref<1800x128xf32, #tpu.memory_space<vmem>>, vector<32x128xf32>
    %cst_230 = arith.constant dense<0.000000e+00> : vector<8x128xf32>
    %802 = tpu.matmul %763, %801, %cst_230 {dimension_numbers = #tpu.dot_dimension_numbers<[1], [0], [0], [1], [0, 0, 1, 1], [], []>} : vector<8x32xf32>, vector<32x128xf32>, vector<8x128xf32> -> vector<8x128xf32>
    %803 = arith.addf %800, %802 : vector<8x128xf32>
    %c584 = arith.constant 584 : index
    %c0_231 = arith.constant 0 : index
    %804 = vector.load %arg1[%c584, %c0_231] : memref<1800x128xf32, #tpu.memory_space<vmem>>, vector<32x128xf32>
    %cst_232 = arith.constant dense<0.000000e+00> : vector<8x128xf32>
    %805 = tpu.matmul %774, %804, %cst_232 {dimension_numbers = #tpu.dot_dimension_numbers<[1], [0], [0], [1], [0, 0, 1, 1], [], []>} : vector<8x32xf32>, vector<32x128xf32>, vector<8x128xf32> -> vector<8x128xf32>
    %806 = arith.addf %803, %805 : vector<8x128xf32>
    %c616 = arith.constant 616 : index
    %c0_233 = arith.constant 0 : index
    %807 = vector.load %arg1[%c616, %c0_233] : memref<1800x128xf32, #tpu.memory_space<vmem>>, vector<32x128xf32>
    %cst_234 = arith.constant dense<0.000000e+00> : vector<8x128xf32>
    %808 = tpu.matmul %785, %807, %cst_234 {dimension_numbers = #tpu.dot_dimension_numbers<[1], [0], [0], [1], [0, 0, 1, 1], [], []>} : vector<8x32xf32>, vector<32x128xf32>, vector<8x128xf32> -> vector<8x128xf32>
    %809 = arith.addf %806, %808 : vector<8x128xf32>
    %810 = arith.negf %809 : vector<8x128xf32>
    %811 = math.exp %810 : vector<8x128xf32>
    %cst_235 = arith.constant 1.000000e+00 : f32
    %812 = vector.broadcast %cst_235 : f32 to vector<8x128xf32>
    %813 = arith.addf %812, %811 : vector<8x128xf32>
    %814 = arith.divf %812, %813 : vector<8x128xf32>
    %815 = arith.mulf %809, %814 : vector<8x128xf32>
    %c648 = arith.constant 648 : index
    %c0_236 = arith.constant 0 : index
    %816 = vector.load %arg1[%c648, %c0_236] : memref<1800x128xf32, #tpu.memory_space<vmem>>, vector<128x128xf32>
    %cst_237 = arith.constant dense<0.000000e+00> : vector<8x128xf32>
    %817 = tpu.matmul %815, %816, %cst_237 {dimension_numbers = #tpu.dot_dimension_numbers<[1], [0], [0], [1], [0, 0, 1, 1], [], []>} : vector<8x128xf32>, vector<128x128xf32>, vector<8x128xf32> -> vector<8x128xf32>
    %cst_238 = arith.constant -2.200000e+00 : f32
    %818 = vector.broadcast %cst_238 : f32 to vector<8x128xf32>
    %819 = arith.cmpf oge, %809, %818 : vector<8x128xf32>
    %cst_239 = arith.constant -1.800000e+00 : f32
    %820 = vector.broadcast %cst_239 : f32 to vector<8x128xf32>
    %821 = arith.cmpf olt, %809, %820 : vector<8x128xf32>
    %822 = arith.andi %819, %821 : vector<8x128xi1>
    %823 = arith.extui %822 : vector<8x128xi1> to vector<8x128xi32>
    %824 = arith.sitofp %823 : vector<8x128xi32> to vector<8x128xf32>
    %cst_240 = arith.constant -1.800000e+00 : f32
    %825 = vector.broadcast %cst_240 : f32 to vector<8x128xf32>
    %826 = arith.cmpf oge, %809, %825 : vector<8x128xf32>
    %cst_241 = arith.constant -1.400000e+00 : f32
    %827 = vector.broadcast %cst_241 : f32 to vector<8x128xf32>
    %828 = arith.cmpf olt, %809, %827 : vector<8x128xf32>
    %829 = arith.andi %826, %828 : vector<8x128xi1>
    %830 = arith.extui %829 : vector<8x128xi1> to vector<8x128xi32>
    %831 = arith.sitofp %830 : vector<8x128xi32> to vector<8x128xf32>
    %cst_242 = arith.constant -1.400000e+00 : f32
    %832 = vector.broadcast %cst_242 : f32 to vector<8x128xf32>
    %833 = arith.cmpf oge, %809, %832 : vector<8x128xf32>
    %cst_243 = arith.constant -1.000000e+00 : f32
    %834 = vector.broadcast %cst_243 : f32 to vector<8x128xf32>
    %835 = arith.cmpf olt, %809, %834 : vector<8x128xf32>
    %836 = arith.andi %833, %835 : vector<8x128xi1>
    %837 = arith.extui %836 : vector<8x128xi1> to vector<8x128xi32>
    %838 = arith.sitofp %837 : vector<8x128xi32> to vector<8x128xf32>
    %cst_244 = arith.constant -1.000000e+00 : f32
    %839 = vector.broadcast %cst_244 : f32 to vector<8x128xf32>
    %840 = arith.cmpf oge, %809, %839 : vector<8x128xf32>
    %cst_245 = arith.constant -6.000000e-01 : f32
    %841 = vector.broadcast %cst_245 : f32 to vector<8x128xf32>
    %842 = arith.cmpf olt, %809, %841 : vector<8x128xf32>
    %843 = arith.andi %840, %842 : vector<8x128xi1>
    %844 = arith.extui %843 : vector<8x128xi1> to vector<8x128xi32>
    %845 = arith.sitofp %844 : vector<8x128xi32> to vector<8x128xf32>
    %cst_246 = arith.constant -6.000000e-01 : f32
    %846 = vector.broadcast %cst_246 : f32 to vector<8x128xf32>
    %847 = arith.cmpf oge, %809, %846 : vector<8x128xf32>
    %cst_247 = arith.constant -2.000000e-01 : f32
    %848 = vector.broadcast %cst_247 : f32 to vector<8x128xf32>
    %849 = arith.cmpf olt, %809, %848 : vector<8x128xf32>
    %850 = arith.andi %847, %849 : vector<8x128xi1>
    %851 = arith.extui %850 : vector<8x128xi1> to vector<8x128xi32>
    %852 = arith.sitofp %851 : vector<8x128xi32> to vector<8x128xf32>
    %cst_248 = arith.constant -2.000000e-01 : f32
    %853 = vector.broadcast %cst_248 : f32 to vector<8x128xf32>
    %854 = arith.cmpf oge, %809, %853 : vector<8x128xf32>
    %cst_249 = arith.constant 2.000000e-01 : f32
    %855 = vector.broadcast %cst_249 : f32 to vector<8x128xf32>
    %856 = arith.cmpf olt, %809, %855 : vector<8x128xf32>
    %857 = arith.andi %854, %856 : vector<8x128xi1>
    %858 = arith.extui %857 : vector<8x128xi1> to vector<8x128xi32>
    %859 = arith.sitofp %858 : vector<8x128xi32> to vector<8x128xf32>
    %cst_250 = arith.constant 2.000000e-01 : f32
    %860 = vector.broadcast %cst_250 : f32 to vector<8x128xf32>
    %861 = arith.cmpf oge, %809, %860 : vector<8x128xf32>
    %cst_251 = arith.constant 6.000000e-01 : f32
    %862 = vector.broadcast %cst_251 : f32 to vector<8x128xf32>
    %863 = arith.cmpf olt, %809, %862 : vector<8x128xf32>
    %864 = arith.andi %861, %863 : vector<8x128xi1>
    %865 = arith.extui %864 : vector<8x128xi1> to vector<8x128xi32>
    %866 = arith.sitofp %865 : vector<8x128xi32> to vector<8x128xf32>
    %cst_252 = arith.constant 6.000000e-01 : f32
    %867 = vector.broadcast %cst_252 : f32 to vector<8x128xf32>
    %868 = arith.cmpf oge, %809, %867 : vector<8x128xf32>
    %cst_253 = arith.constant 1.000000e+00 : f32
    %869 = vector.broadcast %cst_253 : f32 to vector<8x128xf32>
    %870 = arith.cmpf olt, %809, %869 : vector<8x128xf32>
    %871 = arith.andi %868, %870 : vector<8x128xi1>
    %872 = arith.extui %871 : vector<8x128xi1> to vector<8x128xi32>
    %873 = arith.sitofp %872 : vector<8x128xi32> to vector<8x128xf32>
    %cst_254 = arith.constant 1.000000e+00 : f32
    %874 = vector.broadcast %cst_254 : f32 to vector<8x128xf32>
    %875 = arith.cmpf oge, %809, %874 : vector<8x128xf32>
    %cst_255 = arith.constant 1.400000e+00 : f32
    %876 = vector.broadcast %cst_255 : f32 to vector<8x128xf32>
    %877 = arith.cmpf olt, %809, %876 : vector<8x128xf32>
    %878 = arith.andi %875, %877 : vector<8x128xi1>
    %879 = arith.extui %878 : vector<8x128xi1> to vector<8x128xi32>
    %880 = arith.sitofp %879 : vector<8x128xi32> to vector<8x128xf32>
    %cst_256 = arith.constant 1.400000e+00 : f32
    %881 = vector.broadcast %cst_256 : f32 to vector<8x128xf32>
    %882 = arith.cmpf oge, %809, %881 : vector<8x128xf32>
    %cst_257 = arith.constant 1.800000e+00 : f32
    %883 = vector.broadcast %cst_257 : f32 to vector<8x128xf32>
    %884 = arith.cmpf olt, %809, %883 : vector<8x128xf32>
    %885 = arith.andi %882, %884 : vector<8x128xi1>
    %886 = arith.extui %885 : vector<8x128xi1> to vector<8x128xi32>
    %887 = arith.sitofp %886 : vector<8x128xi32> to vector<8x128xf32>
    %cst_258 = arith.constant 1.800000e+00 : f32
    %888 = vector.broadcast %cst_258 : f32 to vector<8x128xf32>
    %889 = arith.cmpf oge, %809, %888 : vector<8x128xf32>
    %cst_259 = arith.constant 2.200000e+00 : f32
    %890 = vector.broadcast %cst_259 : f32 to vector<8x128xf32>
    %891 = arith.cmpf olt, %809, %890 : vector<8x128xf32>
    %892 = arith.andi %889, %891 : vector<8x128xi1>
    %893 = arith.extui %892 : vector<8x128xi1> to vector<8x128xi32>
    %894 = arith.sitofp %893 : vector<8x128xi32> to vector<8x128xf32>
    %cst_260 = arith.constant -2.200000e+00 : f32
    %895 = vector.broadcast %cst_260 : f32 to vector<8x128xf32>
    %896 = arith.subf %809, %895 : vector<8x128xf32>
    %cst_261 = arith.constant 2.500000e+00 : f32
    %897 = vector.broadcast %cst_261 : f32 to vector<8x128xf32>
    %898 = arith.mulf %896, %897 : vector<8x128xf32>
    %899 = arith.mulf %898, %824 : vector<8x128xf32>
    %cst_262 = arith.constant -1.400000e+00 : f32
    %900 = vector.broadcast %cst_262 : f32 to vector<8x128xf32>
    %901 = arith.subf %900, %809 : vector<8x128xf32>
    %cst_263 = arith.constant 2.500000e+00 : f32
    %902 = vector.broadcast %cst_263 : f32 to vector<8x128xf32>
    %903 = arith.mulf %901, %902 : vector<8x128xf32>
    %904 = arith.mulf %903, %831 : vector<8x128xf32>
    %905 = arith.addf %899, %904 : vector<8x128xf32>
    %cst_264 = arith.constant -1.800000e+00 : f32
    %906 = vector.broadcast %cst_264 : f32 to vector<8x128xf32>
    %907 = arith.subf %809, %906 : vector<8x128xf32>
    %cst_265 = arith.constant 2.500000e+00 : f32
    %908 = vector.broadcast %cst_265 : f32 to vector<8x128xf32>
    %909 = arith.mulf %907, %908 : vector<8x128xf32>
    %910 = arith.mulf %909, %831 : vector<8x128xf32>
    %cst_266 = arith.constant -1.000000e+00 : f32
    %911 = vector.broadcast %cst_266 : f32 to vector<8x128xf32>
    %912 = arith.subf %911, %809 : vector<8x128xf32>
    %cst_267 = arith.constant 2.500000e+00 : f32
    %913 = vector.broadcast %cst_267 : f32 to vector<8x128xf32>
    %914 = arith.mulf %912, %913 : vector<8x128xf32>
    %915 = arith.mulf %914, %838 : vector<8x128xf32>
    %916 = arith.addf %910, %915 : vector<8x128xf32>
    %cst_268 = arith.constant -1.400000e+00 : f32
    %917 = vector.broadcast %cst_268 : f32 to vector<8x128xf32>
    %918 = arith.subf %809, %917 : vector<8x128xf32>
    %cst_269 = arith.constant 2.500000e+00 : f32
    %919 = vector.broadcast %cst_269 : f32 to vector<8x128xf32>
    %920 = arith.mulf %918, %919 : vector<8x128xf32>
    %921 = arith.mulf %920, %838 : vector<8x128xf32>
    %cst_270 = arith.constant -6.000000e-01 : f32
    %922 = vector.broadcast %cst_270 : f32 to vector<8x128xf32>
    %923 = arith.subf %922, %809 : vector<8x128xf32>
    %cst_271 = arith.constant 2.500000e+00 : f32
    %924 = vector.broadcast %cst_271 : f32 to vector<8x128xf32>
    %925 = arith.mulf %923, %924 : vector<8x128xf32>
    %926 = arith.mulf %925, %845 : vector<8x128xf32>
    %927 = arith.addf %921, %926 : vector<8x128xf32>
    %cst_272 = arith.constant -1.000000e+00 : f32
    %928 = vector.broadcast %cst_272 : f32 to vector<8x128xf32>
    %929 = arith.subf %809, %928 : vector<8x128xf32>
    %cst_273 = arith.constant 2.500000e+00 : f32
    %930 = vector.broadcast %cst_273 : f32 to vector<8x128xf32>
    %931 = arith.mulf %929, %930 : vector<8x128xf32>
    %932 = arith.mulf %931, %845 : vector<8x128xf32>
    %cst_274 = arith.constant -2.000000e-01 : f32
    %933 = vector.broadcast %cst_274 : f32 to vector<8x128xf32>
    %934 = arith.subf %933, %809 : vector<8x128xf32>
    %cst_275 = arith.constant 2.500000e+00 : f32
    %935 = vector.broadcast %cst_275 : f32 to vector<8x128xf32>
    %936 = arith.mulf %934, %935 : vector<8x128xf32>
    %937 = arith.mulf %936, %852 : vector<8x128xf32>
    %938 = arith.addf %932, %937 : vector<8x128xf32>
    %cst_276 = arith.constant -6.000000e-01 : f32
    %939 = vector.broadcast %cst_276 : f32 to vector<8x128xf32>
    %940 = arith.subf %809, %939 : vector<8x128xf32>
    %cst_277 = arith.constant 2.500000e+00 : f32
    %941 = vector.broadcast %cst_277 : f32 to vector<8x128xf32>
    %942 = arith.mulf %940, %941 : vector<8x128xf32>
    %943 = arith.mulf %942, %852 : vector<8x128xf32>
    %cst_278 = arith.constant 2.000000e-01 : f32
    %944 = vector.broadcast %cst_278 : f32 to vector<8x128xf32>
    %945 = arith.subf %944, %809 : vector<8x128xf32>
    %cst_279 = arith.constant 2.500000e+00 : f32
    %946 = vector.broadcast %cst_279 : f32 to vector<8x128xf32>
    %947 = arith.mulf %945, %946 : vector<8x128xf32>
    %948 = arith.mulf %947, %859 : vector<8x128xf32>
    %949 = arith.addf %943, %948 : vector<8x128xf32>
    %cst_280 = arith.constant -2.000000e-01 : f32
    %950 = vector.broadcast %cst_280 : f32 to vector<8x128xf32>
    %951 = arith.subf %809, %950 : vector<8x128xf32>
    %cst_281 = arith.constant 2.500000e+00 : f32
    %952 = vector.broadcast %cst_281 : f32 to vector<8x128xf32>
    %953 = arith.mulf %951, %952 : vector<8x128xf32>
    %954 = arith.mulf %953, %859 : vector<8x128xf32>
    %cst_282 = arith.constant 6.000000e-01 : f32
    %955 = vector.broadcast %cst_282 : f32 to vector<8x128xf32>
    %956 = arith.subf %955, %809 : vector<8x128xf32>
    %cst_283 = arith.constant 2.500000e+00 : f32
    %957 = vector.broadcast %cst_283 : f32 to vector<8x128xf32>
    %958 = arith.mulf %956, %957 : vector<8x128xf32>
    %959 = arith.mulf %958, %866 : vector<8x128xf32>
    %960 = arith.addf %954, %959 : vector<8x128xf32>
    %cst_284 = arith.constant 2.000000e-01 : f32
    %961 = vector.broadcast %cst_284 : f32 to vector<8x128xf32>
    %962 = arith.subf %809, %961 : vector<8x128xf32>
    %cst_285 = arith.constant 2.500000e+00 : f32
    %963 = vector.broadcast %cst_285 : f32 to vector<8x128xf32>
    %964 = arith.mulf %962, %963 : vector<8x128xf32>
    %965 = arith.mulf %964, %866 : vector<8x128xf32>
    %cst_286 = arith.constant 1.000000e+00 : f32
    %966 = vector.broadcast %cst_286 : f32 to vector<8x128xf32>
    %967 = arith.subf %966, %809 : vector<8x128xf32>
    %cst_287 = arith.constant 2.500000e+00 : f32
    %968 = vector.broadcast %cst_287 : f32 to vector<8x128xf32>
    %969 = arith.mulf %967, %968 : vector<8x128xf32>
    %970 = arith.mulf %969, %873 : vector<8x128xf32>
    %971 = arith.addf %965, %970 : vector<8x128xf32>
    %cst_288 = arith.constant 6.000000e-01 : f32
    %972 = vector.broadcast %cst_288 : f32 to vector<8x128xf32>
    %973 = arith.subf %809, %972 : vector<8x128xf32>
    %cst_289 = arith.constant 2.500000e+00 : f32
    %974 = vector.broadcast %cst_289 : f32 to vector<8x128xf32>
    %975 = arith.mulf %973, %974 : vector<8x128xf32>
    %976 = arith.mulf %975, %873 : vector<8x128xf32>
    %cst_290 = arith.constant 1.400000e+00 : f32
    %977 = vector.broadcast %cst_290 : f32 to vector<8x128xf32>
    %978 = arith.subf %977, %809 : vector<8x128xf32>
    %cst_291 = arith.constant 2.500000e+00 : f32
    %979 = vector.broadcast %cst_291 : f32 to vector<8x128xf32>
    %980 = arith.mulf %978, %979 : vector<8x128xf32>
    %981 = arith.mulf %980, %880 : vector<8x128xf32>
    %982 = arith.addf %976, %981 : vector<8x128xf32>
    %cst_292 = arith.constant 1.000000e+00 : f32
    %983 = vector.broadcast %cst_292 : f32 to vector<8x128xf32>
    %984 = arith.subf %809, %983 : vector<8x128xf32>
    %cst_293 = arith.constant 2.500000e+00 : f32
    %985 = vector.broadcast %cst_293 : f32 to vector<8x128xf32>
    %986 = arith.mulf %984, %985 : vector<8x128xf32>
    %987 = arith.mulf %986, %880 : vector<8x128xf32>
    %cst_294 = arith.constant 1.800000e+00 : f32
    %988 = vector.broadcast %cst_294 : f32 to vector<8x128xf32>
    %989 = arith.subf %988, %809 : vector<8x128xf32>
    %cst_295 = arith.constant 2.500000e+00 : f32
    %990 = vector.broadcast %cst_295 : f32 to vector<8x128xf32>
    %991 = arith.mulf %989, %990 : vector<8x128xf32>
    %992 = arith.mulf %991, %887 : vector<8x128xf32>
    %993 = arith.addf %987, %992 : vector<8x128xf32>
    %cst_296 = arith.constant 1.400000e+00 : f32
    %994 = vector.broadcast %cst_296 : f32 to vector<8x128xf32>
    %995 = arith.subf %809, %994 : vector<8x128xf32>
    %cst_297 = arith.constant 2.500000e+00 : f32
    %996 = vector.broadcast %cst_297 : f32 to vector<8x128xf32>
    %997 = arith.mulf %995, %996 : vector<8x128xf32>
    %998 = arith.mulf %997, %887 : vector<8x128xf32>
    %cst_298 = arith.constant 2.200000e+00 : f32
    %999 = vector.broadcast %cst_298 : f32 to vector<8x128xf32>
    %1000 = arith.subf %999, %809 : vector<8x128xf32>
    %cst_299 = arith.constant 2.500000e+00 : f32
    %1001 = vector.broadcast %cst_299 : f32 to vector<8x128xf32>
    %1002 = arith.mulf %1000, %1001 : vector<8x128xf32>
    %1003 = arith.mulf %1002, %894 : vector<8x128xf32>
    %1004 = arith.addf %998, %1003 : vector<8x128xf32>
    %cst_300 = arith.constant -2.200000e+00 : f32
    %1005 = vector.broadcast %cst_300 : f32 to vector<8x128xf32>
    %1006 = arith.subf %809, %1005 : vector<8x128xf32>
    %cst_301 = arith.constant 1.250000e+00 : f32
    %1007 = vector.broadcast %cst_301 : f32 to vector<8x128xf32>
    %1008 = arith.mulf %1006, %1007 : vector<8x128xf32>
    %1009 = arith.mulf %1008, %905 : vector<8x128xf32>
    %cst_302 = arith.constant -1.000000e+00 : f32
    %1010 = vector.broadcast %cst_302 : f32 to vector<8x128xf32>
    %1011 = arith.subf %1010, %809 : vector<8x128xf32>
    %cst_303 = arith.constant 1.250000e+00 : f32
    %1012 = vector.broadcast %cst_303 : f32 to vector<8x128xf32>
    %1013 = arith.mulf %1011, %1012 : vector<8x128xf32>
    %1014 = arith.mulf %1013, %916 : vector<8x128xf32>
    %1015 = arith.addf %1009, %1014 : vector<8x128xf32>
    %cst_304 = arith.constant -1.800000e+00 : f32
    %1016 = vector.broadcast %cst_304 : f32 to vector<8x128xf32>
    %1017 = arith.subf %809, %1016 : vector<8x128xf32>
    %cst_305 = arith.constant 1.250000e+00 : f32
    %1018 = vector.broadcast %cst_305 : f32 to vector<8x128xf32>
    %1019 = arith.mulf %1017, %1018 : vector<8x128xf32>
    %1020 = arith.mulf %1019, %916 : vector<8x128xf32>
    %cst_306 = arith.constant -6.000000e-01 : f32
    %1021 = vector.broadcast %cst_306 : f32 to vector<8x128xf32>
    %1022 = arith.subf %1021, %809 : vector<8x128xf32>
    %cst_307 = arith.constant 1.250000e+00 : f32
    %1023 = vector.broadcast %cst_307 : f32 to vector<8x128xf32>
    %1024 = arith.mulf %1022, %1023 : vector<8x128xf32>
    %1025 = arith.mulf %1024, %927 : vector<8x128xf32>
    %1026 = arith.addf %1020, %1025 : vector<8x128xf32>
    %cst_308 = arith.constant -1.400000e+00 : f32
    %1027 = vector.broadcast %cst_308 : f32 to vector<8x128xf32>
    %1028 = arith.subf %809, %1027 : vector<8x128xf32>
    %cst_309 = arith.constant 1.250000e+00 : f32
    %1029 = vector.broadcast %cst_309 : f32 to vector<8x128xf32>
    %1030 = arith.mulf %1028, %1029 : vector<8x128xf32>
    %1031 = arith.mulf %1030, %927 : vector<8x128xf32>
    %cst_310 = arith.constant -2.000000e-01 : f32
    %1032 = vector.broadcast %cst_310 : f32 to vector<8x128xf32>
    %1033 = arith.subf %1032, %809 : vector<8x128xf32>
    %cst_311 = arith.constant 1.250000e+00 : f32
    %1034 = vector.broadcast %cst_311 : f32 to vector<8x128xf32>
    %1035 = arith.mulf %1033, %1034 : vector<8x128xf32>
    %1036 = arith.mulf %1035, %938 : vector<8x128xf32>
    %1037 = arith.addf %1031, %1036 : vector<8x128xf32>
    %cst_312 = arith.constant -1.000000e+00 : f32
    %1038 = vector.broadcast %cst_312 : f32 to vector<8x128xf32>
    %1039 = arith.subf %809, %1038 : vector<8x128xf32>
    %cst_313 = arith.constant 1.250000e+00 : f32
    %1040 = vector.broadcast %cst_313 : f32 to vector<8x128xf32>
    %1041 = arith.mulf %1039, %1040 : vector<8x128xf32>
    %1042 = arith.mulf %1041, %938 : vector<8x128xf32>
    %cst_314 = arith.constant 2.000000e-01 : f32
    %1043 = vector.broadcast %cst_314 : f32 to vector<8x128xf32>
    %1044 = arith.subf %1043, %809 : vector<8x128xf32>
    %cst_315 = arith.constant 1.250000e+00 : f32
    %1045 = vector.broadcast %cst_315 : f32 to vector<8x128xf32>
    %1046 = arith.mulf %1044, %1045 : vector<8x128xf32>
    %1047 = arith.mulf %1046, %949 : vector<8x128xf32>
    %1048 = arith.addf %1042, %1047 : vector<8x128xf32>
    %cst_316 = arith.constant -6.000000e-01 : f32
    %1049 = vector.broadcast %cst_316 : f32 to vector<8x128xf32>
    %1050 = arith.subf %809, %1049 : vector<8x128xf32>
    %cst_317 = arith.constant 1.250000e+00 : f32
    %1051 = vector.broadcast %cst_317 : f32 to vector<8x128xf32>
    %1052 = arith.mulf %1050, %1051 : vector<8x128xf32>
    %1053 = arith.mulf %1052, %949 : vector<8x128xf32>
    %cst_318 = arith.constant 6.000000e-01 : f32
    %1054 = vector.broadcast %cst_318 : f32 to vector<8x128xf32>
    %1055 = arith.subf %1054, %809 : vector<8x128xf32>
    %cst_319 = arith.constant 1.250000e+00 : f32
    %1056 = vector.broadcast %cst_319 : f32 to vector<8x128xf32>
    %1057 = arith.mulf %1055, %1056 : vector<8x128xf32>
    %1058 = arith.mulf %1057, %960 : vector<8x128xf32>
    %1059 = arith.addf %1053, %1058 : vector<8x128xf32>
    %cst_320 = arith.constant -2.000000e-01 : f32
    %1060 = vector.broadcast %cst_320 : f32 to vector<8x128xf32>
    %1061 = arith.subf %809, %1060 : vector<8x128xf32>
    %cst_321 = arith.constant 1.250000e+00 : f32
    %1062 = vector.broadcast %cst_321 : f32 to vector<8x128xf32>
    %1063 = arith.mulf %1061, %1062 : vector<8x128xf32>
    %1064 = arith.mulf %1063, %960 : vector<8x128xf32>
    %cst_322 = arith.constant 1.000000e+00 : f32
    %1065 = vector.broadcast %cst_322 : f32 to vector<8x128xf32>
    %1066 = arith.subf %1065, %809 : vector<8x128xf32>
    %cst_323 = arith.constant 1.250000e+00 : f32
    %1067 = vector.broadcast %cst_323 : f32 to vector<8x128xf32>
    %1068 = arith.mulf %1066, %1067 : vector<8x128xf32>
    %1069 = arith.mulf %1068, %971 : vector<8x128xf32>
    %1070 = arith.addf %1064, %1069 : vector<8x128xf32>
    %cst_324 = arith.constant 2.000000e-01 : f32
    %1071 = vector.broadcast %cst_324 : f32 to vector<8x128xf32>
    %1072 = arith.subf %809, %1071 : vector<8x128xf32>
    %cst_325 = arith.constant 1.250000e+00 : f32
    %1073 = vector.broadcast %cst_325 : f32 to vector<8x128xf32>
    %1074 = arith.mulf %1072, %1073 : vector<8x128xf32>
    %1075 = arith.mulf %1074, %971 : vector<8x128xf32>
    %cst_326 = arith.constant 1.400000e+00 : f32
    %1076 = vector.broadcast %cst_326 : f32 to vector<8x128xf32>
    %1077 = arith.subf %1076, %809 : vector<8x128xf32>
    %cst_327 = arith.constant 1.250000e+00 : f32
    %1078 = vector.broadcast %cst_327 : f32 to vector<8x128xf32>
    %1079 = arith.mulf %1077, %1078 : vector<8x128xf32>
    %1080 = arith.mulf %1079, %982 : vector<8x128xf32>
    %1081 = arith.addf %1075, %1080 : vector<8x128xf32>
    %cst_328 = arith.constant 6.000000e-01 : f32
    %1082 = vector.broadcast %cst_328 : f32 to vector<8x128xf32>
    %1083 = arith.subf %809, %1082 : vector<8x128xf32>
    %cst_329 = arith.constant 1.250000e+00 : f32
    %1084 = vector.broadcast %cst_329 : f32 to vector<8x128xf32>
    %1085 = arith.mulf %1083, %1084 : vector<8x128xf32>
    %1086 = arith.mulf %1085, %982 : vector<8x128xf32>
    %cst_330 = arith.constant 1.800000e+00 : f32
    %1087 = vector.broadcast %cst_330 : f32 to vector<8x128xf32>
    %1088 = arith.subf %1087, %809 : vector<8x128xf32>
    %cst_331 = arith.constant 1.250000e+00 : f32
    %1089 = vector.broadcast %cst_331 : f32 to vector<8x128xf32>
    %1090 = arith.mulf %1088, %1089 : vector<8x128xf32>
    %1091 = arith.mulf %1090, %993 : vector<8x128xf32>
    %1092 = arith.addf %1086, %1091 : vector<8x128xf32>
    %cst_332 = arith.constant 1.000000e+00 : f32
    %1093 = vector.broadcast %cst_332 : f32 to vector<8x128xf32>
    %1094 = arith.subf %809, %1093 : vector<8x128xf32>
    %cst_333 = arith.constant 1.250000e+00 : f32
    %1095 = vector.broadcast %cst_333 : f32 to vector<8x128xf32>
    %1096 = arith.mulf %1094, %1095 : vector<8x128xf32>
    %1097 = arith.mulf %1096, %993 : vector<8x128xf32>
    %cst_334 = arith.constant 2.200000e+00 : f32
    %1098 = vector.broadcast %cst_334 : f32 to vector<8x128xf32>
    %1099 = arith.subf %1098, %809 : vector<8x128xf32>
    %cst_335 = arith.constant 1.250000e+00 : f32
    %1100 = vector.broadcast %cst_335 : f32 to vector<8x128xf32>
    %1101 = arith.mulf %1099, %1100 : vector<8x128xf32>
    %1102 = arith.mulf %1101, %1004 : vector<8x128xf32>
    %1103 = arith.addf %1097, %1102 : vector<8x128xf32>
    %cst_336 = arith.constant -2.200000e+00 : f32
    %1104 = vector.broadcast %cst_336 : f32 to vector<8x128xf32>
    %1105 = arith.subf %809, %1104 : vector<8x128xf32>
    %cst_337 = arith.constant 0.833333313 : f32
    %1106 = vector.broadcast %cst_337 : f32 to vector<8x128xf32>
    %1107 = arith.mulf %1105, %1106 : vector<8x128xf32>
    %1108 = arith.mulf %1107, %1015 : vector<8x128xf32>
    %cst_338 = arith.constant -6.000000e-01 : f32
    %1109 = vector.broadcast %cst_338 : f32 to vector<8x128xf32>
    %1110 = arith.subf %1109, %809 : vector<8x128xf32>
    %cst_339 = arith.constant 0.833333313 : f32
    %1111 = vector.broadcast %cst_339 : f32 to vector<8x128xf32>
    %1112 = arith.mulf %1110, %1111 : vector<8x128xf32>
    %1113 = arith.mulf %1112, %1026 : vector<8x128xf32>
    %1114 = arith.addf %1108, %1113 : vector<8x128xf32>
    %cst_340 = arith.constant -1.800000e+00 : f32
    %1115 = vector.broadcast %cst_340 : f32 to vector<8x128xf32>
    %1116 = arith.subf %809, %1115 : vector<8x128xf32>
    %cst_341 = arith.constant 0.833333313 : f32
    %1117 = vector.broadcast %cst_341 : f32 to vector<8x128xf32>
    %1118 = arith.mulf %1116, %1117 : vector<8x128xf32>
    %1119 = arith.mulf %1118, %1026 : vector<8x128xf32>
    %cst_342 = arith.constant -2.000000e-01 : f32
    %1120 = vector.broadcast %cst_342 : f32 to vector<8x128xf32>
    %1121 = arith.subf %1120, %809 : vector<8x128xf32>
    %cst_343 = arith.constant 0.833333313 : f32
    %1122 = vector.broadcast %cst_343 : f32 to vector<8x128xf32>
    %1123 = arith.mulf %1121, %1122 : vector<8x128xf32>
    %1124 = arith.mulf %1123, %1037 : vector<8x128xf32>
    %1125 = arith.addf %1119, %1124 : vector<8x128xf32>
    %cst_344 = arith.constant -1.400000e+00 : f32
    %1126 = vector.broadcast %cst_344 : f32 to vector<8x128xf32>
    %1127 = arith.subf %809, %1126 : vector<8x128xf32>
    %cst_345 = arith.constant 0.833333313 : f32
    %1128 = vector.broadcast %cst_345 : f32 to vector<8x128xf32>
    %1129 = arith.mulf %1127, %1128 : vector<8x128xf32>
    %1130 = arith.mulf %1129, %1037 : vector<8x128xf32>
    %cst_346 = arith.constant 2.000000e-01 : f32
    %1131 = vector.broadcast %cst_346 : f32 to vector<8x128xf32>
    %1132 = arith.subf %1131, %809 : vector<8x128xf32>
    %cst_347 = arith.constant 0.833333313 : f32
    %1133 = vector.broadcast %cst_347 : f32 to vector<8x128xf32>
    %1134 = arith.mulf %1132, %1133 : vector<8x128xf32>
    %1135 = arith.mulf %1134, %1048 : vector<8x128xf32>
    %1136 = arith.addf %1130, %1135 : vector<8x128xf32>
    %cst_348 = arith.constant -1.000000e+00 : f32
    %1137 = vector.broadcast %cst_348 : f32 to vector<8x128xf32>
    %1138 = arith.subf %809, %1137 : vector<8x128xf32>
    %cst_349 = arith.constant 0.833333313 : f32
    %1139 = vector.broadcast %cst_349 : f32 to vector<8x128xf32>
    %1140 = arith.mulf %1138, %1139 : vector<8x128xf32>
    %1141 = arith.mulf %1140, %1048 : vector<8x128xf32>
    %cst_350 = arith.constant 6.000000e-01 : f32
    %1142 = vector.broadcast %cst_350 : f32 to vector<8x128xf32>
    %1143 = arith.subf %1142, %809 : vector<8x128xf32>
    %cst_351 = arith.constant 0.833333313 : f32
    %1144 = vector.broadcast %cst_351 : f32 to vector<8x128xf32>
    %1145 = arith.mulf %1143, %1144 : vector<8x128xf32>
    %1146 = arith.mulf %1145, %1059 : vector<8x128xf32>
    %1147 = arith.addf %1141, %1146 : vector<8x128xf32>
    %cst_352 = arith.constant -6.000000e-01 : f32
    %1148 = vector.broadcast %cst_352 : f32 to vector<8x128xf32>
    %1149 = arith.subf %809, %1148 : vector<8x128xf32>
    %cst_353 = arith.constant 0.833333313 : f32
    %1150 = vector.broadcast %cst_353 : f32 to vector<8x128xf32>
    %1151 = arith.mulf %1149, %1150 : vector<8x128xf32>
    %1152 = arith.mulf %1151, %1059 : vector<8x128xf32>
    %cst_354 = arith.constant 1.000000e+00 : f32
    %1153 = vector.broadcast %cst_354 : f32 to vector<8x128xf32>
    %1154 = arith.subf %1153, %809 : vector<8x128xf32>
    %cst_355 = arith.constant 0.833333313 : f32
    %1155 = vector.broadcast %cst_355 : f32 to vector<8x128xf32>
    %1156 = arith.mulf %1154, %1155 : vector<8x128xf32>
    %1157 = arith.mulf %1156, %1070 : vector<8x128xf32>
    %1158 = arith.addf %1152, %1157 : vector<8x128xf32>
    %cst_356 = arith.constant -2.000000e-01 : f32
    %1159 = vector.broadcast %cst_356 : f32 to vector<8x128xf32>
    %1160 = arith.subf %809, %1159 : vector<8x128xf32>
    %cst_357 = arith.constant 0.833333313 : f32
    %1161 = vector.broadcast %cst_357 : f32 to vector<8x128xf32>
    %1162 = arith.mulf %1160, %1161 : vector<8x128xf32>
    %1163 = arith.mulf %1162, %1070 : vector<8x128xf32>
    %cst_358 = arith.constant 1.400000e+00 : f32
    %1164 = vector.broadcast %cst_358 : f32 to vector<8x128xf32>
    %1165 = arith.subf %1164, %809 : vector<8x128xf32>
    %cst_359 = arith.constant 0.833333313 : f32
    %1166 = vector.broadcast %cst_359 : f32 to vector<8x128xf32>
    %1167 = arith.mulf %1165, %1166 : vector<8x128xf32>
    %1168 = arith.mulf %1167, %1081 : vector<8x128xf32>
    %1169 = arith.addf %1163, %1168 : vector<8x128xf32>
    %cst_360 = arith.constant 2.000000e-01 : f32
    %1170 = vector.broadcast %cst_360 : f32 to vector<8x128xf32>
    %1171 = arith.subf %809, %1170 : vector<8x128xf32>
    %cst_361 = arith.constant 0.833333313 : f32
    %1172 = vector.broadcast %cst_361 : f32 to vector<8x128xf32>
    %1173 = arith.mulf %1171, %1172 : vector<8x128xf32>
    %1174 = arith.mulf %1173, %1081 : vector<8x128xf32>
    %cst_362 = arith.constant 1.800000e+00 : f32
    %1175 = vector.broadcast %cst_362 : f32 to vector<8x128xf32>
    %1176 = arith.subf %1175, %809 : vector<8x128xf32>
    %cst_363 = arith.constant 0.833333313 : f32
    %1177 = vector.broadcast %cst_363 : f32 to vector<8x128xf32>
    %1178 = arith.mulf %1176, %1177 : vector<8x128xf32>
    %1179 = arith.mulf %1178, %1092 : vector<8x128xf32>
    %1180 = arith.addf %1174, %1179 : vector<8x128xf32>
    %cst_364 = arith.constant 6.000000e-01 : f32
    %1181 = vector.broadcast %cst_364 : f32 to vector<8x128xf32>
    %1182 = arith.subf %809, %1181 : vector<8x128xf32>
    %cst_365 = arith.constant 0.833333313 : f32
    %1183 = vector.broadcast %cst_365 : f32 to vector<8x128xf32>
    %1184 = arith.mulf %1182, %1183 : vector<8x128xf32>
    %1185 = arith.mulf %1184, %1092 : vector<8x128xf32>
    %cst_366 = arith.constant 2.200000e+00 : f32
    %1186 = vector.broadcast %cst_366 : f32 to vector<8x128xf32>
    %1187 = arith.subf %1186, %809 : vector<8x128xf32>
    %cst_367 = arith.constant 0.833333313 : f32
    %1188 = vector.broadcast %cst_367 : f32 to vector<8x128xf32>
    %1189 = arith.mulf %1187, %1188 : vector<8x128xf32>
    %1190 = arith.mulf %1189, %1103 : vector<8x128xf32>
    %1191 = arith.addf %1185, %1190 : vector<8x128xf32>
    %c776 = arith.constant 776 : index
    %c0_368 = arith.constant 0 : index
    %1192 = vector.load %arg1[%c776, %c0_368] : memref<1800x128xf32, #tpu.memory_space<vmem>>, vector<128x128xf32>
    %cst_369 = arith.constant dense<0.000000e+00> : vector<8x128xf32>
    %1193 = tpu.matmul %1114, %1192, %cst_369 {dimension_numbers = #tpu.dot_dimension_numbers<[1], [0], [0], [1], [0, 0, 1, 1], [], []>} : vector<8x128xf32>, vector<128x128xf32>, vector<8x128xf32> -> vector<8x128xf32>
    %1194 = arith.addf %817, %1193 : vector<8x128xf32>
    %c904 = arith.constant 904 : index
    %c0_370 = arith.constant 0 : index
    %1195 = vector.load %arg1[%c904, %c0_370] : memref<1800x128xf32, #tpu.memory_space<vmem>>, vector<128x128xf32>
    %cst_371 = arith.constant dense<0.000000e+00> : vector<8x128xf32>
    %1196 = tpu.matmul %1125, %1195, %cst_371 {dimension_numbers = #tpu.dot_dimension_numbers<[1], [0], [0], [1], [0, 0, 1, 1], [], []>} : vector<8x128xf32>, vector<128x128xf32>, vector<8x128xf32> -> vector<8x128xf32>
    %1197 = arith.addf %1194, %1196 : vector<8x128xf32>
    %c1032 = arith.constant 1032 : index
    %c0_372 = arith.constant 0 : index
    %1198 = vector.load %arg1[%c1032, %c0_372] : memref<1800x128xf32, #tpu.memory_space<vmem>>, vector<128x128xf32>
    %cst_373 = arith.constant dense<0.000000e+00> : vector<8x128xf32>
    %1199 = tpu.matmul %1136, %1198, %cst_373 {dimension_numbers = #tpu.dot_dimension_numbers<[1], [0], [0], [1], [0, 0, 1, 1], [], []>} : vector<8x128xf32>, vector<128x128xf32>, vector<8x128xf32> -> vector<8x128xf32>
    %1200 = arith.addf %1197, %1199 : vector<8x128xf32>
    %c1160 = arith.constant 1160 : index
    %c0_374 = arith.constant 0 : index
    %1201 = vector.load %arg1[%c1160, %c0_374] : memref<1800x128xf32, #tpu.memory_space<vmem>>, vector<128x128xf32>
    %cst_375 = arith.constant dense<0.000000e+00> : vector<8x128xf32>
    %1202 = tpu.matmul %1147, %1201, %cst_375 {dimension_numbers = #tpu.dot_dimension_numbers<[1], [0], [0], [1], [0, 0, 1, 1], [], []>} : vector<8x128xf32>, vector<128x128xf32>, vector<8x128xf32> -> vector<8x128xf32>
    %1203 = arith.addf %1200, %1202 : vector<8x128xf32>
    %c1288 = arith.constant 1288 : index
    %c0_376 = arith.constant 0 : index
    %1204 = vector.load %arg1[%c1288, %c0_376] : memref<1800x128xf32, #tpu.memory_space<vmem>>, vector<128x128xf32>
    %cst_377 = arith.constant dense<0.000000e+00> : vector<8x128xf32>
    %1205 = tpu.matmul %1158, %1204, %cst_377 {dimension_numbers = #tpu.dot_dimension_numbers<[1], [0], [0], [1], [0, 0, 1, 1], [], []>} : vector<8x128xf32>, vector<128x128xf32>, vector<8x128xf32> -> vector<8x128xf32>
    %1206 = arith.addf %1203, %1205 : vector<8x128xf32>
    %c1416 = arith.constant 1416 : index
    %c0_378 = arith.constant 0 : index
    %1207 = vector.load %arg1[%c1416, %c0_378] : memref<1800x128xf32, #tpu.memory_space<vmem>>, vector<128x128xf32>
    %cst_379 = arith.constant dense<0.000000e+00> : vector<8x128xf32>
    %1208 = tpu.matmul %1169, %1207, %cst_379 {dimension_numbers = #tpu.dot_dimension_numbers<[1], [0], [0], [1], [0, 0, 1, 1], [], []>} : vector<8x128xf32>, vector<128x128xf32>, vector<8x128xf32> -> vector<8x128xf32>
    %1209 = arith.addf %1206, %1208 : vector<8x128xf32>
    %c1544 = arith.constant 1544 : index
    %c0_380 = arith.constant 0 : index
    %1210 = vector.load %arg1[%c1544, %c0_380] : memref<1800x128xf32, #tpu.memory_space<vmem>>, vector<128x128xf32>
    %cst_381 = arith.constant dense<0.000000e+00> : vector<8x128xf32>
    %1211 = tpu.matmul %1180, %1210, %cst_381 {dimension_numbers = #tpu.dot_dimension_numbers<[1], [0], [0], [1], [0, 0, 1, 1], [], []>} : vector<8x128xf32>, vector<128x128xf32>, vector<8x128xf32> -> vector<8x128xf32>
    %1212 = arith.addf %1209, %1211 : vector<8x128xf32>
    %c1672 = arith.constant 1672 : index
    %c0_382 = arith.constant 0 : index
    %1213 = vector.load %arg1[%c1672, %c0_382] : memref<1800x128xf32, #tpu.memory_space<vmem>>, vector<128x128xf32>
    %cst_383 = arith.constant dense<0.000000e+00> : vector<8x128xf32>
    %1214 = tpu.matmul %1191, %1213, %cst_383 {dimension_numbers = #tpu.dot_dimension_numbers<[1], [0], [0], [1], [0, 0, 1, 1], [], []>} : vector<8x128xf32>, vector<128x128xf32>, vector<8x128xf32> -> vector<8x128xf32>
    %1215 = arith.addf %1212, %1214 : vector<8x128xf32>
    %c0_384 = arith.constant 0 : index
    %c0_385 = arith.constant 0 : index
    %1216 = vector.load %arg2[%c0_384, %c0_385] : memref<8x128xf32, #tpu.memory_space<vmem>>, vector<8x128xf32>
    tpu.vector_store %arg2[%c0_384, %c0_385], %1215 {strides = array<i32>} : memref<8x128xf32, #tpu.memory_space<vmem>>, vector<8x128xf32>,
    return
  }
}

</mosaic_0001>

<bundles_post_ra>
// kernel: cnn_lstm_forward.1
= control target key start
LH: loop header
LB: loop body
LE: loop exit
PB: predicated region body
PF: predicated region fallthrough
CT: control target
= control target key end

     0   :  { %v5044_v46 = vmov 0.0   ;;  %vm5045_vm0 = vmmov 0   ;;  %v5046_v55 = vmov 0   ;;  %v198_v59 = vlaneseq  ;;  %s5047_s30 = smov 64   ;;  %s6627_s1 = inlined_call_operand.vmem [shape: f32[1800,128], index: 1, kind: input, shape index: {}]   ;;  %s6628_s0 = inlined_call_operand.vmem [shape: f32[128,128], index: 0, kind: input, shape index: {}]   ;;  %s6629_s2 = inlined_call_operand.vmem [shape: f32[8,128], index: 2, kind: output, shape index: {}]  }
   0x1   :  { %v44_v0 = vld [vmem:[%s6627_s1 + $0x78] sm:$0xff]  ;;  %v43_v1 = vld [vmem:[%s6627_s1 + $0x70] sm:$0xff]  ;;  %v42_v2 = vld [vmem:[%s6627_s1 + $0x68] sm:$0xff]  ;;  %4329 = vmatprep.subr.bf16.mxu1 %v5044_v46  ;;  %4333 = vmatprep.mubr.msk.bf16.mxu1 %vm5045_vm0, %v5044_v46  ;;  %vm361_vm1 = vcmask 261120  }
   0x2   :  { %4229 = vmatprep.subr.mxu0 %v44_v0  ;;  %v41_v3 = vld [vmem:[%s6627_s1 + $0x60] sm:$0xff]  ;;  %v40_v5 = vld [vmem:[%s6627_s1 + $0x58] sm:$0xff]  ;;  %v39_v6 = vld [vmem:[%s6627_s1 + $0x50] sm:$0xff]  ;;  %v5235_v62 = vshrl.u32 %v198_v59, 7 }
   0x3   :  { %4230 = vmatpush3.msra.mxu0 %v44_v0  ;;  %v13_v4 = vld [vmem:[%s6628_s0] sm:$0xff]  ;;  %v38_v7 = vld [vmem:[%s6627_s1 + $0x48] sm:$0xff]  ;;  %v36_v9 = vld [vmem:[%s6627_s1 + $0x38] sm:$0xff] }
   0x4   :  { %4231 = vmatprep.subr.mxu0 %v43_v1  ;;  %4261 = vmatprep.mubr.f32.mxu0 %v13_v4  ;;  %v37_v8 = vld [vmem:[%s6627_s1 + $0x40] sm:$0xff]  ;;  %v35_v10 = vld [vmem:[%s6627_s1 + $0x30] sm:$0xff]  ;;  %v34_v11 = vld [vmem:[%s6627_s1 + $0x28] sm:$0xff] }
   0x5   :  { %4232 = vmatpush3.msra.mxu0 %v43_v1  ;;  %v33_v12 = vld [vmem:[%s6627_s1 + $0x20] sm:$0xff]  ;;  %v32_v13 = vld [vmem:[%s6627_s1 + $0x18] sm:$0xff]  ;;  %v31_v14 = vld [vmem:[%s6627_s1 + $0x10] sm:$0xff]  ;;  %v200_v1 = vsub.s32 0, %v5235_v62 }
   0x6   :  { %4233 = vmatprep.subr.mxu0 %v42_v2  ;;  %v30_v15 = vld [vmem:[%s6627_s1 + $0x8] sm:$0xff]  ;;  %v29_v16 = vld [vmem:[%s6627_s1] sm:$0xff]  ;;  %v233_v18 = vld [vmem:[%s6627_s1 + $0xf8] sm:$0xff] }
   0x7   :  { %4234 = vmatpush3.msra.mxu0 %v42_v2  ;;  %v14_v17 = vld [vmem:[%s6628_s0 + $0x8] sm:$0xff]  ;;  %v15_v19 = vld [vmem:[%s6628_s0 + $0x10] sm:$0xff]  ;;  %v16_v21 = vld [vmem:[%s6628_s0 + $0x18] sm:$0xff] }
   0x8   :  { %4235 = vmatprep.subr.mxu0 %v41_v3  ;;  %v232_v20 = vld [vmem:[%s6627_s1 + $0xf0] sm:$0xff]  ;;  %v231_v22 = vld [vmem:[%s6627_s1 + $0xe8] sm:$0xff]  ;;  %v17_v23 = vld [vmem:[%s6628_s0 + $0x20] sm:$0xff] }
   0x9   :  { %4236 = vmatpush3.msra.mxu0 %v41_v3  ;;  %v230_v24 = vld [vmem:[%s6627_s1 + $0xe0] sm:$0xff]  ;;  %v18_v25 = vld [vmem:[%s6628_s0 + $0x28] sm:$0xff]  ;;  %v19_v26 = vld [vmem:[%s6628_s0 + $0x30] sm:$0xff] }
   0xa   :  { %4237 = vmatprep.subr.mxu0 %v40_v5  ;;  %v20_v27 = vld [vmem:[%s6628_s0 + $0x38] sm:$0xff]  ;;  %v21_v28 = vld [vmem:[%s6628_s0 + $0x40] sm:$0xff]  ;;  %v22_v29 = vld [vmem:[%s6628_s0 + $0x48] sm:$0xff] }
   0xb   :  { %4238 = vmatpush3.msra.mxu0 %v40_v5  ;;  %v23_v30 = vld [vmem:[%s6628_s0 + $0x50] sm:$0xff]  ;;  %v24_v31 = vld [vmem:[%s6628_s0 + $0x58] sm:$0xff]  ;;  %v25_v32 = vld [vmem:[%s6628_s0 + $0x60] sm:$0xff] }
   0xc   :  { %4239 = vmatprep.subr.mxu0 %v39_v6  ;;  %v26_v33 = vld [vmem:[%s6628_s0 + $0x68] sm:$0xff]  ;;  %v27_v34 = vld [vmem:[%s6628_s0 + $0x70] sm:$0xff]  ;;  %v28_v35 = vld [vmem:[%s6628_s0 + $0x78] sm:$0xff]  ;;  %s5048_s0 = smov 32  }
   0xd   :  { %4240 = vmatpush3.msra.mxu0 %v39_v6  ;;  %v229_v36 = vld [vmem:[%s6627_s1 + $0xd8] sm:$0xff]  ;;  %v228_v37 = vld [vmem:[%s6627_s1 + $0xd0] sm:$0xff]  ;;  %v227_v38 = vld [vmem:[%s6627_s1 + $0xc8] sm:$0xff] }
   0xe   :  { %4241 = vmatprep.subr.mxu0 %v38_v7  ;;  %v226_v39 = vld [vmem:[%s6627_s1 + $0xc0] sm:$0xff]  ;;  %v225_v40 = vld [vmem:[%s6627_s1 + $0xb8] sm:$0xff]  ;;  %v224_v41 = vld [vmem:[%s6627_s1 + $0xb0] sm:$0xff] }
   0xf   :  { %4242 = vmatpush3.msra.mxu0 %v38_v7  ;;  %v223_v42 = vld [vmem:[%s6627_s1 + $0xa8] sm:$0xff]  ;;  %v222_v43 = vld [vmem:[%s6627_s1 + $0xa0] sm:$0xff]  ;;  %v345_v44 = vld [vmem:[%s6627_s1 + $0x110] sm:$0xff] }
  0x10   :  { %4243 = vmatprep.subr.mxu0 %v37_v8  ;;  %v346_v45 = vld [vmem:[%s6627_s1 + $0x118] sm:$0xff]  ;;  %v343_v49 = vld [vmem:[%s6627_s1 + $0x100] sm:$0xff]  ;;  %v344_v50 = vld [vmem:[%s6627_s1 + $0x108] sm:$0xff] }
  0x11   :  { %4244 = vmatpush3.msra.mxu0 %v37_v8  ;;  %v5203_v47 = vpack.c.bf16 %v346_v45, %v345_v44  ;;  %v221_v48 = vld [vmem:[%s6627_s1 + $0x98] sm:$0xff]  ;;  %v220_v51 = vld [vmem:[%s6627_s1 + $0x90] sm:$0xff]  ;;  %v5219_v52 = vpack.c.bf16 %v344_v50, %v343_v49  ;;  %v219_v53 = vld [vmem:[%s6627_s1 + $0x88] sm:$0xff] }
  0x12   :  { %4245 = vmatprep.subr.mxu0 %v36_v9  ;;  %v218_v54 = vld [vmem:[%s6627_s1 + $0x80] sm:$0xff] }
  0x13   :  { %4246 = vmatpush3.msra.mxu0 %v36_v9  ;;  %4330 = vmatpush3.bf16.msra.mxu1 %v5203_v47  ;;  %v5241_v2 = vld [vmem:[%s6627_s1 + $0x160] sm:$0xff] }
  0x14   :  { %4247 = vmatprep.subr.mxu0 %v35_v10  ;;  %4331 = vmatprep.subr.bf16.mxu1 %v5044_v46  ;;  %v201_v5 = vrot.slane %v5241_v2, %v200_v1 }
  0x15   :  { %4248 = vmatpush3.msra.mxu0 %v35_v10 }
  0x16   :  { %4249 = vmatprep.subr.mxu0 %v34_v11 }
  0x17   :  { %4250 = vmatpush3.msra.mxu0 %v34_v11  ;;  %4332 = vmatpush3.bf16.msra.mxu1 %v5219_v52 }
  0x18   :  { %4251 = vmatprep.subr.mxu0 %v33_v12  ;;  %4337 = vmatprep.subr.bf16.mxu1 %v5044_v46 }
  0x19   :  { %4252 = vmatpush3.msra.mxu0 %v33_v12 }
  0x1a   :  { %4253 = vmatprep.subr.mxu0 %v32_v13  ;;  %4334 = vmatmul.mubr.bf16.vlgmr.msra.gmra.mxu1 %v5046_v55 }
  0x1b   :  { %4254 = vmatpush3.msra.mxu0 %v32_v13  ;;  %4341 = vmatprep.mubr.msk.bf16.mxu1 %vm5045_vm0, %v5044_v46 }
  0x1c   :  { %4255 = vmatprep.subr.mxu0 %v31_v14 }
  0x1d   :  { %4256 = vmatpush3.msra.mxu0 %v31_v14 }
  0x1e   :  { %4257 = vmatprep.subr.mxu0 %v30_v15 }
  0x1f   :  { %4258 = vmatpush3.msra.mxu0 %v30_v15 }
  0x20   :  { %4259 = vmatprep.subr.mxu0 %v29_v16 }
  0x21   :  { %4260 = vmatpush3.msra.mxu0 %v29_v16 }
  0x22   :  { %4262 = vmatmul.mubr.f32.vlgmr.msra.gmra.mxu0 %v14_v17  ;;  %4285 = vmatprep.subr.mxu0 %v233_v18 }
  0x23   :  { %4264 = vmatprep.mubr.f32.mxu0 %v15_v19  ;;  %4286 = vmatpush3.msra.mxu0 %v233_v18 }
  0x24   :  { %4287 = vmatprep.subr.mxu0 %v232_v20 }
  0x25   :  { %4288 = vmatpush3.msra.mxu0 %v232_v20 }
  0x26   :  { %4265 = vmatmul.mubr.f32.gmra.mxu0 %v16_v21  ;;  %4289 = vmatprep.subr.mxu0 %v231_v22 }
  0x27   :  { %4267 = vmatprep.mubr.f32.mxu0 %v17_v23  ;;  %4290 = vmatpush3.msra.mxu0 %v231_v22 }
  0x28   :  { %4291 = vmatprep.subr.mxu0 %v230_v24 }
  0x29   :  { %4292 = vmatpush3.msra.mxu0 %v230_v24 }
  0x2a   :  { %4268 = vmatmul.mubr.f32.gmra.mxu0 %v18_v25  ;;  %4293 = vmatprep.subr.mxu0 %v229_v36 }
  0x2b   :  { %4270 = vmatprep.mubr.f32.mxu0 %v19_v26  ;;  %4294 = vmatpush3.msra.mxu0 %v229_v36 }
  0x2c   :  { %4295 = vmatprep.subr.mxu0 %v228_v37 }
  0x2d   :  { %4296 = vmatpush3.msra.mxu0 %v228_v37 }
  0x2e   :  { %4271 = vmatmul.mubr.f32.gmra.mxu0 %v20_v27  ;;  %4297 = vmatprep.subr.mxu0 %v227_v38 }
  0x2f   :  { %4273 = vmatprep.mubr.f32.mxu0 %v21_v28  ;;  %4298 = vmatpush3.msra.mxu0 %v227_v38 }
  0x30   :  { %4299 = vmatprep.subr.mxu0 %v226_v39 }
  0x31   :  { %4300 = vmatpush3.msra.mxu0 %v226_v39 }
  0x32   :  { %4274 = vmatmul.mubr.f32.gmra.mxu0 %v22_v29  ;;  %4301 = vmatprep.subr.mxu0 %v225_v40 }
  0x33   :  { %4276 = vmatprep.mubr.f32.mxu0 %v23_v30  ;;  %4302 = vmatpush3.msra.mxu0 %v225_v40 }
  0x34   :  { %4303 = vmatprep.subr.mxu0 %v224_v41 }
  0x35   :  { %4304 = vmatpush3.msra.mxu0 %v224_v41  ;;  %v236_v41 = vsub.s32 1, %v5235_v62 }
  0x36   :  { %4277 = vmatmul.mubr.f32.gmra.mxu0 %v24_v31  ;;  %4305 = vmatprep.subr.mxu0 %v223_v42 }
  0x37   :  { %4279 = vmatprep.mubr.f32.mxu0 %v25_v32  ;;  %4306 = vmatpush3.msra.mxu0 %v223_v42  ;;  %v5252_v42 = vrot.slane %v5241_v2, %v236_v41 }
  0x38   :  { %4307 = vmatprep.subr.mxu0 %v222_v43 }
  0x39   :  { %4308 = vmatpush3.msra.mxu0 %v222_v43 }
  0x3a   :  { %4280 = vmatmul.mubr.f32.gmra.mxu0 %v26_v33  ;;  %4309 = vmatprep.subr.mxu0 %v221_v48 }
  0x3b   :  { %4282 = vmatprep.mubr.f32.mxu0 %v27_v34  ;;  %4310 = vmatpush3.msra.mxu0 %v221_v48 }
  0x3c   :  { %4311 = vmatprep.subr.mxu0 %v220_v51 }
  0x3d   :  { %4312 = vmatpush3.msra.mxu0 %v220_v51 }
  0x3e   :  { %4283 = vmatmul.mubr.f32.gmra.mxu0 %v28_v35  ;;  %4313 = vmatprep.subr.mxu0 %v219_v53 }
  0x3f   :  { %4314 = vmatpush3.msra.mxu0 %v219_v53 }
  0x40   :  { %4315 = vmatprep.subr.mxu0 %v218_v54 }
  0x41   :  { %4316 = vmatpush3.msra.mxu0 %v218_v54 }
  0x42   :  { %4377 = vmatprep.subr.bf16.mxu0 %v5044_v46 }
  0xda   :  { %v399_v37 = vpop.f32.mrf.mxu1 }
  0xdc   :  { %v4335_v38 = vpop.f32.mrf.mxu1 }
  0xde   :  { %v402_v39 = vpop.f32.mrf.mxu1 }
  0xe0   :  { %v4336_v40 = vpop.f32.mrf.mxu1 }
  0xe2   :  { %v4263_v56 = vpop.f32.mrf.mxu0 }
  0xe4   :  { %v111_v57 = vpop.f32.mrf.mxu0 }
  0xe6   :  { %v4266_v58 = vpop.f32.mrf.mxu0 }
  0xe8   :  { %v121_v60 = vpop.f32.mrf.mxu0 }
  0xea   :  { %v4269_v61 = vpop.f32.mrf.mxu0 }
  0xec   :  { %v131_v63 = vpop.f32.mrf.mxu0 }
  0xee   :  { %v4272_v0 = vpop.f32.mrf.mxu0 }
  0xf0   :  { %v141_v3 = vpop.f32.mrf.mxu0 }
  0xf2   :  { %v4275_v4 = vpop.f32.mrf.mxu0 }
  0xf3   :  { %v191_v6 = vmax.f32 %v4263_v56, %v4275_v4 }
  0xf4   :  { %v151_v7 = vpop.f32.mrf.mxu0 }
  0xf5   :  { %v190_v8 = vmax.f32 %v111_v57, %v151_v7  ;;  %v203_v9 = vadd.f32 %v201_v5, %v191_v6 }
  0xf6   :  { %v4278_v10 = vpop.f32.mrf.mxu0 }
  0xf7   :  { %v202_v11 = vadd.f32 %v201_v5, %v190_v8  ;;  %v193_v12 = vmax.f32 %v4266_v58, %v4278_v10  ;;  %v211_v16 = vmax.f32 %v203_v9, 0.0  ;;  %v351_v10 = vld [vmem:[%s6627_s1 + $0x130] sm:$0xff] }
  0xf8   :  { %v161_v13 = vpop.f32.mrf.mxu0 }
  0xf9   :  { %v210_v14 = vmax.f32 %v202_v11, 0.0  ;;  %v192_v15 = vmax.f32 %v121_v60, %v161_v13  ;;  %v205_v17 = vadd.f32 %v201_v5, %v193_v12  ;;  %v352_v11 = vld [vmem:[%s6627_s1 + $0x138] sm:$0xff]  ;;  %v349_v12 = vld [vmem:[%s6627_s1 + $0x120] sm:$0xff] }
  0xfa   :  { %v4281_v18 = vpop.f32.mrf.mxu0  ;;  %v5286_v13 = vpack.c.bf16 %v352_v11, %v351_v10 }
  0xfb   :  { %v204_v19 = vadd.f32 %v201_v5, %v192_v15  ;;  %v195_v20 = vmax.f32 %v4269_v61, %v4281_v18  ;;  %4317 = vmatprep.mubr.f32.mxu0 %v210_v14  ;;  %v213_v24 = vmax.f32 %v205_v17, 0.0  ;;  %v350_v14 = vld [vmem:[%s6627_s1 + $0x128] sm:$0xff] }
  0xfc   :  { %v171_v21 = vpop.f32.mrf.mxu0  ;;  %4318 = vmatmul.mubr.f32.vlgmr.msra.gmra.mxu0 %v211_v16  ;;  %4338 = vmatpush3.bf16.msra.mxu1 %v5286_v13  ;;  %v5292_v15 = vpack.c.bf16 %v350_v14, %v349_v12 }
  0xfd   :  { %v212_v22 = vmax.f32 %v204_v19, 0.0  ;;  %v194_v23 = vmax.f32 %v131_v63, %v171_v21  ;;  %4378 = vmatpush3.bf16.msra.mxu0 %v5203_v47  ;;  %v207_v25 = vadd.f32 %v201_v5, %v195_v20  ;;  %4339 = vmatprep.subr.bf16.mxu1 %v5044_v46  ;;  %v357_v20 = vld [vmem:[%s6627_s1 + $0x150] sm:$0xff]  ;;  %v358_v21 = vld [vmem:[%s6627_s1 + $0x158] sm:$0xff] }
  0xfe   :  { %v4284_v26 = vpop.f32.mrf.mxu0  ;;  %4379 = vmatprep.subr.bf16.mxu0 %v5044_v46 }
  0xff   :  { %v206_v27 = vadd.f32 %v201_v5, %v194_v23  ;;  %v197_v28 = vmax.f32 %v4272_v0, %v4284_v26  ;;  %4320 = vmatprep.mubr.f32.mxu0 %v212_v22  ;;  %v215_v32 = vmax.f32 %v207_v25, 0.0  ;;  %v5305_v22 = vpack.c.bf16 %v358_v21, %v357_v20  ;;  %v355_v23 = vld [vmem:[%s6627_s1 + $0x140] sm:$0xff] }
 0x100   :  { %v181_v29 = vpop.f32.mrf.mxu0  ;;  %4321 = vmatmul.mubr.f32.gmra.mxu0 %v213_v24  ;;  %4340 = vmatpush3.bf16.msra.mxu1 %v5292_v15  ;;  %v356_v24 = vld [vmem:[%s6627_s1 + $0x148] sm:$0xff] }
 0x101   :  { %v214_v30 = vmax.f32 %v206_v27, 0.0  ;;  %v196_v31 = vmax.f32 %v141_v3, %v181_v29  ;;  %4380 = vmatpush3.bf16.msra.mxu0 %v5219_v52  ;;  %v209_v33 = vadd.f32 %v201_v5, %v197_v28  ;;  %4345 = vmatprep.subr.bf16.mxu1 %v5044_v46  ;;  %v5315_v26 = vpack.c.bf16 %v356_v24, %v355_v23 }
 0x102   :  { %4393 = vmatprep.subr.bf16.mxu0 %v5044_v46 }
 0x103   :  { %v208_v34 = vadd.f32 %v201_v5, %v196_v31  ;;  %4323 = vmatprep.mubr.f32.mxu0 %v214_v30  ;;  %v217_v36 = vmax.f32 %v209_v33, 0.0 }
 0x104   :  { %4324 = vmatmul.mubr.f32.gmra.mxu0 %v215_v32 }
 0x105   :  { %v216_v35 = vmax.f32 %v208_v34, 0.0 }
 0x107   :  { %4326 = vmatprep.mubr.f32.mxu0 %v216_v35 }
 0x108   :  { %4327 = vmatmul.mubr.f32.gmra.mxu0 %v217_v36 }
 0x109   :  { %4381 = vmatprep.mubr.msk.bf16.mxu0 %vm5045_vm0, %v5044_v46 }
 0x1bc   :  { %v4319_v43 = vpop.f32.mrf.mxu0 }
 0x1bd   :  { %v5255_v44 = vadd.f32 %v4319_v43, %v5252_v42 }
 0x1be   :  { %v304_v45 = vpop.f32.mrf.mxu0 }
 0x1bf   :  { %v305_v48 = vadd.f32 %v304_v45, %v5252_v42 }
 0x1c0   :  { %v4322_v49 = vpop.f32.mrf.mxu0 }
 0x1c1   :  { %v405_v50 = vadd.f32 %v399_v37, %v305_v48  ;;  %v5259_v51 = vadd.f32 %v4322_v49, %v5252_v42 }
 0x1c2   :  { %v5261_v53 = vpop.f32.mrf.mxu0 }
 0x1c3   :  { %v3796_v54 = vmul.f32 -1.442695, %v405_v50 }
 0x1c4   :  { %v4325_v56 = vpop.f32.mrf.mxu0 }
 0x1c5   :  { %4940 = vpow2.f32 %v3796_v54  ;;  %v5264_v57 = vadd.f32 %v4325_v56, %v5252_v42 }
 0x1c6   :  { %v324_v58 = vpop.f32.mrf.mxu0 }
 0x1c7   :  { %v5267_v59 = vadd.f32 %v324_v58, %v5252_v42 }
 0x1c8   :  { %v4328_v60 = vpop.f32.mrf.mxu0 }
 0x1c9   :  { %v5270_v61 = vadd.f32 %v4328_v60, %v5252_v42 }
 0x1ca   :  { %v5378_v24 = vpop.f32.mrf.mxu0 }
 0x1d2   :  { %v4941_v63 = vpop.eup %4940 }
 0x1d3   :  { %v409_v0 = vadd.f32 1.0, %v4941_v63 }
 0x1d5   :  { %4942 = vrcp.f32 %v409_v0 }
 0x1e2   :  { %v4943_v1 = vpop.eup %4942 }
 0x1e3   :  { %v412_v3 = vmul.f32 2.0, %v4943_v1  ;;  %v414_v7 = vmul.f32 0.0, %v4943_v1 }
 0x1e5   :  { %v3797_v4 = vadd.f32 -1.0, %v412_v3 }
 0x1e7   :  { %416 = vrot.lane.b32.xlu0 %v3797_v4, %s5047_s30 }
 0x259   :  { %v417_v5 = vpop.permute.xlu0 %416 }
 0x25a   :  { %v419_v6 = vmul.f32 %v4943_v1, %v417_v5 }
 0x25c   :  { %421 = vrot.lane.b32.xlu0 %v419_v6, %s5048_s0 }
 0x2ce   :  { %v422_v8 = vpop.permute.xlu0 %421 }
 0x2cf   :  { %v5274_v9 = vadd.f32 %v422_v8, %v414_v7 }
 0x2d1   :  { %4944 = vtanh.f32 %v5274_v9 }
 0x2de   :  { %v4945_v16 = vpop.eup %4944 }
 0x2df   :  { %427 = vrot.lane.b32.xlu1 %v4945_v16, %s5047_s30 }
 0x351   :  { %v428_v17 = vpop.permute.xlu1 %427 }
 0x352   :  { %v430_v18 = vmul.f32 %v4943_v1, %v428_v17 }
 0x354   :  { %v431_v19 = vpack.c.bf16 %v430_v18, %v430_v18 }
 0x356   :  { %433 = vrot.lane.b32.xlu1 %v431_v19, %s5048_s0 }
 0x3c8   :  { %v434_v25 = vpop.permute.xlu1 %433 }
 0x3c9   :  { %4342 = vmatmul.mubr.msk.bf16.vlgmr.msra.gmra.mxu1 %vm361_vm1, %v434_v25 }
 0x3ca   :  { %4346 = vmatpush3.bf16.msra.mxu1 %v5305_v22  ;;  %4349 = vmatprep.mubr.msk.bf16.mxu1 %vm5045_vm0, %v5044_v46 }
 0x3cb   :  { %4347 = vmatprep.subr.bf16.mxu1 %v5044_v46 }
 0x3ce   :  { %4348 = vmatpush3.bf16.msra.mxu1 %v5315_v26 }
 0x3cf   :  { %4353 = vmatprep.subr.bf16.mxu1 %v5044_v46 }
 0x3d1   :  { %4350 = vmatmul.mubr.bf16.vlgmr.msra.gmra.mxu1 %v5046_v55  ;;  %v480_v55 = vsub.s32 2, %v5235_v62 }
 0x3d2   :  { %4354 = vmatpush3.bf16.msra.mxu1 %v5203_v47  ;;  %4357 = vmatprep.mubr.msk.bf16.mxu1 %vm5045_vm0, %v5044_v46 }
 0x3d3   :  { %4355 = vmatprep.subr.bf16.mxu1 %v5044_v46  ;;  %v5338_v29 = vrot.slane %v5241_v2, %v480_v55 }
 0x3d6   :  { %4356 = vmatpush3.bf16.msra.mxu1 %v5219_v52 }
 0x3d7   :  { %4361 = vmatprep.subr.bf16.mxu1 %v5044_v46 }
 0x3d9   :  { %4358 = vmatmul.mubr.msk.bf16.vlgmr.msra.gmra.mxu1 %vm361_vm1, %v434_v25  ;;  %v315_v25 = vadd.f32 %v5261_v53, %v5252_v42 }
 0x3da   :  { %4362 = vmatpush3.bf16.msra.mxu1 %v5286_v13  ;;  %4365 = vmatprep.mubr.msk.bf16.mxu1 %vm5045_vm0, %v5044_v46 }
 0x3db   :  { %4363 = vmatprep.subr.bf16.mxu1 %v5044_v46 }
 0x3de   :  { %4364 = vmatpush3.bf16.msra.mxu1 %v5292_v15 }
 0x3df   :  { %4369 = vmatprep.subr.bf16.mxu1 %v5044_v46 }
 0x489   :  { %v472_v27 = vpop.f32.mrf.mxu1 }
 0x48a   :  { %v482_v32 = vadd.f32 %v5338_v29, %v472_v27 }
 0x48b   :  { %v4343_v28 = vpop.f32.mrf.mxu1 }
 0x48d   :  { %v475_v30 = vpop.f32.mrf.mxu1 }
 0x48f   :  { %v4344_v31 = vpop.f32.mrf.mxu1 }
 0x491   :  { %v517_v33 = vpop.f32.mrf.mxu1 }
 0x492   :  { %v523_v34 = vadd.f32 %v517_v33, %v482_v32 }
 0x493   :  { %v4351_v35 = vpop.f32.mrf.mxu1 }
 0x494   :  { %v3799_v36 = vmul.f32 -1.442695, %v523_v34 }
 0x495   :  { %v520_v37 = vpop.f32.mrf.mxu1 }
 0x496   :  { %4946 = vpow2.f32 %v3799_v36 }
 0x497   :  { %v4352_v38 = vpop.f32.mrf.mxu1 }
 0x499   :  { %v583_v39 = vpop.f32.mrf.mxu1 }
 0x49a   :  { %v589_v40 = vadd.f32 %v583_v39, %v5255_v44 }
 0x49b   :  { %v4359_v62 = vpop.f32.mrf.mxu1 }
 0x49c   :  { %v3802_v41 = vmul.f32 -1.442695, %v589_v40 }
 0x49d   :  { %v586_v43 = vpop.f32.mrf.mxu1 }
 0x49e   :  { %4948 = vpow2.f32 %v3802_v41 }
 0x49f   :  { %v4360_v2 = vpop.f32.mrf.mxu1 }
 0x4a3   :  { %v4947_v45 = vpop.eup %4946 }
 0x4a4   :  { %v527_v48 = vadd.f32 1.0, %v4947_v45 }
 0x4a6   :  { %4950 = vrcp.f32 %v527_v48 }
 0x4ab   :  { %v4949_v49 = vpop.eup %4948 }
 0x4ac   :  { %v593_v50 = vadd.f32 1.0, %v4949_v49 }
 0x4ae   :  { %4952 = vrcp.f32 %v593_v50 }
 0x4b3   :  { %v4951_v54 = vpop.eup %4950 }
 0x4b4   :  { %v530_v56 = vmul.f32 2.0, %v4951_v54  ;;  %v532_v5 = vmul.f32 0.0, %v4951_v54 }
 0x4b6   :  { %v3800_v58 = vadd.f32 -1.0, %v530_v56 }
 0x4b8   :  { %534 = vrot.lane.b32.xlu1 %v3800_v58, %s5047_s30 }
 0x4bb   :  { %v4953_v60 = vpop.eup %4952 }
 0x4bc   :  { %v596_v63 = vmul.f32 2.0, %v4953_v60  ;;  %v598_v8 = vmul.f32 %v4953_v60, %v5274_v9 }
 0x4be   :  { %v3803_v0 = vadd.f32 -1.0, %v596_v63 }
 0x4c0   :  { %600 = vrot.lane.b32.xlu0 %v3803_v0, %s5047_s30 }
 0x52a   :  { %v535_v44 = vpop.permute.xlu1 %534 }
 0x52b   :  { %v537_v1 = vmul.f32 %v4951_v54, %v535_v44 }
 0x52d   :  { %539 = vrot.lane.b32.xlu1 %v537_v1, %s5048_s0 }
 0x532   :  { %v601_v3 = vpop.permute.xlu0 %600 }
 0x533   :  { %v603_v4 = vmul.f32 %v4953_v60, %v601_v3 }
 0x535   :  { %605 = vrot.lane.b32.xlu0 %v603_v4, %s5048_s0 }
 0x59f   :  { %v540_v6 = vpop.permute.xlu1 %539 }
 0x5a0   :  { %v5346_v7 = vadd.f32 %v540_v6, %v532_v5 }
 0x5a2   :  { %4954 = vtanh.f32 %v5346_v7 }
 0x5a7   :  { %v606_v10 = vpop.permute.xlu0 %605 }
 0x5a8   :  { %v5350_v11 = vadd.f32 %v606_v10, %v598_v8 }
 0x5aa   :  { %4956 = vtanh.f32 %v5350_v11 }
 0x5af   :  { %v4955_v12 = vpop.eup %4954 }
 0x5b0   :  { %545 = vrot.lane.b32.xlu1 %v4955_v12, %s5047_s30 }
 0x5b7   :  { %v4957_v14 = vpop.eup %4956 }
 0x5b8   :  { %611 = vrot.lane.b32.xlu0 %v4957_v14, %s5047_s30 }
 0x622   :  { %v546_v16 = vpop.permute.xlu1 %545 }
 0x623   :  { %v548_v17 = vmul.f32 %v4951_v54, %v546_v16 }
 0x625   :  { %v663_v18 = vpack.c.bf16 %v548_v17, %v548_v17 }
 0x627   :  { %665 = vrot.lane.b32.xlu1 %v663_v18, %s5048_s0 }
 0x62a   :  { %v612_v19 = vpop.permute.xlu0 %611 }
 0x62b   :  { %v614_v20 = vmul.f32 %v4953_v60, %v612_v19 }
 0x62d   :  { %v615_v21 = vpack.c.bf16 %v614_v20, %v614_v20 }
 0x62f   :  { %617 = vrot.lane.b32.xlu0 %v615_v21, %s5048_s0 }
 0x699   :  { %v666_v23 = vpop.permute.xlu1 %665 }
 0x6a1   :  { %v618_v9 = vpop.permute.xlu0 %617 }
 0x6a2   :  { %4366 = vmatmul.mubr.msk.bf16.vlgmr.msra.gmra.mxu1 %vm361_vm1, %v618_v9  ;;  %4382 = vmatmul.mubr.msk.bf16.vlgmr.msra.gmra.mxu0 %vm361_vm1, %v618_v9 }
 0x6a3   :  { %4370 = vmatpush3.bf16.msra.mxu1 %v5305_v22  ;;  %4373 = vmatprep.mubr.msk.bf16.mxu1 %vm5045_vm0, %v5044_v46 }
 0x6a4   :  { %4371 = vmatprep.subr.bf16.mxu1 %v5044_v46  ;;  %4394 = vmatpush3.bf16.msra.mxu0 %v5305_v22 }
 0x6a5   :  { %4395 = vmatprep.subr.bf16.mxu0 %v5044_v46  ;;  %4397 = vmatprep.mubr.msk.bf16.mxu0 %vm5045_vm0, %v5044_v46 }
 0x6a7   :  { %4372 = vmatpush3.bf16.msra.mxu1 %v5315_v26 }
 0x6a8   :  { %4385 = vmatprep.subr.bf16.mxu1 %v5044_v46  ;;  %4396 = vmatpush3.bf16.msra.mxu0 %v5315_v26 }
 0x6a9   :  { %4409 = vmatprep.subr.bf16.mxu0 %v5044_v46 }
 0x6aa   :  { %4374 = vmatmul.mubr.msk.bf16.vlgmr.msra.gmra.mxu1 %vm361_vm1, %v666_v23 }
 0x6ab   :  { %4386 = vmatpush3.bf16.msra.mxu1 %v5286_v13  ;;  %4389 = vmatprep.mubr.msk.bf16.mxu1 %vm5045_vm0, %v5044_v46 }
 0x6ac   :  { %4387 = vmatprep.subr.bf16.mxu1 %v5044_v46 }
 0x6af   :  { %4388 = vmatpush3.bf16.msra.mxu1 %v5292_v15 }
 0x6b0   :  { %4401 = vmatprep.subr.bf16.mxu1 %v5044_v46 }
 0x762   :  { %v656_v55 = vpop.f32.mrf.mxu1  ;;  %v770_v27 = vpop.f32.mrf.mxu0 }
 0x763   :  { %v776_v28 = vadd.f32 %v770_v27, %v315_v25  ;;  %v662_v37 = vadd.f32 %v656_v55, %v5338_v29 }
 0x764   :  { %v4367_v30 = vpop.f32.mrf.mxu1  ;;  %v4383_v31 = vpop.f32.mrf.mxu0 }
 0x765   :  { %v3809_v32 = vmul.f32 -1.442695, %v776_v28 }
 0x766   :  { %v659_v33 = vpop.f32.mrf.mxu1  ;;  %v773_v34 = vpop.f32.mrf.mxu0 }
 0x767   :  { %4958 = vpow2.f32 %v3809_v32 }
 0x768   :  { %v4368_v35 = vpop.f32.mrf.mxu1  ;;  %v4384_v36 = vpop.f32.mrf.mxu0 }
 0x76a   :  { %v704_v38 = vpop.f32.mrf.mxu1 }
 0x76b   :  { %v710_v39 = vadd.f32 %v704_v38, %v662_v37 }
 0x76c   :  { %v4375_v40 = vpop.f32.mrf.mxu1 }
 0x76d   :  { %v3806_v62 = vmul.f32 -1.442695, %v710_v39 }
 0x76e   :  { %v707_v41 = vpop.f32.mrf.mxu1 }
 0x76f   :  { %4960 = vpow2.f32 %v3806_v62 }
 0x770   :  { %v4376_v53 = vpop.f32.mrf.mxu1 }
 0x774   :  { %v4959_v43 = vpop.eup %4958 }
 0x775   :  { %v780_v2 = vadd.f32 1.0, %v4959_v43 }
 0x777   :  { %4962 = vrcp.f32 %v780_v2 }
 0x77c   :  { %v4961_v45 = vpop.eup %4960 }
 0x77d   :  { %v714_v48 = vadd.f32 1.0, %v4961_v45 }
 0x77f   :  { %4964 = vrcp.f32 %v714_v48 }
 0x784   :  { %v4963_v49 = vpop.eup %4962 }
 0x785   :  { %v783_v50 = vmul.f32 2.0, %v4963_v49  ;;  %v785_v3 = vmul.f32 %v4963_v49, %v5350_v11 }
 0x787   :  { %v3810_v54 = vadd.f32 -1.0, %v783_v50 }
 0x789   :  { %787 = vrot.lane.b32.xlu0 %v3810_v54, %s5047_s30 }
 0x78c   :  { %v4965_v56 = vpop.eup %4964 }
 0x78d   :  { %v717_v58 = vmul.f32 2.0, %v4965_v56  ;;  %v719_v6 = vmul.f32 %v4965_v56, %v5346_v7 }
 0x78f   :  { %v3807_v60 = vadd.f32 -1.0, %v717_v58 }
 0x791   :  { %721 = vrot.lane.b32.xlu1 %v3807_v60, %s5047_s30 }
 0x7fb   :  { %v788_v63 = vpop.permute.xlu0 %787 }
 0x7fc   :  { %v790_v0 = vmul.f32 %v4963_v49, %v788_v63 }
 0x7fe   :  { %792 = vrot.lane.b32.xlu0 %v790_v0, %s5048_s0 }
 0x803   :  { %v722_v44 = vpop.permute.xlu1 %721 }
 0x804   :  { %v724_v1 = vmul.f32 %v4965_v56, %v722_v44 }
 0x806   :  { %726 = vrot.lane.b32.xlu1 %v724_v1, %s5048_s0 }
 0x870   :  { %v793_v4 = vpop.permute.xlu0 %792 }
 0x871   :  { %v5388_v5 = vadd.f32 %v793_v4, %v785_v3 }
 0x873   :  { %4966 = vtanh.f32 %v5388_v5 }
 0x878   :  { %v727_v8 = vpop.permute.xlu1 %726 }
 0x879   :  { %v5392_v10 = vadd.f32 %v727_v8, %v719_v6 }
 0x87b   :  { %4968 = vtanh.f32 %v5392_v10 }
 0x880   :  { %v4967_v12 = vpop.eup %4966 }
 0x881   :  { %798 = vrot.lane.b32.xlu0 %v4967_v12, %s5047_s30 }
 0x888   :  { %v4969_v14 = vpop.eup %4968 }
 0x889   :  { %732 = vrot.lane.b32.xlu1 %v4969_v14, %s5047_s30 }
 0x8f3   :  { %v799_v16 = vpop.permute.xlu0 %798 }
 0x8f4   :  { %v801_v11 = vmul.f32 %v4963_v49, %v799_v16 }
 0x8f6   :  { %v802_v17 = vpack.c.bf16 %v801_v11, %v801_v11 }
 0x8f8   :  { %804 = vrot.lane.b32.xlu0 %v802_v17, %s5048_s0 }
 0x8fb   :  { %v733_v18 = vpop.permute.xlu1 %732 }
 0x8fc   :  { %v735_v19 = vmul.f32 %v4965_v56, %v733_v18 }
 0x8fe   :  { %v850_v20 = vpack.c.bf16 %v735_v19, %v735_v19 }
 0x900   :  { %852 = vrot.lane.b32.xlu1 %v850_v20, %s5048_s0 }
 0x96a   :  { %v805_v7 = vpop.permute.xlu0 %804 }
 0x96b   :  { %4390 = vmatmul.mubr.msk.bf16.vlgmr.msra.gmra.mxu1 %vm361_vm1, %v805_v7 }
 0x96c   :  { %4402 = vmatpush3.bf16.msra.mxu1 %v5203_v47  ;;  %4405 = vmatprep.mubr.msk.bf16.mxu1 %vm5045_vm0, %v5044_v46 }
 0x96d   :  { %4403 = vmatprep.subr.bf16.mxu1 %v5044_v46 }
 0x970   :  { %4404 = vmatpush3.bf16.msra.mxu1 %v5219_v52 }
 0x971   :  { %4417 = vmatprep.subr.bf16.mxu1 %v5044_v46 }
 0x972   :  { %v853_v21 = vpop.permute.xlu1 %852 }
 0x973   :  { %4398 = vmatmul.mubr.msk.bf16.vlgmr.msra.gmra.mxu0 %vm361_vm1, %v853_v21  ;;  %4406 = vmatmul.mubr.msk.bf16.vlgmr.msra.gmra.mxu1 %vm361_vm1, %v805_v7 }
 0x974   :  { %4410 = vmatpush3.bf16.msra.mxu0 %v5286_v13  ;;  %4418 = vmatpush3.bf16.msra.mxu1 %v5305_v22 }
 0x975   :  { %4411 = vmatprep.subr.bf16.mxu0 %v5044_v46  ;;  %4419 = vmatprep.subr.bf16.mxu1 %v5044_v46 }
 0x976   :  { %4413 = vmatprep.mubr.msk.bf16.mxu0 %vm5045_vm0, %v5044_v46  ;;  %4421 = vmatprep.mubr.msk.bf16.mxu1 %vm5045_vm0, %v5044_v46 }
 0x978   :  { %4412 = vmatpush3.bf16.msra.mxu0 %v5292_v15  ;;  %4420 = vmatpush3.bf16.msra.mxu1 %v5315_v26 }
 0x979   :  { %4425 = vmatprep.subr.bf16.mxu0 %v5044_v46  ;;  %4433 = vmatprep.subr.bf16.mxu1 %v5044_v46 }
 0xa2b   :  { %v843_v9 = vpop.f32.mrf.mxu1 }
 0xa2c   :  { %v849_v27 = vadd.f32 %v843_v9, %v5338_v29 }
 0xa2d   :  { %v4391_v23 = vpop.f32.mrf.mxu1 }
 0xa2f   :  { %v846_v25 = vpop.f32.mrf.mxu1 }
 0xa31   :  { %v4392_v55 = vpop.f32.mrf.mxu1 }
 0xa33   :  { %v891_v28 = vpop.f32.mrf.mxu0  ;;  %v957_v30 = vpop.f32.mrf.mxu1 }
 0xa34   :  { %v897_v31 = vadd.f32 %v891_v28, %v849_v27  ;;  %v963_v32 = vadd.f32 %v957_v30, %v5259_v51 }
 0xa35   :  { %v4399_v33 = vpop.f32.mrf.mxu0  ;;  %v4407_v34 = vpop.f32.mrf.mxu1 }
 0xa36   :  { %v3813_v35 = vmul.f32 -1.442695, %v897_v31  ;;  %v3816_v36 = vmul.f32 -1.442695, %v963_v32 }
 0xa37   :  { %v894_v37 = vpop.f32.mrf.mxu0  ;;  %v960_v38 = vpop.f32.mrf.mxu1 }
 0xa38   :  { %4970 = vpow2.f32 %v3813_v35 }
 0xa39   :  { %4972 = vpow2.f32 %v3816_v36  ;;  %v4400_v39 = vpop.f32.mrf.mxu0  ;;  %v4408_v40 = vpop.f32.mrf.mxu1 }
 0xa45   :  { %v4971_v62 = vpop.eup %4970 }
 0xa46   :  { %v4973_v41 = vpop.eup %4972  ;;  %v901_v53 = vadd.f32 1.0, %v4971_v62 }
 0xa47   :  { %v967_v43 = vadd.f32 1.0, %v4973_v41 }
 0xa48   :  { %4974 = vrcp.f32 %v901_v53 }
 0xa49   :  { %4976 = vrcp.f32 %v967_v43 }
 0xa55   :  { %v4975_v2 = vpop.eup %4974 }
 0xa56   :  { %v4977_v45 = vpop.eup %4976  ;;  %v904_v48 = vmul.f32 2.0, %v4975_v2  ;;  %v906_v63 = vmul.f32 %v4975_v2, %v5392_v10 }
 0xa57   :  { %v970_v51 = vmul.f32 2.0, %v4977_v45  ;;  %v972_v0 = vmul.f32 %v4977_v45, %v5388_v5 }
 0xa58   :  { %v3814_v49 = vadd.f32 -1.0, %v904_v48 }
 0xa59   :  { %v3817_v50 = vadd.f32 -1.0, %v970_v51 }
 0xa5a   :  { %908 = vrot.lane.b32.xlu1 %v3814_v49, %s5047_s30 }
 0xa5b   :  { %974 = vrot.lane.b32.xlu0 %v3817_v50, %s5047_s30 }
 0xacc   :  { %v909_v54 = vpop.permute.xlu1 %908 }
 0xacd   :  { %v975_v56 = vpop.permute.xlu0 %974  ;;  %v911_v58 = vmul.f32 %v4975_v2, %v909_v54 }
 0xace   :  { %v977_v60 = vmul.f32 %v4977_v45, %v975_v56 }
 0xacf   :  { %913 = vrot.lane.b32.xlu1 %v911_v58, %s5048_s0 }
 0xad0   :  { %979 = vrot.lane.b32.xlu0 %v977_v60, %s5048_s0 }
 0xb41   :  { %v914_v44 = vpop.permute.xlu1 %913 }
 0xb42   :  { %v980_v1 = vpop.permute.xlu0 %979  ;;  %v5428_v3 = vadd.f32 %v914_v44, %v906_v63 }
 0xb43   :  { %v5430_v4 = vadd.f32 %v980_v1, %v972_v0 }
 0xb44   :  { %4978 = vtanh.f32 %v5428_v3 }
 0xb45   :  { %4980 = vtanh.f32 %v5430_v4 }
 0xb51   :  { %v4979_v6 = vpop.eup %4978 }
 0xb52   :  { %v4981_v8 = vpop.eup %4980  ;;  %919 = vrot.lane.b32.xlu1 %v4979_v6, %s5047_s30 }
 0xb53   :  { %985 = vrot.lane.b32.xlu0 %v4981_v8, %s5047_s30 }
 0xbc4   :  { %v920_v12 = vpop.permute.xlu1 %919 }
 0xbc5   :  { %v986_v10 = vpop.permute.xlu0 %985  ;;  %v922_v14 = vmul.f32 %v4975_v2, %v920_v12 }
 0xbc6   :  { %v988_v5 = vmul.f32 %v4977_v45, %v986_v10 }
 0xbc7   :  { %v1037_v16 = vpack.c.bf16 %v922_v14, %v922_v14 }
 0xbc8   :  { %v989_v11 = vpack.c.bf16 %v988_v5, %v988_v5 }
 0xbc9   :  { %1039 = vrot.lane.b32.xlu1 %v1037_v16, %s5048_s0 }
 0xbca   :  { %991 = vrot.lane.b32.xlu0 %v989_v11, %s5048_s0 }
 0xc3b   :  { %v1040_v17 = vpop.permute.xlu1 %1039 }
 0xc3c   :  { %v992_v18 = vpop.permute.xlu0 %991  ;;  %4422 = vmatmul.mubr.msk.bf16.vlgmr.msra.gmra.mxu1 %vm361_vm1, %v1040_v17 }
 0xc3d   :  { %4414 = vmatmul.mubr.msk.bf16.vlgmr.msra.gmra.mxu0 %vm361_vm1, %v992_v18  ;;  %4434 = vmatpush3.bf16.msra.mxu1 %v5286_v13 }
 0xc3e   :  { %4426 = vmatpush3.bf16.msra.mxu0 %v5203_v47  ;;  %4429 = vmatprep.mubr.msk.bf16.mxu0 %vm5045_vm0, %v5044_v46 }
 0xc3f   :  { %4427 = vmatprep.subr.bf16.mxu0 %v5044_v46  ;;  %4435 = vmatprep.subr.bf16.mxu1 %v5044_v46 }
 0xc40   :  { %4437 = vmatprep.mubr.msk.bf16.mxu1 %vm5045_vm0, %v5044_v46 }
 0xc41   :  { %4436 = vmatpush3.bf16.msra.mxu1 %v5292_v15 }
 0xc42   :  { %4428 = vmatpush3.bf16.msra.mxu0 %v5219_v52  ;;  %4449 = vmatprep.subr.bf16.mxu1 %v5044_v46 }
 0xc43   :  { %4441 = vmatprep.subr.bf16.mxu0 %v5044_v46 }
 0xc45   :  { %4430 = vmatmul.mubr.msk.bf16.vlgmr.msra.gmra.mxu0 %vm361_vm1, %v992_v18 }
 0xc46   :  { %4442 = vmatpush3.bf16.msra.mxu0 %v5305_v22  ;;  %4445 = vmatprep.mubr.msk.bf16.mxu0 %vm5045_vm0, %v5044_v46 }
 0xc47   :  { %4443 = vmatprep.subr.bf16.mxu0 %v5044_v46 }
 0xc4a   :  { %4444 = vmatpush3.bf16.msra.mxu0 %v5315_v26 }
 0xc4b   :  { %4457 = vmatprep.subr.bf16.mxu0 %v5044_v46 }
 0xcfc   :  { %v1078_v19 = vpop.f32.mrf.mxu1 }
 0xcfd   :  { %v1030_v20 = vpop.f32.mrf.mxu0 }
 0xcfe   :  { %v1036_v7 = vadd.f32 %v1030_v20, %v5338_v29  ;;  %v4423_v21 = vpop.f32.mrf.mxu1 }
 0xcff   :  { %v4415_v9 = vpop.f32.mrf.mxu0 }
 0xd00   :  { %v1084_v23 = vadd.f32 %v1078_v19, %v1036_v7  ;;  %v1081_v25 = vpop.f32.mrf.mxu1 }
 0xd01   :  { %v1033_v55 = vpop.f32.mrf.mxu0 }
 0xd02   :  { %v3820_v27 = vmul.f32 -1.442695, %v1084_v23  ;;  %v4424_v28 = vpop.f32.mrf.mxu1 }
 0xd03   :  { %v4416_v30 = vpop.f32.mrf.mxu0 }
 0xd04   :  { %4982 = vpow2.f32 %v3820_v27 }
 0xd05   :  { %v1144_v31 = vpop.f32.mrf.mxu0 }
 0xd06   :  { %v1150_v32 = vadd.f32 %v1144_v31, %v5267_v59 }
 0xd07   :  { %v4431_v33 = vpop.f32.mrf.mxu0 }
 0xd08   :  { %v3823_v34 = vmul.f32 -1.442695, %v1150_v32 }
 0xd09   :  { %v1147_v35 = vpop.f32.mrf.mxu0 }
 0xd0a   :  { %4984 = vpow2.f32 %v3823_v34 }
 0xd0b   :  { %v4432_v36 = vpop.f32.mrf.mxu0 }
 0xd11   :  { %v4983_v37 = vpop.eup %4982 }
 0xd12   :  { %v1088_v38 = vadd.f32 1.0, %v4983_v37 }
 0xd14   :  { %4986 = vrcp.f32 %v1088_v38 }
 0xd17   :  { %v4985_v39 = vpop.eup %4984 }
 0xd18   :  { %v1154_v40 = vadd.f32 1.0, %v4985_v39 }
 0xd1a   :  { %4988 = vrcp.f32 %v1154_v40 }
 0xd21   :  { %v4987_v62 = vpop.eup %4986 }
 0xd22   :  { %v1091_v41 = vmul.f32 2.0, %v4987_v62  ;;  %v1093_v50 = vmul.f32 %v4987_v62, %v5428_v3 }
 0xd24   :  { %v3821_v53 = vadd.f32 -1.0, %v1091_v41 }
 0xd26   :  { %1095 = vrot.lane.b32.xlu1 %v3821_v53, %s5047_s30 }
 0xd27   :  { %v4989_v43 = vpop.eup %4988 }
 0xd28   :  { %v1157_v2 = vmul.f32 2.0, %v4989_v43  ;;  %v1159_v58 = vmul.f32 %v4989_v43, %v5430_v4 }
 0xd2a   :  { %v3824_v45 = vadd.f32 -1.0, %v1157_v2 }
 0xd2c   :  { %1161 = vrot.lane.b32.xlu0 %v3824_v45, %s5047_s30 }
 0xd98   :  { %v1096_v59 = vpop.permute.xlu1 %1095 }
 0xd99   :  { %v1098_v48 = vmul.f32 %v4987_v62, %v1096_v59 }
 0xd9b   :  { %1100 = vrot.lane.b32.xlu1 %v1098_v48, %s5048_s0 }
 0xd9e   :  { %v1162_v51 = vpop.permute.xlu0 %1161 }
 0xd9f   :  { %v1164_v49 = vmul.f32 %v4989_v43, %v1162_v51 }
 0xda1   :  { %1166 = vrot.lane.b32.xlu0 %v1164_v49, %s5048_s0 }
 0xe0d   :  { %v1101_v54 = vpop.permute.xlu1 %1100 }
 0xe0e   :  { %v5466_v56 = vadd.f32 %v1101_v54, %v1093_v50 }
 0xe10   :  { %4990 = vtanh.f32 %v5466_v56 }
 0xe13   :  { %v1167_v60 = vpop.permute.xlu0 %1166 }
 0xe14   :  { %v5470_v63 = vadd.f32 %v1167_v60, %v1159_v58 }
 0xe16   :  { %4992 = vtanh.f32 %v5470_v63 }
 0xe1d   :  { %v4991_v0 = vpop.eup %4990 }
 0xe1e   :  { %1106 = vrot.lane.b32.xlu1 %v4991_v0, %s5047_s30 }
 0xe23   :  { %v4993_v44 = vpop.eup %4992 }
 0xe24   :  { %1172 = vrot.lane.b32.xlu0 %v4993_v44, %s5047_s30 }
 0xe90   :  { %v1107_v1 = vpop.permute.xlu1 %1106 }
 0xe91   :  { %v1109_v3 = vmul.f32 %v4987_v62, %v1107_v1 }
 0xe93   :  { %v1224_v6 = vpack.c.bf16 %v1109_v3, %v1109_v3 }
 0xe95   :  { %1226 = vrot.lane.b32.xlu1 %v1224_v6, %s5048_s0 }
 0xe96   :  { %v1173_v8 = vpop.permute.xlu0 %1172 }
 0xe97   :  { %v1175_v12 = vmul.f32 %v4989_v43, %v1173_v8 }
 0xe99   :  { %v1176_v10 = vpack.c.bf16 %v1175_v12, %v1175_v12 }
 0xe9b   :  { %1178 = vrot.lane.b32.xlu0 %v1176_v10, %s5048_s0 }
 0xf07   :  { %v1227_v4 = vpop.permute.xlu1 %1226 }
 0xf08   :  { %4446 = vmatmul.mubr.msk.bf16.vlgmr.msra.gmra.mxu0 %vm361_vm1, %v1227_v4 }
 0xf09   :  { %4458 = vmatpush3.bf16.msra.mxu0 %v5286_v13  ;;  %4461 = vmatprep.mubr.msk.bf16.mxu0 %vm5045_vm0, %v5044_v46 }
 0xf0a   :  { %4459 = vmatprep.subr.bf16.mxu0 %v5044_v46 }
 0xf0d   :  { %v1179_v14 = vpop.permute.xlu0 %1178  ;;  %4460 = vmatpush3.bf16.msra.mxu0 %v5292_v15 }
 0xf0e   :  { %4438 = vmatmul.mubr.msk.bf16.vlgmr.msra.gmra.mxu1 %vm361_vm1, %v1179_v14  ;;  %4473 = vmatprep.subr.bf16.mxu0 %v5044_v46 }
 0xf0f   :  { %4450 = vmatpush3.bf16.msra.mxu1 %v5203_v47  ;;  %4453 = vmatprep.mubr.msk.bf16.mxu1 %vm5045_vm0, %v5044_v46 }
 0xf10   :  { %4451 = vmatprep.subr.bf16.mxu1 %v5044_v46 }
 0xf13   :  { %4452 = vmatpush3.bf16.msra.mxu1 %v5219_v52 }
 0xf14   :  { %4465 = vmatprep.subr.bf16.mxu1 %v5044_v46 }
 0xf16   :  { %4454 = vmatmul.mubr.msk.bf16.vlgmr.msra.gmra.mxu1 %vm361_vm1, %v1179_v14 }
 0xf17   :  { %4466 = vmatpush3.bf16.msra.mxu1 %v5305_v22  ;;  %4469 = vmatprep.mubr.msk.bf16.mxu1 %vm5045_vm0, %v5044_v46 }
 0xf18   :  { %4467 = vmatprep.subr.bf16.mxu1 %v5044_v46 }
 0xf1b   :  { %4468 = vmatpush3.bf16.msra.mxu1 %v5315_v26 }
 0xf1c   :  { %4481 = vmatprep.subr.bf16.mxu1 %v5044_v46 }
 0xfc8   :  { %v1265_v5 = vpop.f32.mrf.mxu0 }
 0xfca   :  { %v4447_v16 = vpop.f32.mrf.mxu0 }
 0xfcc   :  { %v1268_v11 = vpop.f32.mrf.mxu0 }
 0xfce   :  { %v1217_v17 = vpop.f32.mrf.mxu1  ;;  %v4448_v18 = vpop.f32.mrf.mxu0 }
 0xfcf   :  { %v1223_v19 = vadd.f32 %v1217_v17, %v5338_v29 }
 0xfd0   :  { %v4439_v20 = vpop.f32.mrf.mxu1 }
 0xfd1   :  { %v1271_v7 = vadd.f32 %v1265_v5, %v1223_v19  ;;  %v335_v19 = vadd.f32 %v5378_v24, %v5252_v42 }
 0xfd2   :  { %v1220_v21 = vpop.f32.mrf.mxu1 }
 0xfd3   :  { %v3827_v9 = vmul.f32 -1.442695, %v1271_v7 }
 0xfd4   :  { %v4440_v23 = vpop.f32.mrf.mxu1 }
 0xfd5   :  { %4994 = vpow2.f32 %v3827_v9 }
 0xfd6   :  { %v1331_v25 = vpop.f32.mrf.mxu1 }
 0xfd7   :  { %v1337_v55 = vadd.f32 %v1331_v25, %v5264_v57 }
 0xfd8   :  { %v4455_v27 = vpop.f32.mrf.mxu1 }
 0xfd9   :  { %v3830_v28 = vmul.f32 -1.442695, %v1337_v55 }
 0xfda   :  { %v1334_v30 = vpop.f32.mrf.mxu1 }
 0xfdb   :  { %4996 = vpow2.f32 %v3830_v28 }
 0xfdc   :  { %v4456_v31 = vpop.f32.mrf.mxu1 }
 0xfe2   :  { %v4995_v32 = vpop.eup %4994 }
 0xfe3   :  { %v1275_v33 = vadd.f32 1.0, %v4995_v32 }
 0xfe5   :  { %4998 = vrcp.f32 %v1275_v33 }
 0xfe8   :  { %v4997_v34 = vpop.eup %4996 }
 0xfe9   :  { %v1341_v35 = vadd.f32 1.0, %v4997_v34 }
 0xfeb   :  { %5000 = vrcp.f32 %v1341_v35 }
 0xff2   :  { %v4999_v36 = vpop.eup %4998 }
 0xff3   :  { %v1278_v37 = vmul.f32 2.0, %v4999_v36  ;;  %v1280_v2 = vmul.f32 %v4999_v36, %v5466_v56 }
 0xff5   :  { %v3828_v38 = vadd.f32 -1.0, %v1278_v37 }
 0xff7   :  { %1282 = vrot.lane.b32.xlu1 %v3828_v38, %s5047_s30 }
 0xff8   :  { %v5001_v39 = vpop.eup %5000 }
 0xff9   :  { %v1344_v40 = vmul.f32 2.0, %v5001_v39  ;;  %v1346_v48 = vmul.f32 %v5001_v39, %v5470_v63 }
 0xffb   :  { %v3831_v62 = vadd.f32 -1.0, %v1344_v40 }
 0xffd   :  { %1348 = vrot.lane.b32.xlu0 %v3831_v62, %s5047_s30 }
0x1069   :  { %v1283_v57 = vpop.permute.xlu1 %1282 }
0x106a   :  { %v1285_v41 = vmul.f32 %v4999_v36, %v1283_v57 }
0x106c   :  { %1287 = vrot.lane.b32.xlu1 %v1285_v41, %s5048_s0 }
0x106f   :  { %v1349_v53 = vpop.permute.xlu0 %1348 }
0x1070   :  { %v1351_v43 = vmul.f32 %v5001_v39, %v1349_v53 }
0x1072   :  { %1353 = vrot.lane.b32.xlu0 %v1351_v43, %s5048_s0 }
0x10de   :  { %v1288_v45 = vpop.permute.xlu1 %1287 }
0x10df   :  { %v5505_v59 = vadd.f32 %v1288_v45, %v1280_v2 }
0x10e1   :  { %5002 = vtanh.f32 %v5505_v59 }
0x10e4   :  { %v1354_v51 = vpop.permute.xlu0 %1353 }
0x10e5   :  { %v5509_v49 = vadd.f32 %v1354_v51, %v1346_v48 }
0x10e7   :  { %5004 = vtanh.f32 %v5509_v49 }
0x10ee   :  { %v5003_v50 = vpop.eup %5002 }
0x10ef   :  { %1293 = vrot.lane.b32.xlu1 %v5003_v50, %s5047_s30 }
0x10f4   :  { %v5005_v54 = vpop.eup %5004 }
0x10f5   :  { %1359 = vrot.lane.b32.xlu0 %v5005_v54, %s5047_s30 }
0x1161   :  { %v1294_v58 = vpop.permute.xlu1 %1293 }
0x1162   :  { %v1296_v56 = vmul.f32 %v4999_v36, %v1294_v58 }
0x1164   :  { %v1411_v60 = vpack.c.bf16 %v1296_v56, %v1296_v56 }
0x1166   :  { %1413 = vrot.lane.b32.xlu1 %v1411_v60, %s5048_s0 }
0x1167   :  { %v1360_v0 = vpop.permute.xlu0 %1359 }
0x1168   :  { %v1362_v44 = vmul.f32 %v5001_v39, %v1360_v0 }
0x116a   :  { %v1363_v1 = vpack.c.bf16 %v1362_v44, %v1362_v44 }
0x116c   :  { %1365 = vrot.lane.b32.xlu0 %v1363_v1, %s5048_s0 }
0x11d8   :  { %v1414_v63 = vpop.permute.xlu1 %1413 }
0x11d9   :  { %4470 = vmatmul.mubr.msk.bf16.vlgmr.msra.gmra.mxu1 %vm361_vm1, %v1414_v63 }
0x11da   :  { %4482 = vmatpush3.bf16.msra.mxu1 %v5286_v13  ;;  %4485 = vmatprep.mubr.msk.bf16.mxu1 %vm5045_vm0, %v5044_v46 }
0x11db   :  { %4483 = vmatprep.subr.bf16.mxu1 %v5044_v46 }
0x11de   :  { %v1366_v3 = vpop.permute.xlu0 %1365  ;;  %4484 = vmatpush3.bf16.msra.mxu1 %v5292_v15 }
0x11df   :  { %4462 = vmatmul.mubr.msk.bf16.vlgmr.msra.gmra.mxu0 %vm361_vm1, %v1366_v3  ;;  %4497 = vmatprep.subr.bf16.mxu1 %v5044_v46 }
0x11e0   :  { %4474 = vmatpush3.bf16.msra.mxu0 %v5203_v47  ;;  %4477 = vmatprep.mubr.msk.bf16.mxu0 %vm5045_vm0, %v5044_v46 }
0x11e1   :  { %4475 = vmatprep.subr.bf16.mxu0 %v5044_v46 }
0x11e4   :  { %4476 = vmatpush3.bf16.msra.mxu0 %v5219_v52 }
0x11e5   :  { %4489 = vmatprep.subr.bf16.mxu0 %v5044_v46 }
0x11e7   :  { %4478 = vmatmul.mubr.msk.bf16.vlgmr.msra.gmra.mxu0 %vm361_vm1, %v1366_v3 }
0x11e8   :  { %4490 = vmatpush3.bf16.msra.mxu0 %v5305_v22  ;;  %4493 = vmatprep.mubr.msk.bf16.mxu0 %vm5045_vm0, %v5044_v46 }
0x11e9   :  { %4491 = vmatprep.subr.bf16.mxu0 %v5044_v46 }
0x11ec   :  { %4492 = vmatpush3.bf16.msra.mxu0 %v5315_v26 }
0x11ed   :  { %4505 = vmatprep.subr.bf16.mxu0 %v5044_v46 }
0x1299   :  { %v1452_v6 = vpop.f32.mrf.mxu1 }
0x129b   :  { %v4471_v8 = vpop.f32.mrf.mxu1 }
0x129d   :  { %v1455_v12 = vpop.f32.mrf.mxu1 }
0x129f   :  { %v1404_v10 = vpop.f32.mrf.mxu0  ;;  %v4472_v4 = vpop.f32.mrf.mxu1 }
0x12a0   :  { %v1410_v14 = vadd.f32 %v1404_v10, %v5338_v29 }
0x12a1   :  { %v4463_v5 = vpop.f32.mrf.mxu0 }
0x12a2   :  { %v1458_v16 = vadd.f32 %v1452_v6, %v1410_v14 }
0x12a3   :  { %v1407_v11 = vpop.f32.mrf.mxu0 }
0x12a4   :  { %v3834_v17 = vmul.f32 -1.442695, %v1458_v16 }
0x12a5   :  { %v4464_v18 = vpop.f32.mrf.mxu0 }
0x12a6   :  { %5006 = vpow2.f32 %v3834_v17 }
0x12a7   :  { %v1518_v20 = vpop.f32.mrf.mxu0 }
0x12a8   :  { %v1524_v7 = vadd.f32 %v1518_v20, %v335_v19 }
0x12a9   :  { %v4479_v21 = vpop.f32.mrf.mxu0 }
0x12aa   :  { %v3837_v9 = vmul.f32 -1.442695, %v1524_v7 }
0x12ab   :  { %v1521_v23 = vpop.f32.mrf.mxu0 }
0x12ac   :  { %5008 = vpow2.f32 %v3837_v9 }
0x12ad   :  { %v4480_v25 = vpop.f32.mrf.mxu0 }
0x12b3   :  { %v5007_v55 = vpop.eup %5006 }
0x12b4   :  { %v1462_v27 = vadd.f32 1.0, %v5007_v55 }
0x12b6   :  { %5010 = vrcp.f32 %v1462_v27 }
0x12b9   :  { %v5009_v28 = vpop.eup %5008 }
0x12ba   :  { %v1528_v30 = vadd.f32 1.0, %v5009_v28 }
0x12bc   :  { %5012 = vrcp.f32 %v1528_v30 }
0x12c3   :  { %v5011_v31 = vpop.eup %5010 }
0x12c4   :  { %v1465_v32 = vmul.f32 2.0, %v5011_v31  ;;  %v1467_v39 = vmul.f32 %v5011_v31, %v5505_v59 }
0x12c6   :  { %v3835_v33 = vadd.f32 -1.0, %v1465_v32 }
0x12c8   :  { %1469 = vrot.lane.b32.xlu1 %v3835_v33, %s5047_s30 }
0x12c9   :  { %v5013_v42 = vpop.eup %5012 }
0x12ca   :  { %v1531_v24 = vmul.f32 2.0, %v5013_v42  ;;  %v1533_v57 = vmul.f32 %v5013_v42, %v5509_v49 }
0x12cc   :  { %v3838_v34 = vadd.f32 -1.0, %v1531_v24 }
0x12ce   :  { %1535 = vrot.lane.b32.xlu0 %v3838_v34, %s5047_s30 }
0x133a   :  { %v1470_v35 = vpop.permute.xlu1 %1469 }
0x133b   :  { %v1472_v36 = vmul.f32 %v5011_v31, %v1470_v35 }
0x133d   :  { %1474 = vrot.lane.b32.xlu1 %v1472_v36, %s5048_s0 }
0x1340   :  { %v1536_v37 = vpop.permute.xlu0 %1535 }
0x1341   :  { %v1538_v38 = vmul.f32 %v5013_v42, %v1536_v37 }
0x1343   :  { %1540 = vrot.lane.b32.xlu0 %v1538_v38, %s5048_s0 }
0x13af   :  { %v1475_v40 = vpop.permute.xlu1 %1474 }
0x13b0   :  { %v5545_v62 = vadd.f32 %v1475_v40, %v1467_v39 }
0x13b2   :  { %5014 = vtanh.f32 %v5545_v62 }
0x13b5   :  { %v1541_v41 = vpop.permute.xlu0 %1540 }
0x13b6   :  { %v5549_v53 = vadd.f32 %v1541_v41, %v1533_v57 }
0x13b8   :  { %5016 = vtanh.f32 %v5549_v53 }
0x13bf   :  { %v5015_v43 = vpop.eup %5014 }
0x13c0   :  { %1480 = vrot.lane.b32.xlu1 %v5015_v43, %s5047_s30 }
0x13c5   :  { %v5017_v2 = vpop.eup %5016 }
0x13c6   :  { %1546 = vrot.lane.b32.xlu0 %v5017_v2, %s5047_s30 }
0x1432   :  { %v1481_v45 = vpop.permute.xlu1 %1480 }
0x1433   :  { %v1483_v59 = vmul.f32 %v5011_v31, %v1481_v45 }
0x1435   :  { %v1598_v48 = vpack.c.bf16 %v1483_v59, %v1483_v59 }
0x1437   :  { %1600 = vrot.lane.b32.xlu1 %v1598_v48, %s5048_s0 }
0x1438   :  { %v1547_v51 = vpop.permute.xlu0 %1546 }
0x1439   :  { %v1549_v50 = vmul.f32 %v5013_v42, %v1547_v51 }
0x143b   :  { %v1550_v54 = vpack.c.bf16 %v1549_v50, %v1549_v50 }
0x143d   :  { %1552 = vrot.lane.b32.xlu0 %v1550_v54, %s5048_s0 }
0x14a9   :  { %v1601_v49 = vpop.permute.xlu1 %1600 }
0x14aa   :  { %4494 = vmatmul.mubr.msk.bf16.vlgmr.msra.gmra.mxu0 %vm361_vm1, %v1601_v49 }
0x14ab   :  { %4506 = vmatpush3.bf16.msra.mxu0 %v5286_v13  ;;  %4509 = vmatprep.mubr.msk.bf16.mxu0 %vm5045_vm0, %v5044_v46 }
0x14ac   :  { %4507 = vmatprep.subr.bf16.mxu0 %v5044_v46 }
0x14af   :  { %v1553_v58 = vpop.permute.xlu0 %1552  ;;  %4508 = vmatpush3.bf16.msra.mxu0 %v5292_v15 }
0x14b0   :  { %4486 = vmatmul.mubr.msk.bf16.vlgmr.msra.gmra.mxu1 %vm361_vm1, %v1553_v58  ;;  %4521 = vmatprep.subr.mxu0 %v5044_v46 }
0x14b1   :  { %4498 = vmatpush3.bf16.msra.mxu1 %v5203_v47  ;;  %4501 = vmatprep.mubr.msk.bf16.mxu1 %vm5045_vm0, %v5044_v46 }
0x14b2   :  { %4499 = vmatprep.subr.bf16.mxu1 %v5044_v46 }
0x14b5   :  { %4500 = vmatpush3.bf16.msra.mxu1 %v5219_v52 }
0x14b6   :  { %4513 = vmatprep.subr.bf16.mxu1 %v5044_v46 }
0x14b8   :  { %4502 = vmatmul.mubr.msk.bf16.vlgmr.msra.gmra.mxu1 %vm361_vm1, %v1553_v58 }
0x14b9   :  { %4514 = vmatpush3.bf16.msra.mxu1 %v5305_v22  ;;  %4517 = vmatprep.mubr.msk.bf16.mxu1 %vm5045_vm0, %v5044_v46 }
0x14ba   :  { %4515 = vmatprep.subr.bf16.mxu1 %v5044_v46 }
0x14bd   :  { %4516 = vmatpush3.bf16.msra.mxu1 %v5315_v26 }
0x14be   :  { %4532 = vmatprep.subr.mxu1 %v5044_v46 }
0x156a   :  { %v1639_v47 = vpop.f32.mrf.mxu0 }
0x156c   :  { %v4495_v13 = vpop.f32.mrf.mxu0 }
0x156e   :  { %v1642_v15 = vpop.f32.mrf.mxu0 }
0x1570   :  { %v1591_v56 = vpop.f32.mrf.mxu1  ;;  %v4496_v52 = vpop.f32.mrf.mxu0 }
0x1571   :  { %v1597_v60 = vadd.f32 %v1591_v56, %v5338_v29 }
0x1572   :  { %v4487_v0 = vpop.f32.mrf.mxu1 }
0x1573   :  { %v1645_v44 = vadd.f32 %v1639_v47, %v1597_v60  ;;  %v2082_v0 = vld [vmem:[%s6627_s1 + $0x1a0] sm:$0xff] }
0x1574   :  { %v1594_v1 = vpop.f32.mrf.mxu1 }
0x1575   :  { %v3841_v22 = vmul.f32 -1.442695, %v1645_v44  ;;  %v2081_v44 = vld [vmem:[%s6627_s1 + $0x198] sm:$0xff]  ;;  %v2080_v1 = vld [vmem:[%s6627_s1 + $0x190] sm:$0xff] }
0x1576   :  { %v4488_v63 = vpop.f32.mrf.mxu1 }
0x1577   :  { %5018 = vpow2.f32 %v3841_v22  ;;  %v2079_v22 = vld [vmem:[%s6627_s1 + $0x188] sm:$0xff] }
0x1578   :  { %v1705_v3 = vpop.f32.mrf.mxu1 }
0x1579   :  { %v1711_v6 = vadd.f32 %v1705_v3, %v5270_v61 }
0x157a   :  { %v4503_v8 = vpop.f32.mrf.mxu1 }
0x157b   :  { %v3844_v26 = vmul.f32 -1.442695, %v1711_v6 }
0x157c   :  { %v1708_v12 = vpop.f32.mrf.mxu1 }
0x157d   :  { %5020 = vpow2.f32 %v3844_v26 }
0x157e   :  { %v4504_v10 = vpop.f32.mrf.mxu1 }
0x1584   :  { %v5019_v4 = vpop.eup %5018 }
0x1585   :  { %v1649_v14 = vadd.f32 1.0, %v5019_v4 }
0x1587   :  { %5022 = vrcp.f32 %v1649_v14 }
0x158a   :  { %v5021_v5 = vpop.eup %5020 }
0x158b   :  { %v1715_v16 = vadd.f32 1.0, %v5021_v5 }
0x158d   :  { %5024 = vrcp.f32 %v1715_v16 }
0x1594   :  { %v5023_v11 = vpop.eup %5022 }
0x1595   :  { %v1652_v17 = vmul.f32 2.0, %v5023_v11  ;;  %v1654_v25 = vmul.f32 %v5023_v11, %v5545_v62 }
0x1597   :  { %v3842_v18 = vadd.f32 -1.0, %v1652_v17 }
0x1599   :  { %1656 = vrot.lane.b32.xlu1 %v3842_v18, %s5047_s30 }
0x159a   :  { %v5025_v19 = vpop.eup %5024 }
0x159b   :  { %v1718_v20 = vmul.f32 2.0, %v5025_v19  ;;  %v1720_v28 = vmul.f32 %v5025_v19, %v5549_v53 }
0x159d   :  { %v3845_v7 = vadd.f32 -1.0, %v1718_v20 }
0x159f   :  { %1722 = vrot.lane.b32.xlu0 %v3845_v7, %s5047_s30 }
0x160b   :  { %v1657_v61 = vpop.permute.xlu1 %1656 }
0x160c   :  { %v1659_v21 = vmul.f32 %v5023_v11, %v1657_v61 }
0x160e   :  { %1661 = vrot.lane.b32.xlu1 %v1659_v21, %s5048_s0 }
0x1611   :  { %v1723_v9 = vpop.permute.xlu0 %1722 }
0x1612   :  { %v1725_v23 = vmul.f32 %v5025_v19, %v1723_v9 }
0x1614   :  { %1727 = vrot.lane.b32.xlu0 %v1725_v23, %s5048_s0 }
0x1680   :  { %v1662_v55 = vpop.permute.xlu1 %1661 }
0x1681   :  { %v1664_v27 = vadd.f32 %v1662_v55, %v1654_v25 }
0x1683   :  { %5026 = vtanh.f32 %v1664_v27 }
0x1686   :  { %v1728_v30 = vpop.permute.xlu0 %1727 }
0x1687   :  { %v1730_v31 = vadd.f32 %v1728_v30, %v1720_v28 }
0x1689   :  { %5028 = vtanh.f32 %v1730_v31 }
0x1690   :  { %v5027_v32 = vpop.eup %5026 }
0x1691   :  { %1667 = vrot.lane.b32.xlu1 %v5027_v32, %s5047_s30 }
0x1696   :  { %v5029_v33 = vpop.eup %5028 }
0x1697   :  { %1733 = vrot.lane.b32.xlu0 %v5029_v33, %s5047_s30 }
0x1703   :  { %v1668_v42 = vpop.permute.xlu1 %1667 }
0x1704   :  { %v1670_v24 = vmul.f32 %v5023_v11, %v1668_v42 }
0x1706   :  { %v1785_v34 = vpack.c.bf16 %v1670_v24, %v1670_v24 }
0x1708   :  { %1787 = vrot.lane.b32.xlu1 %v1785_v34, %s5048_s0 }
0x1709   :  { %v1734_v35 = vpop.permute.xlu0 %1733 }
0x170a   :  { %v1736_v36 = vmul.f32 %v5025_v19, %v1734_v35 }
0x170c   :  { %v1737_v37 = vpack.c.bf16 %v1736_v36, %v1736_v36 }
0x170e   :  { %1739 = vrot.lane.b32.xlu0 %v1737_v37, %s5048_s0 }
0x177a   :  { %v1788_v38 = vpop.permute.xlu1 %1787 }
0x177b   :  { %4518 = vmatmul.mubr.msk.bf16.vlgmr.msra.gmra.mxu1 %vm361_vm1, %v1788_v38 }
0x177c   :  { %4540 = vmatprep.mubr.msk.f32.mxu1 %vm5045_vm0, %v5044_v46 }
0x1780   :  { %v1740_v39 = vpop.permute.xlu0 %1739 }
0x1781   :  { %4510 = vmatmul.mubr.msk.bf16.vlgmr.msra.gmra.mxu0 %vm361_vm1, %v1740_v39 }
0x1782   :  { %4529 = vmatprep.mubr.msk.f32.mxu0 %vm5045_vm0, %v5044_v46  ;;  %4522 = vmatpush3.msra.mxu0 %v2082_v0 }
0x1783   :  { %4523 = vmatprep.subr.mxu0 %v5044_v46 }
0x1784   :  { %4524 = vmatpush3.msra.mxu0 %v2081_v44 }
0x1785   :  { %4525 = vmatprep.subr.mxu0 %v5044_v46 }
0x1786   :  { %4526 = vmatpush3.msra.mxu0 %v2080_v1 }
0x1787   :  { %4527 = vmatprep.subr.mxu0 %v5044_v46 }
0x1788   :  { %4528 = vmatpush3.msra.mxu0 %v2079_v22 }
0x1789   :  { %4543 = vmatprep.subr.mxu0 %v5044_v46 }
0x183b   :  { %v1826_v40 = vpop.f32.mrf.mxu1 }
0x183d   :  { %v4519_v62 = vpop.f32.mrf.mxu1 }
0x183f   :  { %v1829_v57 = vpop.f32.mrf.mxu1 }
0x1841   :  { %v1778_v41 = vpop.f32.mrf.mxu0  ;;  %v4520_v53 = vpop.f32.mrf.mxu1 }
0x1842   :  { %v1784_v43 = vadd.f32 %v1778_v41, %v5338_v29 }
0x1843   :  { %v4511_v2 = vpop.f32.mrf.mxu0 }
0x1844   :  { %v1832_v45 = vadd.f32 %v1826_v40, %v1784_v43 }
0x1845   :  { %v1781_v59 = vpop.f32.mrf.mxu0 }
0x1846   :  { %v3848_v48 = vmul.f32 -1.442695, %v1832_v45 }
0x1847   :  { %v4512_v51 = vpop.f32.mrf.mxu0 }
0x1848   :  { %5030 = vpow2.f32 %v3848_v48 }
0x1855   :  { %v5031_v50 = vpop.eup %5030 }
0x1856   :  { %v1836_v54 = vadd.f32 1.0, %v5031_v50 }
0x1858   :  { %5032 = vrcp.f32 %v1836_v54 }
0x1865   :  { %v5033_v49 = vpop.eup %5032 }
0x1866   :  { %v1839_v58 = vmul.f32 2.0, %v5033_v49  ;;  %v1841_v56 = vmul.f32 %v5033_v49, %v1664_v27 }
0x1868   :  { %v3849_v47 = vadd.f32 -1.0, %v1839_v58 }
0x186a   :  { %1843 = vrot.lane.b32.xlu0 %v3849_v47, %s5047_s30 }
0x18dc   :  { %v1844_v13 = vpop.permute.xlu0 %1843 }
0x18dd   :  { %v1846_v15 = vmul.f32 %v5033_v49, %v1844_v13 }
0x18df   :  { %1848 = vrot.lane.b32.xlu1 %v1846_v15, %s5048_s0 }
0x1951   :  { %v1849_v29 = vpop.permute.xlu1 %1848 }
0x1952   :  { %v1851_v52 = vadd.f32 %v1849_v29, %v1841_v56 }
0x1954   :  { %5034 = vtanh.f32 %v1851_v52 }
0x1961   :  { %v5035_v60 = vpop.eup %5034 }
0x1962   :  { %1854 = vrot.lane.b32.xlu0 %v5035_v60, %s5047_s30 }
0x19d4   :  { %v1855_v63 = vpop.permute.xlu0 %1854 }
0x19d5   :  { %v5615_v3 = vmul.f32 %v5033_v49, %v1855_v63 }
0x19d7   :  { %vm1869_vm2 = vcmp.ge.f32.partialorder %v5615_v3, -2.2  ;;  %vm1870_vm3 = vcmp.lt.f32.partialorder %v5615_v3, -1.8  ;;  %vm1874_vm4 = vcmp.ge.f32.partialorder %v5615_v3, -1.8 }
0x19d8   :  { %vm1871_vm5 = vmand %vm1869_vm2, %vm1870_vm3  ;;  %vm1875_vm6 = vcmp.lt.f32.partialorder %v5615_v3, -1.4  ;;  %vm1879_vm7 = vcmp.ge.f32.partialorder %v5615_v3, -1.4  ;;  %vm1880_vm8 = vcmp.lt.f32.partialorder %v5615_v3, -1.0  ;;  %vm1884_vm9 = vcmp.ge.f32.partialorder %v5615_v3, -1.0 }
0x19d9   :  { %v3851_v6 = vsel %vm1871_vm5, 1.0, %v5044_v46  ;;  %vm1876_vm10 = vmand %vm1874_vm4, %vm1875_vm6  ;;  %vm1885_vm11 = vcmp.lt.f32.partialorder %v5615_v3, -0.6  ;;  %v3862_v8 = vadd.f32 2.2, %v5615_v3  ;;  %v1934_v26 = vsub.f32 -1.0, %v5615_v3 }
0x19da   :  { %v3852_v12 = vsel %vm1876_vm10, 1.0, %v5044_v46  ;;  %vm1881_vm12 = vmand %vm1879_vm7, %vm1880_vm8  ;;  %v1927_v10 = vsub.f32 -1.4, %v5615_v3  ;;  %v3863_v4 = vadd.f32 1.8, %v5615_v3  ;;  %v5632_v14 = vadd.f32 1.0, %v5615_v3 }
0x19db   :  { %v3853_v5 = vsel %vm1881_vm12, 1.0, %v5044_v46  ;;  %vm1886_vm13 = vmand %vm1884_vm9, %vm1885_vm11  ;;  %v1925_v16 = vmul.f32 2.5, %v3862_v8  ;;  %v1935_v11 = vmul.f32 2.5, %v1934_v26  ;;  %v5636_v17 = vadd.f32 1.4, %v5615_v3 }
0x19dc   :  { %v3854_v18 = vsel %vm1886_vm13, 1.0, %v5044_v46  ;;  %v1928_v19 = vmul.f32 2.5, %v1927_v10  ;;  %v1932_v20 = vmul.f32 2.5, %v3863_v4  ;;  %v1941_v7 = vsub.f32 -0.6, %v5615_v3 }
0x19dd   :  { %v1926_v61 = vmul.f32 %v3851_v6, %v1925_v16  ;;  %v1936_v21 = vmul.f32 %v3853_v5, %v1935_v11  ;;  %v1939_v9 = vmul.f32 2.5, %v5636_v17  ;;  %v1994_v23 = vmul.f32 1.25, %v3862_v8  ;;  %v1868_v16 = vld [vmem:[%s6627_s1 + $0x180] sm:$0xff] }
0x19de   :  { %v1929_v25 = vmul.f32 %v3852_v12, %v1928_v19  ;;  %v1933_v55 = vmul.f32 %v3852_v12, %v1932_v20  ;;  %v1942_v27 = vmul.f32 2.5, %v1941_v7  ;;  %v1996_v28 = vmul.f32 1.25, %v1934_v26  ;;  %4533 = vmatpush3.msra.mxu1 %v1868_v16 }
0x19df   :  { %v1940_v30 = vmul.f32 %v3853_v5, %v1939_v9  ;;  %v1999_v31 = vmul.f32 1.25, %v3863_v4  ;;  %v2001_v32 = vmul.f32 1.25, %v1941_v7  ;;  %v2039_v33 = vmul.f32 0.8333333, %v3862_v8  ;;  %4534 = vmatprep.subr.mxu1 %v5044_v46 }
0x19e0   :  { %v1930_v42 = vadd.f32 %v1929_v25, %v1926_v61  ;;  %v1937_v24 = vadd.f32 %v1936_v21, %v1933_v55  ;;  %v1943_v34 = vmul.f32 %v3854_v18, %v1942_v27  ;;  %v2041_v35 = vmul.f32 0.8333333, %v1941_v7 }
0x19e1   :  { %vm1889_vm14 = vcmp.ge.f32.partialorder %v5615_v3, -0.6  ;;  %vm1890_vm15 = vcmp.lt.f32.partialorder %v5615_v3, -0.2  ;;  %v1946_v36 = vmul.f32 2.5, %v5632_v14  ;;  %v2004_v37 = vmul.f32 1.25, %v5636_v17 }
0x19e2   :  { %v1944_v38 = vadd.f32 %v1943_v34, %v1940_v30  ;;  %v1995_v39 = vmul.f32 %v1994_v23, %v1930_v42  ;;  %v1997_v40 = vmul.f32 %v1996_v28, %v1937_v24  ;;  %v2000_v62 = vmul.f32 %v1999_v31, %v1937_v24  ;;  %vm1891_vm2 = vmand %vm1889_vm14, %vm1890_vm15 }
0x19e3   :  { %v3855_v57 = vsel %vm1891_vm2, 1.0, %v5044_v46  ;;  %v1947_v41 = vmul.f32 %v3854_v18, %v1946_v36  ;;  %v1948_v53 = vsub.f32 -0.2, %v5615_v3  ;;  %v2044_v43 = vmul.f32 0.8333333, %v3863_v4 }
0x19e4   :  { %v1998_v2 = vadd.f32 %v1997_v40, %v1995_v39  ;;  %v2002_v45 = vmul.f32 %v2001_v32, %v1944_v38  ;;  %v2005_v59 = vmul.f32 %v2004_v37, %v1944_v38  ;;  %vm1894_vm3 = vcmp.ge.f32.partialorder %v5615_v3, -0.2 }
0x19e5   :  { %v1949_v48 = vmul.f32 2.5, %v1948_v53  ;;  %v2006_v51 = vmul.f32 1.25, %v1948_v53  ;;  %v2046_v50 = vmul.f32 0.8333333, %v1948_v53  ;;  %vm1895_vm4 = vcmp.lt.f32.partialorder %v5615_v3, 0.2 }
0x19e6   :  { %v2003_v54 = vadd.f32 %v2002_v45, %v2000_v62  ;;  %v2040_v49 = vmul.f32 %v2039_v33, %v1998_v2  ;;  %vm1896_vm5 = vmand %vm1894_vm3, %vm1895_vm4  ;;  %vm1899_vm6 = vcmp.ge.f32.partialorder %v5615_v3, 0.2  ;;  %vm1900_vm7 = vcmp.lt.f32.partialorder %v5615_v3, 0.6  ;;  %v1866_v2 = vld [vmem:[%s6627_s1 + $0x170] sm:$0xff] }
0x19e7   :  { %v1950_v58 = vmul.f32 %v3855_v57, %v1949_v48  ;;  %v3856_v47 = vsel %vm1896_vm5, 1.0, %v5044_v46  ;;  %vm1901_vm8 = vmand %vm1899_vm6, %vm1900_vm7  ;;  %v5653_v13 = vadd.f32 0.6, %v5615_v3  ;;  %v5656_v15 = vsub.f32 0.2, %v5615_v3 }
0x19e8   :  { %v2042_v56 = vmul.f32 %v2041_v35, %v2003_v54  ;;  %v2045_v29 = vmul.f32 %v2044_v43, %v2003_v54  ;;  %v3857_v52 = vsel %vm1901_vm8, 1.0, %v5044_v46  ;;  %v5660_v60 = vadd.f32 0.2, %v5615_v3  ;;  %v1867_v43 = vld [vmem:[%s6627_s1 + $0x178] sm:$0xff] }
0x19e9   :  { %v1951_v0 = vadd.f32 %v1950_v58, %v1947_v41  ;;  %v1953_v44 = vmul.f32 2.5, %v5653_v13  ;;  %v1956_v1 = vmul.f32 2.5, %v5656_v15  ;;  %v1962_v22 = vsub.f32 0.6, %v5615_v3  ;;  %4535 = vmatpush3.msra.mxu1 %v1867_v43 }
0x19ea   :  { %v2043_v63 = vadd.f32 %v2042_v56, %v2040_v49  ;;  %v1960_v6 = vmul.f32 2.5, %v5660_v60  ;;  %v2009_v8 = vmul.f32 1.25, %v5632_v14  ;;  %v2011_v26 = vmul.f32 1.25, %v5656_v15  ;;  %4536 = vmatprep.subr.mxu1 %v5044_v46 }
0x19eb   :  { %v2007_v12 = vmul.f32 %v2006_v51, %v1951_v0  ;;  %v1954_v10 = vmul.f32 %v3855_v57, %v1953_v44  ;;  %v1957_v4 = vmul.f32 %v3856_v47, %v1956_v1  ;;  %v1963_v5 = vmul.f32 2.5, %v1962_v22  ;;  %4537 = vmatpush3.msra.mxu1 %v1866_v2 }
0x19ec   :  { %2084 = vrot.lane.b32.xlu1 %v2043_v63, %s5048_s0  ;;  %v1961_v11 = vmul.f32 %v3856_v47, %v1960_v6  ;;  %v2010_v18 = vmul.f32 %v2009_v8, %v1951_v0  ;;  %v2014_v19 = vmul.f32 1.25, %v5653_v13  ;;  %v2016_v20 = vmul.f32 1.25, %v1962_v22  ;;  %4538 = vmatprep.subr.mxu1 %v5044_v46 }
0x19ed   :  { %v5673_v7 = vadd.f32 %v2007_v12, %v2005_v59  ;;  %v1958_v61 = vadd.f32 %v1957_v4, %v1954_v10  ;;  %v1964_v21 = vmul.f32 %v3857_v52, %v1963_v5  ;;  %v2054_v9 = vmul.f32 0.8333333, %v5632_v14 }
0x19ee   :  { %v2056_v23 = vmul.f32 0.8333333, %v1962_v22  ;;  %vm1904_vm9 = vcmp.ge.f32.partialorder %v5615_v3, 0.6  ;;  %vm1905_vm10 = vcmp.lt.f32.partialorder %v5615_v3, 1.0  ;;  %vm1909_vm11 = vcmp.ge.f32.partialorder %v5615_v3, 1.0 }
0x19ef   :  { %v2047_v25 = vmul.f32 %v2046_v50, %v5673_v7  ;;  %v1965_v55 = vadd.f32 %v1964_v21, %v1961_v11  ;;  %v2012_v27 = vmul.f32 %v2011_v26, %v1958_v61  ;;  %v2015_v28 = vmul.f32 %v2014_v19, %v1958_v61  ;;  %vm1906_vm12 = vmand %vm1904_vm9, %vm1905_vm10  ;;  %v1865_v19 = vld [vmem:[%s6627_s1 + $0x168] sm:$0xff] }
0x19f0   :  { %v3858_v30 = vsel %vm1906_vm12, 1.0, %v5044_v46  ;;  %vm1910_vm13 = vcmp.lt.f32.partialorder %v5615_v3, 1.4  ;;  %v5684_v14 = vadd.f32 -0.2, %v5615_v3  ;;  %v5687_v31 = vsub.f32 1.0, %v5615_v3  ;;  %4539 = vmatpush3.msra.mxu1 %v1865_v19 }
0x19f1   :  { %v2048_v32 = vadd.f32 %v2047_v25, %v2045_v29  ;;  %v5689_v33 = vadd.f32 %v2012_v27, %v2010_v18  ;;  %v2017_v42 = vmul.f32 %v2016_v20, %v1965_v55  ;;  %vm1911_vm14 = vmand %vm1909_vm11, %vm1910_vm13  ;;  %v5692_v24 = vadd.f32 -0.6, %v5615_v3  ;;  %4554 = vmatprep.subr.mxu1 %v5044_v46  ;;  %v2713_v19 = vld [vmem:[%s6627_s1 + $0x268] sm:$0xff] }
0x19f2   :  { %v3859_v34 = vsel %vm1911_vm14, 1.0, %v5044_v46  ;;  %v1967_v35 = vmul.f32 2.5, %v5684_v14  ;;  %v1970_v36 = vmul.f32 2.5, %v5687_v31  ;;  %v1976_v37 = vsub.f32 1.4, %v5615_v3 }
0x19f3   :  { %2238 = vrot.lane.b32.xlu1 %v2048_v32, %s5048_s0  ;;  %v5699_v38 = vadd.f32 %v2017_v42, %v2015_v28  ;;  %v2055_v39 = vmul.f32 %v2054_v9, %v5689_v33  ;;  %v1974_v40 = vmul.f32 2.5, %v5692_v24  ;;  %v2019_v62 = vmul.f32 1.25, %v5660_v60 }
0x19f4   :  { %v1968_v57 = vmul.f32 %v3857_v52, %v1967_v35  ;;  %v1971_v41 = vmul.f32 %v3858_v30, %v1970_v36  ;;  %v1977_v53 = vmul.f32 2.5, %v1976_v37  ;;  %v2021_v51 = vmul.f32 1.25, %v5687_v31 }
0x19f5   :  { %v2057_v45 = vmul.f32 %v2056_v23, %v5699_v38  ;;  %v1975_v59 = vmul.f32 %v3858_v30, %v1974_v40  ;;  %v2020_v48 = vmul.f32 %v2019_v62, %v1965_v55  ;;  %v2024_v49 = vmul.f32 1.25, %v5684_v14 }
0x19f6   :  { %v1972_v50 = vadd.f32 %v1971_v41, %v1968_v57  ;;  %v1978_v54 = vmul.f32 %v3859_v34, %v1977_v53  ;;  %v2026_v58 = vmul.f32 1.25, %v1976_v37  ;;  %v2064_v56 = vmul.f32 0.8333333, %v5660_v60 }
0x19f7   :  { %v2058_v47 = vadd.f32 %v2057_v45, %v2055_v39  ;;  %vm1914_vm15 = vcmp.ge.f32.partialorder %v5615_v3, 1.4  ;;  %vm1915_vm2 = vcmp.lt.f32.partialorder %v5615_v3, 1.8  ;;  %vm1919_vm4 = vcmp.ge.f32.partialorder %v5615_v3, 1.8 }
0x19f8   :  { %v1979_v29 = vadd.f32 %v1978_v54, %v1975_v59  ;;  %v2022_v52 = vmul.f32 %v2021_v51, %v1972_v50  ;;  %v2025_v0 = vmul.f32 %v2024_v49, %v1972_v50  ;;  %vm1916_vm3 = vmand %vm1914_vm15, %vm1915_vm2  ;;  %vm1920_vm5 = vcmp.lt.f32.partialorder %v5615_v3, 2.2 }
0x19f9   :  { %2398 = vrot.lane.b32.xlu1 %v2058_v47, %s5048_s0  ;;  %v3860_v44 = vsel %vm1916_vm3, 1.0, %v5044_v46  ;;  %v3870_v60 = vadd.f32 -1.0, %v5615_v3  ;;  %v1983_v1 = vsub.f32 1.8, %v5615_v3  ;;  %vm1921_vm6 = vmand %vm1919_vm4, %vm1920_vm5  ;;  %v3871_v6 = vadd.f32 -1.4, %v5615_v3 }
0x19fa   :  { %v2023_v22 = vadd.f32 %v2022_v52, %v2020_v48  ;;  %v2027_v63 = vmul.f32 %v2026_v58, %v1979_v29  ;;  %v1990_v8 = vsub.f32 2.2, %v5615_v3  ;;  %v2066_v26 = vmul.f32 0.8333333, %v1976_v37 }
0x19fb   :  { %v3861_v12 = vsel %vm1921_vm6, 1.0, %v5044_v46  ;;  %v1981_v10 = vmul.f32 2.5, %v3870_v60  ;;  %v1984_v4 = vmul.f32 2.5, %v1983_v1  ;;  %v1988_v11 = vmul.f32 2.5, %v3871_v6  ;;  %v2393_v6 = vld [vmem:[%s6627_s1 + $0x1e8] sm:$0xff] }
0x19fc   :  { %v2028_v5 = vadd.f32 %v2027_v63, %v2025_v0  ;;  %v2065_v16 = vmul.f32 %v2064_v56, %v2023_v22  ;;  %v1991_v18 = vmul.f32 2.5, %v1990_v8  ;;  %v2029_v21 = vmul.f32 1.25, %v5692_v24  ;;  %v2394_v63 = vld [vmem:[%s6627_s1 + $0x1f0] sm:$0xff] }
0x19fd   :  { %v1982_v20 = vmul.f32 %v3859_v34, %v1981_v10  ;;  %v1985_v61 = vmul.f32 %v3860_v44, %v1984_v4  ;;  %v1989_v23 = vmul.f32 %v3860_v44, %v1988_v11  ;;  %v2031_v28 = vmul.f32 1.25, %v1983_v1  ;;  %v2233_v44 = vld [vmem:[%s6627_s1 + $0x1a8] sm:$0xff]  ;;  %v2554_v10 = vld [vmem:[%s6627_s1 + $0x230] sm:$0xff]  ;;  %v2715_v11 = vld [vmem:[%s6627_s1 + $0x278] sm:$0xff] }
0x19fe   :  { %v2067_v9 = vmul.f32 %v2066_v26, %v2028_v5  ;;  %v1992_v25 = vmul.f32 %v3861_v12, %v1991_v18  ;;  %v2030_v27 = vmul.f32 %v2029_v21, %v1979_v29  ;;  %v2034_v30 = vmul.f32 1.25, %v3870_v60  ;;  %v2396_v60 = vld [vmem:[%s6627_s1 + $0x200] sm:$0xff]  ;;  %v2555_v12 = vld [vmem:[%s6627_s1 + $0x238] sm:$0xff]  ;;  %v2553_v4 = vld [vmem:[%s6627_s1 + $0x228] sm:$0xff] }
0x19ff   :  { %v1986_v55 = vadd.f32 %v1985_v61, %v1982_v20  ;;  %v2036_v35 = vmul.f32 1.25, %v1990_v8  ;;  %v3850_v36 = vmul.f32 -1.442695, %v5615_v3  ;;  %v2074_v62 = vmul.f32 0.8333333, %v5692_v24  ;;  %v2714_v18 = vld [vmem:[%s6627_s1 + $0x270] sm:$0xff] }
0x1a00   :  { %v2068_v32 = vadd.f32 %v2067_v9, %v2065_v16  ;;  %v1993_v42 = vadd.f32 %v1992_v25, %v1989_v23  ;;  %v2076_v41 = vmul.f32 0.8333333, %v1990_v8  ;;  %v2049_v48 = vmul.f32 0.8333333, %v5636_v17  ;;  %v2556_v8 = vld [vmem:[%s6627_s1 + $0x240] sm:$0xff]  ;;  %v2315_v9 = vld [vmem:[%s6627_s1 + $0x1d8] sm:$0xff] }
0x1a01   :  { %v2032_v37 = vmul.f32 %v2031_v28, %v1986_v55  ;;  %v2035_v34 = vmul.f32 %v2034_v30, %v1986_v55  ;;  %5036 = vpow2.f32 %v3850_v36  ;;  %v2051_v51 = vmul.f32 0.8333333, %v5656_v15  ;;  %v2316_v61 = vld [vmem:[%s6627_s1 + $0x1e0] sm:$0xff]  ;;  %v2314_v23 = vld [vmem:[%s6627_s1 + $0x1d0] sm:$0xff]  ;;  %v2313_v25 = vld [vmem:[%s6627_s1 + $0x1c8] sm:$0xff] }
0x1a02   :  { %2558 = vrot.lane.b32.xlu1 %v2068_v32, %s5048_s0  ;;  %v2037_v39 = vmul.f32 %v2036_v35, %v1993_v42  ;;  %v2050_v49 = vmul.f32 %v2049_v48, %v5673_v7  ;;  %v2059_v58 = vmul.f32 0.8333333, %v5653_v13  ;;  %v2061_v47 = vmul.f32 0.8333333, %v5687_v31  ;;  %v2236_v13 = vld [vmem:[%s6627_s1 + $0x1c0] sm:$0xff]  ;;  %v2475_v28 = vld [vmem:[%s6627_s1 + $0x218] sm:$0xff] }
0x1a03   :  { %v2033_v40 = vadd.f32 %v2032_v37, %v2030_v27  ;;  %v2052_v24 = vmul.f32 %v2051_v51, %v5689_v33  ;;  %v2069_v17 = vmul.f32 0.8333333, %v5684_v14  ;;  %v2071_v15 = vmul.f32 0.8333333, %v1983_v1  ;;  %v2235_v14 = vld [vmem:[%s6627_s1 + $0x1b8] sm:$0xff]  ;;  %v2476_v55 = vld [vmem:[%s6627_s1 + $0x220] sm:$0xff] }
0x1a04   :  { %v2038_v57 = vadd.f32 %v2037_v39, %v2035_v34  ;;  %v2060_v29 = vmul.f32 %v2059_v58, %v5699_v38  ;;  %v2062_v52 = vmul.f32 %v2061_v47, %v2023_v22  ;;  %v2234_v38 = vld [vmem:[%s6627_s1 + $0x1b0] sm:$0xff]  ;;  %v2395_v22 = vld [vmem:[%s6627_s1 + $0x1f8] sm:$0xff]  ;;  %v2473_v32 = vld [vmem:[%s6627_s1 + $0x208] sm:$0xff] }
0x1a05   :  { %v2075_v53 = vmul.f32 %v2074_v62, %v2033_v40  ;;  %v2053_v56 = vadd.f32 %v2052_v24, %v2050_v49  ;;  %v2070_v0 = vmul.f32 %v2069_v17, %v2028_v5  ;;  %v2072_v7 = vmul.f32 %v2071_v15, %v2033_v40  ;;  %v2716_v5 = vld [vmem:[%s6627_s1 + $0x280] sm:$0xff]  ;;  %v2474_v30 = vld [vmem:[%s6627_s1 + $0x210] sm:$0xff]  ;;  %v2635_v36 = vld [vmem:[%s6627_s1 + $0x258] sm:$0xff] }
0x1a06   :  { %v2077_v43 = vmul.f32 %v2076_v41, %v2038_v57  ;;  %v2636_v42 = vld [vmem:[%s6627_s1 + $0x260] sm:$0xff]  ;;  %v2634_v37 = vld [vmem:[%s6627_s1 + $0x250] sm:$0xff]  ;;  %v2633_v34 = vld [vmem:[%s6627_s1 + $0x248] sm:$0xff] }
0x1a07   :  { %v2073_v33 = vadd.f32 %v2072_v7, %v2070_v0  ;;  %v3041_v40 = vld [vmem:[%s6627_s1 + $0x380] sm:$0xff]  ;;  %v3040_v62 = vld [vmem:[%s6627_s1 + $0x378] sm:$0xff]  ;;  %v3039_v57 = vld [vmem:[%s6627_s1 + $0x370] sm:$0xff] }
0x1a08   :  { %v2078_v2 = vadd.f32 %v2077_v43, %v2075_v53  ;;  %v3038_v41 = vld [vmem:[%s6627_s1 + $0x368] sm:$0xff]  ;;  %v3037_v53 = vld [vmem:[%s6627_s1 + $0x360] sm:$0xff]  ;;  %v3036_v43 = vld [vmem:[%s6627_s1 + $0x358] sm:$0xff] }
0x1a09   :  { %v2815_v48 = vld [vmem:[%s6627_s1 + $0x300] sm:$0xff]  ;;  %v2814_v51 = vld [vmem:[%s6627_s1 + $0x2f8] sm:$0xff]  ;;  %v3031_v49 = vld [vmem:[%s6627_s1 + $0x330] sm:$0xff] }
0x1a0a   :  { %2718 = vrot.lane.b32.xlu1 %v2078_v2, %s5048_s0  ;;  %v3035_v2 = vld [vmem:[%s6627_s1 + $0x350] sm:$0xff]  ;;  %v2812_v24 = vld [vmem:[%s6627_s1 + $0x2e8] sm:$0xff]  ;;  %v2811_v47 = vld [vmem:[%s6627_s1 + $0x2e0] sm:$0xff] }
0x1a0b   :  { %v3030_v58 = vld [vmem:[%s6627_s1 + $0x328] sm:$0xff]  ;;  %v2809_v17 = vld [vmem:[%s6627_s1 + $0x2d0] sm:$0xff]  ;;  %v2807_v7 = vld [vmem:[%s6627_s1 + $0x2c0] sm:$0xff] }
0x1a0c   :  { %v3027_v15 = vld [vmem:[%s6627_s1 + $0x310] sm:$0xff]  ;;  %v2808_v0 = vld [vmem:[%s6627_s1 + $0x2c8] sm:$0xff] }
0x1a0e   :  { %v5037_v45 = vpop.eup %5036 }
0x1a0f   :  { %v1861_v59 = vadd.f32 1.0, %v5037_v45  ;;  %v3034_v45 = vld [vmem:[%s6627_s1 + $0x348] sm:$0xff] }
0x1a11   :  { %5038 = vrcp.f32 %v1861_v59  ;;  %v3033_v59 = vld [vmem:[%s6627_s1 + $0x340] sm:$0xff] }
0x1a1e   :  { %v5039_v50 = vpop.eup %5038 }
0x1a1f   :  { %v1864_v54 = vmul.f32 %v5039_v50, %v5615_v3  ;;  %v2063_v3 = vadd.f32 %v2062_v52, %v2060_v29  ;;  %v3032_v50 = vld [vmem:[%s6627_s1 + $0x338] sm:$0xff] }
0x1a20   :  { %v2810_v29 = vld [vmem:[%s6627_s1 + $0x2d8] sm:$0xff] }
0x1a21   :  { %2159 = vrot.lane.b32.xlu0 %v1864_v54, %s5048_s0  ;;  %v2813_v54 = vld [vmem:[%s6627_s1 + $0x2f0] sm:$0xff]  ;;  %v3028_v52 = vld [vmem:[%s6627_s1 + $0x318] sm:$0xff] }
0x1a25   :  { %2318 = vrot.lane.b32.xlu0 %v2053_v56, %s5048_s0  ;;  %v3029_v56 = vld [vmem:[%s6627_s1 + $0x320] sm:$0xff] }
0x1a29   :  { %2478 = vrot.lane.b32.xlu0 %v2063_v3, %s5048_s0  ;;  %v3026_v3 = vld [vmem:[%s6627_s1 + $0x308] sm:$0xff] }
0x1a2d   :  { %2638 = vrot.lane.b32.xlu0 %v2073_v33, %s5048_s0  ;;  %v2806_v33 = vld [vmem:[%s6627_s1 + $0x2b8] sm:$0xff] }
0x1a5e   :  { %v2085_v31 = vpop.permute.xlu1 %2084 }
0x1a5f   :  { %4530 = vmatmul.mubr.msk.f32.vlgmr.msra.gmra.mxu0 %vm361_vm1, %v2085_v31  ;;  %v2804_v31 = vld [vmem:[%s6627_s1 + $0x2a8] sm:$0xff] }
0x1a60   :  { %4544 = vmatpush3.msra.mxu0 %v2236_v13  ;;  %4551 = vmatprep.mubr.msk.f32.mxu0 %vm5045_vm0, %v5044_v46  ;;  %v2805_v13 = vld [vmem:[%s6627_s1 + $0x2b0] sm:$0xff] }
0x1a61   :  { %4545 = vmatprep.subr.mxu0 %v5044_v46 }
0x1a62   :  { %4546 = vmatpush3.msra.mxu0 %v2235_v14  ;;  %v2803_v14 = vld [vmem:[%s6627_s1 + $0x2a0] sm:$0xff] }
0x1a63   :  { %4547 = vmatprep.subr.mxu0 %v5044_v46 }
0x1a64   :  { %4548 = vmatpush3.msra.mxu0 %v2234_v38  ;;  %v2802_v38 = vld [vmem:[%s6627_s1 + $0x298] sm:$0xff] }
0x1a65   :  { %4549 = vmatprep.subr.mxu0 %v5044_v46  ;;  %v2239_v1 = vpop.permute.xlu1 %2238 }
0x1a66   :  { %4550 = vmatpush3.msra.mxu0 %v2233_v44  ;;  %v2801_v44 = vld [vmem:[%s6627_s1 + $0x290] sm:$0xff] }
0x1a67   :  { %4552 = vmatmul.mubr.msk.f32.vlgmr.msra.gmra.mxu0 %vm361_vm1, %v2239_v1  ;;  %4565 = vmatprep.subr.mxu0 %v5044_v46 }
0x1a68   :  { %4566 = vmatpush3.msra.mxu0 %v2396_v60  ;;  %4573 = vmatprep.mubr.msk.f32.mxu0 %vm5045_vm0, %v5044_v46  ;;  %v2800_v60 = vld [vmem:[%s6627_s1 + $0x288] sm:$0xff] }
0x1a69   :  { %4567 = vmatprep.subr.mxu0 %v5044_v46 }
0x1a6a   :  { %4568 = vmatpush3.msra.mxu0 %v2395_v22 }
0x1a6b   :  { %4569 = vmatprep.subr.mxu0 %v5044_v46  ;;  %v2399_v26 = vpop.permute.xlu1 %2398 }
0x1a6c   :  { %4570 = vmatpush3.msra.mxu0 %v2394_v63 }
0x1a6d   :  { %4571 = vmatprep.subr.mxu0 %v5044_v46 }
0x1a6e   :  { %4572 = vmatpush3.msra.mxu0 %v2393_v6 }
0x1a6f   :  { %4574 = vmatmul.mubr.msk.f32.vlgmr.msra.gmra.mxu0 %vm361_vm1, %v2399_v26  ;;  %4587 = vmatprep.subr.mxu0 %v5044_v46 }
0x1a70   :  { %4588 = vmatpush3.msra.mxu0 %v2556_v8  ;;  %4595 = vmatprep.mubr.msk.f32.mxu0 %vm5045_vm0, %v5044_v46 }
0x1a71   :  { %4589 = vmatprep.subr.mxu0 %v5044_v46 }
0x1a72   :  { %4590 = vmatpush3.msra.mxu0 %v2555_v12 }
0x1a73   :  { %4591 = vmatprep.subr.mxu0 %v5044_v46 }
0x1a74   :  { %4592 = vmatpush3.msra.mxu0 %v2554_v10  ;;  %v2559_v16 = vpop.permute.xlu1 %2558 }
0x1a75   :  { %4593 = vmatprep.subr.mxu0 %v5044_v46 }
0x1a76   :  { %4594 = vmatpush3.msra.mxu0 %v2553_v4 }
0x1a77   :  { %4596 = vmatmul.mubr.msk.f32.vlgmr.msra.gmra.mxu0 %vm361_vm1, %v2559_v16  ;;  %4609 = vmatprep.subr.mxu0 %v5044_v46 }
0x1a78   :  { %4610 = vmatpush3.msra.mxu0 %v2716_v5  ;;  %4617 = vmatprep.mubr.msk.f32.mxu0 %vm5045_vm0, %v5044_v46 }
0x1a79   :  { %4611 = vmatprep.subr.mxu0 %v5044_v46 }
0x1a7a   :  { %4612 = vmatpush3.msra.mxu0 %v2715_v11 }
0x1a7b   :  { %4613 = vmatprep.subr.mxu0 %v5044_v46 }
0x1a7c   :  { %4614 = vmatpush3.msra.mxu0 %v2714_v18  ;;  %v2719_v20 = vpop.permute.xlu1 %2718 }
0x1a7d   :  { %4615 = vmatprep.subr.mxu0 %v5044_v46 }
0x1a7e   :  { %4616 = vmatpush3.msra.mxu0 %v2713_v19 }
0x1a7f   :  { %4618 = vmatmul.mubr.msk.f32.vlgmr.msra.gmra.mxu0 %vm361_vm1, %v2719_v20  ;;  %4655 = vmatprep.subr.mxu0 %v5044_v46 }
0x1a80   :  { %4687 = vmatprep.mubr.msk.f32.mxu0 %vm5045_vm0, %v5044_v46  ;;  %4656 = vmatpush3.msra.mxu0 %v2815_v48 }
0x1a81   :  { %4657 = vmatprep.subr.mxu0 %v5044_v46 }
0x1a82   :  { %4658 = vmatpush3.msra.mxu0 %v2814_v51 }
0x1a83   :  { %4659 = vmatprep.subr.mxu0 %v5044_v46 }
0x1a84   :  { %4660 = vmatpush3.msra.mxu0 %v2813_v54 }
0x1a85   :  { %4661 = vmatprep.subr.mxu0 %v5044_v46 }
0x1a86   :  { %4662 = vmatpush3.msra.mxu0 %v2812_v24 }
0x1a87   :  { %4663 = vmatprep.subr.mxu0 %v5044_v46 }
0x1a88   :  { %4664 = vmatpush3.msra.mxu0 %v2811_v47 }
0x1a89   :  { %4665 = vmatprep.subr.mxu0 %v5044_v46 }
0x1a8a   :  { %4666 = vmatpush3.msra.mxu0 %v2810_v29 }
0x1a8b   :  { %4667 = vmatprep.subr.mxu0 %v5044_v46 }
0x1a8c   :  { %4668 = vmatpush3.msra.mxu0 %v2809_v17 }
0x1a8d   :  { %4669 = vmatprep.subr.mxu0 %v5044_v46 }
0x1a8e   :  { %4670 = vmatpush3.msra.mxu0 %v2808_v0 }
0x1a8f   :  { %4671 = vmatprep.subr.mxu0 %v5044_v46 }
0x1a90   :  { %4672 = vmatpush3.msra.mxu0 %v2807_v7 }
0x1a91   :  { %4673 = vmatprep.subr.mxu0 %v5044_v46 }
0x1a92   :  { %4674 = vmatpush3.msra.mxu0 %v2806_v33 }
0x1a93   :  { %v2160_v21 = vpop.permute.xlu0 %2159  ;;  %4675 = vmatprep.subr.mxu0 %v5044_v46 }
0x1a94   :  { %4541 = vmatmul.mubr.msk.f32.vlgmr.msra.gmra.mxu1 %vm361_vm1, %v2160_v21  ;;  %4676 = vmatpush3.msra.mxu0 %v2805_v13 }
0x1a95   :  { %4555 = vmatpush3.msra.mxu1 %v2316_v61  ;;  %4562 = vmatprep.mubr.msk.f32.mxu1 %vm5045_vm0, %v5044_v46 }
0x1a96   :  { %4556 = vmatprep.subr.mxu1 %v5044_v46  ;;  %4677 = vmatprep.subr.mxu0 %v5044_v46 }
0x1a97   :  { %4557 = vmatpush3.msra.mxu1 %v2315_v9  ;;  %v2319_v27 = vpop.permute.xlu0 %2318  ;;  %4678 = vmatpush3.msra.mxu0 %v2804_v31 }
0x1a98   :  { %4558 = vmatprep.subr.mxu1 %v5044_v46  ;;  %4679 = vmatprep.subr.mxu0 %v5044_v46 }
0x1a99   :  { %4559 = vmatpush3.msra.mxu1 %v2314_v23  ;;  %4680 = vmatpush3.msra.mxu0 %v2803_v14 }
0x1a9a   :  { %4560 = vmatprep.subr.mxu1 %v5044_v46  ;;  %4681 = vmatprep.subr.mxu0 %v5044_v46 }
0x1a9b   :  { %4561 = vmatpush3.msra.mxu1 %v2313_v25  ;;  %v2479_v35 = vpop.permute.xlu0 %2478  ;;  %4682 = vmatpush3.msra.mxu0 %v2802_v38 }
0x1a9c   :  { %4563 = vmatmul.mubr.msk.f32.vlgmr.msra.gmra.mxu1 %vm361_vm1, %v2319_v27  ;;  %4576 = vmatprep.subr.mxu1 %v5044_v46 }
0x1a9d   :  { %4577 = vmatpush3.msra.mxu1 %v2476_v55  ;;  %4584 = vmatprep.mubr.msk.f32.mxu1 %vm5045_vm0, %v5044_v46 }
0x1a9e   :  { %4578 = vmatprep.subr.mxu1 %v5044_v46  ;;  %4683 = vmatprep.subr.mxu0 %v5044_v46 }
0x1a9f   :  { %4579 = vmatpush3.msra.mxu1 %v2475_v28  ;;  %v2639_v39 = vpop.permute.xlu0 %2638  ;;  %4684 = vmatpush3.msra.mxu0 %v2801_v44 }
0x1aa0   :  { %4580 = vmatprep.subr.mxu1 %v5044_v46  ;;  %4685 = vmatprep.subr.mxu0 %v5044_v46 }
0x1aa1   :  { %4581 = vmatpush3.msra.mxu1 %v2474_v30  ;;  %4686 = vmatpush3.msra.mxu0 %v2800_v60 }
0x1aa2   :  { %4582 = vmatprep.subr.mxu1 %v5044_v46  ;;  %4725 = vmatprep.subr.mxu0 %v5044_v46 }
0x1aa3   :  { %4583 = vmatpush3.msra.mxu1 %v2473_v32 }
0x1aa4   :  { %4585 = vmatmul.mubr.msk.f32.vlgmr.msra.gmra.mxu1 %vm361_vm1, %v2479_v35  ;;  %4598 = vmatprep.subr.mxu1 %v5044_v46 }
0x1aa5   :  { %4599 = vmatpush3.msra.mxu1 %v2636_v42  ;;  %4606 = vmatprep.mubr.msk.f32.mxu1 %vm5045_vm0, %v5044_v46 }
0x1aa6   :  { %4600 = vmatprep.subr.mxu1 %v5044_v46 }
0x1aa7   :  { %4601 = vmatpush3.msra.mxu1 %v2635_v36 }
0x1aa8   :  { %4602 = vmatprep.subr.mxu1 %v5044_v46 }
0x1aa9   :  { %4603 = vmatpush3.msra.mxu1 %v2634_v37 }
0x1aaa   :  { %4604 = vmatprep.subr.mxu1 %v5044_v46 }
0x1aab   :  { %4605 = vmatpush3.msra.mxu1 %v2633_v34 }
0x1aac   :  { %4607 = vmatmul.mubr.msk.f32.vlgmr.msra.gmra.mxu1 %vm361_vm1, %v2639_v39  ;;  %4620 = vmatprep.subr.mxu1 %v5044_v46 }
0x1aad   :  { %4652 = vmatprep.mubr.msk.f32.mxu1 %vm5045_vm0, %v5044_v46  ;;  %4621 = vmatpush3.msra.mxu1 %v3041_v40 }
0x1aae   :  { %4622 = vmatprep.subr.mxu1 %v5044_v46 }
0x1aaf   :  { %4623 = vmatpush3.msra.mxu1 %v3040_v62 }
0x1ab0   :  { %4624 = vmatprep.subr.mxu1 %v5044_v46 }
0x1ab1   :  { %4625 = vmatpush3.msra.mxu1 %v3039_v57 }
0x1ab2   :  { %4626 = vmatprep.subr.mxu1 %v5044_v46 }
0x1ab3   :  { %4627 = vmatpush3.msra.mxu1 %v3038_v41 }
0x1ab4   :  { %4628 = vmatprep.subr.mxu1 %v5044_v46 }
0x1ab5   :  { %4629 = vmatpush3.msra.mxu1 %v3037_v53 }
0x1ab6   :  { %4630 = vmatprep.subr.mxu1 %v5044_v46 }
0x1ab7   :  { %4631 = vmatpush3.msra.mxu1 %v3036_v43 }
0x1ab8   :  { %4632 = vmatprep.subr.mxu1 %v5044_v46 }
0x1ab9   :  { %4633 = vmatpush3.msra.mxu1 %v3035_v2 }
0x1aba   :  { %4634 = vmatprep.subr.mxu1 %v5044_v46 }
0x1abb   :  { %4635 = vmatpush3.msra.mxu1 %v3034_v45 }
0x1abc   :  { %4636 = vmatprep.subr.mxu1 %v5044_v46 }
0x1abd   :  { %4637 = vmatpush3.msra.mxu1 %v3033_v59 }
0x1abe   :  { %4638 = vmatprep.subr.mxu1 %v5044_v46 }
0x1abf   :  { %4639 = vmatpush3.msra.mxu1 %v3032_v50 }
0x1ac0   :  { %4640 = vmatprep.subr.mxu1 %v5044_v46 }
0x1ac1   :  { %4641 = vmatpush3.msra.mxu1 %v3031_v49 }
0x1ac2   :  { %4642 = vmatprep.subr.mxu1 %v5044_v46 }
0x1ac3   :  { %4643 = vmatpush3.msra.mxu1 %v3030_v58 }
0x1ac4   :  { %4644 = vmatprep.subr.mxu1 %v5044_v46 }
0x1ac5   :  { %4645 = vmatpush3.msra.mxu1 %v3029_v56 }
0x1ac6   :  { %4646 = vmatprep.subr.mxu1 %v5044_v46 }
0x1ac7   :  { %4647 = vmatpush3.msra.mxu1 %v3028_v52 }
0x1ac8   :  { %4648 = vmatprep.subr.mxu1 %v5044_v46 }
0x1ac9   :  { %4649 = vmatpush3.msra.mxu1 %v3027_v15 }
0x1aca   :  { %4650 = vmatprep.subr.mxu1 %v5044_v46 }
0x1acb   :  { %4651 = vmatpush3.msra.mxu1 %v3026_v3 }
0x1acc   :  { %4690 = vmatprep.subr.mxu1 %v5044_v46 }
0x1b1f   :  { %v2154_v1 = vpop.f32.mrf.mxu0 }
0x1b21   :  { %v4531_v22 = vpop.f32.mrf.mxu0 }
0x1b27   :  { %v2308_v63 = vpop.f32.mrf.mxu0 }
0x1b29   :  { %v4553_v6 = vpop.f32.mrf.mxu0 }
0x1b2f   :  { %v2468_v8 = vpop.f32.mrf.mxu0 }
0x1b31   :  { %v4575_v26 = vpop.f32.mrf.mxu0 }
0x1b37   :  { %v2628_v12 = vpop.f32.mrf.mxu0 }
0x1b39   :  { %v4597_v10 = vpop.f32.mrf.mxu0 }
0x1b3f   :  { %v2788_v4 = vpop.f32.mrf.mxu0 }
0x1b41   :  { %v4619_v5 = vpop.f32.mrf.mxu0 }
0x1b54   :  { %v2229_v16 = vpop.f32.mrf.mxu1 }
0x1b55   :  { %v2230_v11 = vadd.f32 %v2229_v16, %v2154_v1 }
0x1b56   :  { %v4542_v18 = vpop.f32.mrf.mxu1 }
0x1b57   :  { %v2312_v19 = vadd.f32 %v2308_v63, %v2230_v11 }
0x1b5c   :  { %v2388_v20 = vpop.f32.mrf.mxu1 }
0x1b5d   :  { %v2392_v21 = vadd.f32 %v2388_v20, %v2312_v19 }
0x1b5e   :  { %v4564_v61 = vpop.f32.mrf.mxu1 }
0x1b5f   :  { %v2472_v23 = vadd.f32 %v2468_v8, %v2392_v21 }
0x1b64   :  { %v2548_v9 = vpop.f32.mrf.mxu1 }
0x1b65   :  { %v2552_v55 = vadd.f32 %v2548_v9, %v2472_v23 }
0x1b66   :  { %v4586_v25 = vpop.f32.mrf.mxu1 }
0x1b67   :  { %v2632_v27 = vadd.f32 %v2628_v12, %v2552_v55  ;;  %v3197_v55 = vld [vmem:[%s6627_s1 + $0x400] sm:$0xff] }
0x1b6c   :  { %v2708_v28 = vpop.f32.mrf.mxu1 }
0x1b6d   :  { %v2712_v30 = vadd.f32 %v2708_v28, %v2632_v27  ;;  %v3196_v28 = vld [vmem:[%s6627_s1 + $0x3f8] sm:$0xff] }
0x1b6e   :  { %v4608_v32 = vpop.f32.mrf.mxu1 }
0x1b6f   :  { %v6016_v42 = vadd.f32 %v2788_v4, %v2712_v30 }
0x1b71   :  { %vm2816_vm1 = vcmp.ge.f32.partialorder %v6016_v42, -2.2  ;;  %vm2817_vm7 = vcmp.lt.f32.partialorder %v6016_v42, -1.8  ;;  %vm2821_vm8 = vcmp.ge.f32.partialorder %v6016_v42, -1.8 }
0x1b72   :  { %vm2818_vm9 = vmand %vm2816_vm1, %vm2817_vm7  ;;  %vm2822_vm10 = vcmp.lt.f32.partialorder %v6016_v42, -1.4  ;;  %vm2826_vm11 = vcmp.ge.f32.partialorder %v6016_v42, -1.4  ;;  %vm2827_vm12 = vcmp.lt.f32.partialorder %v6016_v42, -1.0  ;;  %vm2831_vm13 = vcmp.ge.f32.partialorder %v6016_v42, -1.0 }
0x1b73   :  { %vm2823_vm14 = vmand %vm2821_vm8, %vm2822_vm10  ;;  %vm2832_vm15 = vcmp.lt.f32.partialorder %v6016_v42, -0.6  ;;  %v3893_v35 = vadd.f32 2.2, %v6016_v42  ;;  %v2881_v36 = vsub.f32 -1.0, %v6016_v42  ;;  %v3882_v37 = vsel %vm2818_vm9, 1.0, %v5044_v46 }
0x1b74   :  { %v3883_v34 = vsel %vm2823_vm14, 1.0, %v5044_v46  ;;  %vm2828_vm2 = vmand %vm2826_vm11, %vm2827_vm12  ;;  %v2874_v39 = vsub.f32 -1.4, %v6016_v42  ;;  %v6032_v40 = vadd.f32 1.8, %v6016_v42  ;;  %v6040_v58 = vadd.f32 1.0, %v6016_v42 }
0x1b75   :  { %v3884_v62 = vsel %vm2828_vm2, 1.0, %v5044_v46  ;;  %vm2833_vm3 = vmand %vm2831_vm13, %vm2832_vm15  ;;  %v2872_v57 = vmul.f32 2.5, %v3893_v35  ;;  %v2882_v41 = vmul.f32 2.5, %v2881_v36  ;;  %v3895_v53 = vadd.f32 1.4, %v6016_v42 }
0x1b76   :  { %v2875_v43 = vmul.f32 2.5, %v2874_v39  ;;  %v2879_v2 = vmul.f32 2.5, %v6032_v40  ;;  %v2888_v45 = vsub.f32 -0.6, %v6016_v42  ;;  %v3885_v59 = vsel %vm2833_vm3, 1.0, %v5044_v46 }
0x1b77   :  { %v2873_v48 = vmul.f32 %v3882_v37, %v2872_v57  ;;  %v2883_v51 = vmul.f32 %v3884_v62, %v2882_v41  ;;  %v2886_v50 = vmul.f32 2.5, %v3895_v53  ;;  %v2941_v56 = vmul.f32 1.25, %v3893_v35 }
0x1b78   :  { %v2876_v54 = vmul.f32 %v3883_v34, %v2875_v43  ;;  %v2880_v49 = vmul.f32 %v3883_v34, %v2879_v2  ;;  %v2889_v24 = vmul.f32 2.5, %v2888_v45  ;;  %v2943_v29 = vmul.f32 1.25, %v2881_v36 }
0x1b79   :  { %v2887_v47 = vmul.f32 %v3884_v62, %v2886_v50  ;;  %v2946_v52 = vmul.f32 1.25, %v6032_v40  ;;  %v2948_v0 = vmul.f32 1.25, %v2888_v45  ;;  %v3881_v7 = vmul.f32 -1.442695, %v6016_v42 }
0x1b7a   :  { %v2877_v17 = vadd.f32 %v2876_v54, %v2873_v48  ;;  %v2884_v15 = vadd.f32 %v2883_v51, %v2880_v49  ;;  %v2890_v3 = vmul.f32 %v3885_v59, %v2889_v24  ;;  %vm2836_vm4 = vcmp.ge.f32.partialorder %v6016_v42, -0.6  ;;  %v3194_v49 = vld [vmem:[%s6627_s1 + $0x3e8] sm:$0xff] }
0x1b7b   :  { %vm2837_vm5 = vcmp.lt.f32.partialorder %v6016_v42, -0.2  ;;  %5040 = vpow2.f32 %v3881_v7  ;;  %v2893_v38 = vmul.f32 2.5, %v6040_v58  ;;  %v6048_v44 = vsub.f32 -0.2, %v6016_v42 }
0x1b7c   :  { %v2891_v33 = vadd.f32 %v2890_v3, %v2887_v47  ;;  %v2942_v13 = vmul.f32 %v2941_v56, %v2877_v17  ;;  %v2944_v31 = vmul.f32 %v2943_v29, %v2884_v15  ;;  %v2947_v14 = vmul.f32 %v2946_v52, %v2884_v15  ;;  %vm2838_vm6 = vmand %vm2836_vm4, %vm2837_vm5  ;;  %v3193_v15 = vld [vmem:[%s6627_s1 + $0x3e0] sm:$0xff] }
0x1b7d   :  { %v2986_v22 = vmul.f32 0.8333333, %v3893_v35  ;;  %v3886_v63 = vsel %vm2838_vm6, 1.0, %v5044_v46  ;;  %v2988_v6 = vmul.f32 0.8333333, %v2888_v45  ;;  %v2894_v8 = vmul.f32 %v3885_v59, %v2893_v38  ;;  %v3192_v38 = vld [vmem:[%s6627_s1 + $0x3d8] sm:$0xff] }
0x1b7e   :  { %v2945_v60 = vadd.f32 %v2944_v31, %v2942_v13  ;;  %v2949_v1 = vmul.f32 %v2948_v0, %v2891_v33  ;;  %v2896_v26 = vmul.f32 2.5, %v6048_v44  ;;  %v2951_v4 = vmul.f32 1.25, %v3895_v53 }
0x1b7f   :  { %vm2841_vm1 = vcmp.ge.f32.partialorder %v6016_v42, -0.2  ;;  %vm2842_vm7 = vcmp.lt.f32.partialorder %v6016_v42, 0.2  ;;  %v6057_v16 = vadd.f32 0.6, %v6016_v42 }
0x1b80   :  { %v6052_v12 = vadd.f32 %v2949_v1, %v2947_v14  ;;  %v2987_v10 = vmul.f32 %v2986_v22, %v2945_v60  ;;  %v2897_v5 = vmul.f32 %v3886_v63, %v2896_v26  ;;  %v2902_v11 = vsub.f32 0.2, %v6016_v42  ;;  %vm2843_vm8 = vmand %vm2841_vm1, %vm2842_vm7 }
0x1b81   :  { %v2952_v19 = vmul.f32 %v2951_v4, %v2891_v33  ;;  %v2953_v20 = vmul.f32 1.25, %v6048_v44  ;;  %v3887_v21 = vsel %vm2843_vm8, 1.0, %v5044_v46  ;;  %v2900_v9 = vmul.f32 2.5, %v6057_v16 }
0x1b82   :  { %v2989_v18 = vmul.f32 %v2988_v6, %v6052_v12  ;;  %v2898_v61 = vadd.f32 %v2897_v5, %v2894_v8  ;;  %v2903_v23 = vmul.f32 2.5, %v2902_v11  ;;  %v2956_v27 = vmul.f32 1.25, %v6040_v58 }
0x1b83   :  { %vm2846_vm9 = vcmp.ge.f32.partialorder %v6016_v42, 0.2  ;;  %v2901_v32 = vmul.f32 %v3886_v63, %v2900_v9  ;;  %v2996_v36 = vmul.f32 0.8333333, %v3895_v53  ;;  %vm2847_vm10 = vcmp.lt.f32.partialorder %v6016_v42, 0.6 }
0x1b84   :  { %v2990_v25 = vadd.f32 %v2989_v18, %v2987_v10  ;;  %v2954_v30 = vmul.f32 %v2953_v20, %v2898_v61  ;;  %v2904_v35 = vmul.f32 %v3887_v21, %v2903_v23  ;;  %v6074_v37 = vadd.f32 0.2, %v6016_v42  ;;  %vm2848_vm11 = vmand %vm2846_vm9, %vm2847_vm10  ;;  %v3195_v53 = vld [vmem:[%s6627_s1 + $0x3f0] sm:$0xff] }
0x1b85   :  { %v2909_v34 = vsub.f32 0.6, %v6016_v42  ;;  %v2957_v57 = vmul.f32 %v2956_v27, %v2898_v61  ;;  %v2958_v41 = vmul.f32 1.25, %v2902_v11  ;;  %v3888_v43 = vsel %vm2848_vm11, 1.0, %v5044_v46  ;;  %v3191_v10 = vld [vmem:[%s6627_s1 + $0x3d0] sm:$0xff]  ;;  %v3189_v27 = vld [vmem:[%s6627_s1 + $0x3c0] sm:$0xff] }
0x1b86   :  { %4653 = vmatmul.mubr.f32.vlgmr.msra.gmra.mxu1 %v2990_v25  ;;  %v6079_v39 = vadd.f32 %v2954_v30, %v2952_v19  ;;  %v2905_v62 = vadd.f32 %v2904_v35, %v2901_v32  ;;  %v2907_v2 = vmul.f32 2.5, %v6074_v37  ;;  %v2998_v51 = vmul.f32 0.8333333, %v2902_v11 }
0x1b87   :  { %4691 = vmatpush3.msra.mxu1 %v3197_v55  ;;  %4722 = vmatprep.mubr.msk.f32.mxu1 %vm5045_vm0, %v5044_v46  ;;  %v2910_v45 = vmul.f32 2.5, %v2909_v34  ;;  %v2961_v50 = vmul.f32 1.25, %v6057_v16  ;;  %v2963_v56 = vmul.f32 1.25, %v2909_v34  ;;  %vm2851_vm12 = vcmp.ge.f32.partialorder %v6016_v42, 0.6 }
0x1b88   :  { %4692 = vmatprep.subr.mxu1 %v5044_v46  ;;  %v2959_v59 = vmul.f32 %v2958_v41, %v2905_v62  ;;  %v2997_v48 = vmul.f32 %v2996_v36, %v6079_v39  ;;  %v5041_v54 = vpop.eup %5040  ;;  %v2908_v24 = vmul.f32 %v3887_v21, %v2907_v2  ;;  %vm2852_vm13 = vcmp.lt.f32.partialorder %v6016_v42, 1.0 }
0x1b89   :  { %4693 = vmatpush3.msra.mxu1 %v3196_v28  ;;  %v2911_v47 = vmul.f32 %v3888_v43, %v2910_v45  ;;  %v2796_v29 = vadd.f32 1.0, %v5041_v54  ;;  %v2962_v17 = vmul.f32 %v2961_v50, %v2905_v62  ;;  %vm2853_vm14 = vmand %vm2851_vm12, %vm2852_vm13  ;;  %v6102_v0 = vadd.f32 -0.2, %v6016_v42  ;;  %v3187_v45 = vld [vmem:[%s6627_s1 + $0x3b0] sm:$0xff] }
0x1b8a   :  { %4694 = vmatprep.subr.mxu1 %v5044_v46  ;;  %v2960_v52 = vadd.f32 %v2959_v59, %v2957_v57  ;;  %v2916_v7 = vsub.f32 1.0, %v6016_v42  ;;  %v2966_v33 = vmul.f32 1.25, %v6074_v37  ;;  %v3001_v31 = vmul.f32 0.8333333, %v6040_v58 }
0x1b8b   :  { %4695 = vmatpush3.msra.mxu1 %v3195_v53  ;;  %v2912_v3 = vadd.f32 %v2911_v47, %v2908_v24  ;;  %5042 = vrcp.f32 %v2796_v29  ;;  %v3889_v14 = vsel %vm2853_vm14, 1.0, %v5044_v46  ;;  %v2914_v1 = vmul.f32 2.5, %v6102_v0  ;;  %v3284_v24 = vld [vmem:[%s6627_s1 + $0x480] sm:$0xff] }
0x1b8c   :  { %4696 = vmatprep.subr.mxu1 %v5044_v46  ;;  %v2999_v13 = vmul.f32 %v2998_v51, %v2960_v52  ;;  %v2917_v22 = vmul.f32 2.5, %v2916_v7  ;;  %v3002_v8 = vmul.f32 %v3001_v31, %v2960_v52  ;;  %v3003_v26 = vmul.f32 0.8333333, %v2909_v34  ;;  %v3188_v34 = vld [vmem:[%s6627_s1 + $0x3b8] sm:$0xff]  ;;  %v3185_v29 = vld [vmem:[%s6627_s1 + $0x3a0] sm:$0xff]  ;;  %v3183_v31 = vld [vmem:[%s6627_s1 + $0x390] sm:$0xff] }
0x1b8d   :  { %4697 = vmatpush3.msra.mxu1 %v3194_v49  ;;  %v2964_v60 = vmul.f32 %v2963_v56, %v2912_v3  ;;  %v2967_v63 = vmul.f32 %v2966_v33, %v2912_v3  ;;  %v3006_v58 = vmul.f32 0.8333333, %v6057_v16  ;;  %v2915_v5 = vmul.f32 %v3888_v43, %v2914_v1  ;;  %v3190_v16 = vld [vmem:[%s6627_s1 + $0x3c8] sm:$0xff]  ;;  %v3283_v52 = vld [vmem:[%s6627_s1 + $0x478] sm:$0xff]  ;;  %v3282_v33 = vld [vmem:[%s6627_s1 + $0x470] sm:$0xff] }
0x1b8e   :  { %4698 = vmatprep.subr.mxu1 %v5044_v46  ;;  %v6113_v6 = vadd.f32 %v2999_v13, %v2997_v48  ;;  %v2918_v11 = vmul.f32 %v3889_v14, %v2917_v22  ;;  %vm2856_vm15 = vcmp.ge.f32.partialorder %v6016_v42, 1.0  ;;  %vm2857_vm2 = vcmp.lt.f32.partialorder %v6016_v42, 1.4  ;;  %v3371_v1 = vld [vmem:[%s6627_s1 + $0x500] sm:$0xff]  ;;  %v3278_v22 = vld [vmem:[%s6627_s1 + $0x450] sm:$0xff] }
0x1b8f   :  { %4699 = vmatpush3.msra.mxu1 %v3193_v15  ;;  %v2965_v4 = vadd.f32 %v2964_v60, %v2962_v17  ;;  %v6123_v18 = vadd.f32 -0.6, %v6016_v42  ;;  %v2923_v19 = vsub.f32 1.4, %v6016_v42  ;;  %v2968_v21 = vmul.f32 1.25, %v2916_v7  ;;  %vm2858_vm3 = vmand %vm2856_vm15, %vm2857_vm2  ;;  %v3184_v15 = vld [vmem:[%s6627_s1 + $0x398] sm:$0xff] }
0x1b90   :  { %4700 = vmatprep.subr.mxu1 %v5044_v46  ;;  %v2919_v61 = vadd.f32 %v2918_v11, %v2915_v5  ;;  %v6131_v23 = vsel %vm2858_vm3, 1.0, %v5044_v46  ;;  %v2971_v36 = vmul.f32 1.25, %v6102_v0  ;;  %v3008_v57 = vmul.f32 0.8333333, %v2916_v7  ;;  %v3279_v60 = vld [vmem:[%s6627_s1 + $0x458] sm:$0xff]  ;;  %v3367_v5 = vld [vmem:[%s6627_s1 + $0x4e0] sm:$0xff] }
0x1b91   :  { %4701 = vmatpush3.msra.mxu1 %v3192_v38  ;;  %v3004_v20 = vmul.f32 %v3003_v26, %v2965_v4  ;;  %v3007_v9 = vmul.f32 %v3006_v58, %v2965_v4  ;;  %v2921_v25 = vmul.f32 2.5, %v6123_v18  ;;  %v2924_v55 = vmul.f32 2.5, %v2923_v19  ;;  %v3182_v38 = vld [vmem:[%s6627_s1 + $0x388] sm:$0xff]  ;;  %v3369_v26 = vld [vmem:[%s6627_s1 + $0x4f0] sm:$0xff]  ;;  %v3276_v58 = vld [vmem:[%s6627_s1 + $0x440] sm:$0xff] }
0x1b92   :  { %4702 = vmatprep.subr.mxu1 %v5044_v46  ;;  %v2969_v30 = vmul.f32 %v2968_v21, %v2919_v61  ;;  %v3011_v41 = vmul.f32 0.8333333, %v6074_v37  ;;  %v2972_v43 = vmul.f32 %v2971_v36, %v2919_v61  ;;  %v2973_v2 = vmul.f32 1.25, %v2923_v19  ;;  %v3186_v37 = vld [vmem:[%s6627_s1 + $0x3a8] sm:$0xff]  ;;  %v3275_v4 = vld [vmem:[%s6627_s1 + $0x438] sm:$0xff]  ;;  %v3274_v11 = vld [vmem:[%s6627_s1 + $0x430] sm:$0xff] }
0x1b93   :  { %4703 = vmatpush3.msra.mxu1 %v3191_v10  ;;  %v6138_v28 = vadd.f32 %v3004_v20, %v3002_v8  ;;  %v2922_v32 = vmul.f32 %v3889_v14, %v2921_v25  ;;  %v2925_v35 = vmul.f32 %v6131_v23, %v2924_v55  ;;  %v3013_v56 = vmul.f32 0.8333333, %v2923_v19  ;;  %v3281_v14 = vld [vmem:[%s6627_s1 + $0x468] sm:$0xff]  ;;  %v3366_v19 = vld [vmem:[%s6627_s1 + $0x4d8] sm:$0xff]  ;;  %v3365_v20 = vld [vmem:[%s6627_s1 + $0x4d0] sm:$0xff] }
0x1b94   :  { %4704 = vmatprep.subr.mxu1 %v5044_v46  ;;  %v2970_v62 = vadd.f32 %v2969_v30, %v2967_v63  ;;  %v2991_v3 = vmul.f32 0.8333333, %v6032_v40  ;;  %v2993_v7 = vmul.f32 0.8333333, %v6048_v44  ;;  %v3370_v63 = vld [vmem:[%s6627_s1 + $0x4f8] sm:$0xff]  ;;  %v3277_v8 = vld [vmem:[%s6627_s1 + $0x448] sm:$0xff] }
0x1b95   :  { %4705 = vmatpush3.msra.mxu1 %v3190_v16  ;;  %v6147_v53 = vadd.f32 %v2925_v35, %v2922_v32  ;;  %v3368_v10 = vld [vmem:[%s6627_s1 + $0x4e8] sm:$0xff]  ;;  %v3272_v61 = vld [vmem:[%s6627_s1 + $0x420] sm:$0xff]  ;;  %v3270_v55 = vld [vmem:[%s6627_s1 + $0x410] sm:$0xff]  ;;  %vm2861_vm4 = vcmp.ge.f32.partialorder %v6016_v42, 1.4 }
0x1b96   :  { %4706 = vmatprep.subr.mxu1 %v5044_v46  ;;  %v3009_v59 = vmul.f32 %v3008_v57, %v2970_v62  ;;  %v3012_v48 = vmul.f32 %v3011_v41, %v2970_v62  ;;  %v2992_v40 = vmul.f32 %v2991_v3, %v6052_v12  ;;  %v2994_v44 = vmul.f32 %v2993_v7, %v6079_v39  ;;  %v3280_v12 = vld [vmem:[%s6627_s1 + $0x460] sm:$0xff]  ;;  %v3273_v16 = vld [vmem:[%s6627_s1 + $0x428] sm:$0xff]  ;;  %v3361_v35 = vld [vmem:[%s6627_s1 + $0x4b0] sm:$0xff] }
0x1b97   :  { %4707 = vmatpush3.msra.mxu1 %v3189_v27  ;;  %v2974_v51 = vmul.f32 %v2973_v2, %v6147_v53  ;;  %v3364_v21 = vld [vmem:[%s6627_s1 + $0x4c8] sm:$0xff]  ;;  %v3363_v25 = vld [vmem:[%s6627_s1 + $0x4c0] sm:$0xff]  ;;  %v3362_v27 = vld [vmem:[%s6627_s1 + $0x4b8] sm:$0xff]  ;;  %vm2862_vm5 = vcmp.lt.f32.partialorder %v6016_v42, 1.8 }
0x1b98   :  { %4708 = vmatprep.subr.mxu1 %v5044_v46  ;;  %v5043_v50 = vpop.eup %5042  ;;  %v6158_v54 = vadd.f32 %v3009_v59, %v3007_v9  ;;  %v2995_v39 = vadd.f32 %v2994_v44, %v2992_v40  ;;  %v3271_v9 = vld [vmem:[%s6627_s1 + $0x418] sm:$0xff]  ;;  %v3269_v30 = vld [vmem:[%s6627_s1 + $0x408] sm:$0xff]  ;;  %v3458_v32 = vld [vmem:[%s6627_s1 + $0x580] sm:$0xff]  ;;  %vm2866_vm1 = vcmp.ge.f32.partialorder %v6016_v42, 1.8 }
0x1b99   :  { %4709 = vmatpush3.msra.mxu1 %v3188_v34  ;;  %v2799_v49 = vmul.f32 %v5043_v50, %v6016_v42  ;;  %v6164_v47 = vadd.f32 %v2974_v51, %v2972_v43  ;;  %v3457_v36 = vld [vmem:[%s6627_s1 + $0x578] sm:$0xff]  ;;  %v3360_v34 = vld [vmem:[%s6627_s1 + $0x4a8] sm:$0xff]  ;;  %v3359_v62 = vld [vmem:[%s6627_s1 + $0x4a0] sm:$0xff]  ;;  %vm2867_vm7 = vcmp.lt.f32.partialorder %v6016_v42, 2.2 }
0x1b9a   :  { %4710 = vmatprep.subr.mxu1 %v5044_v46  ;;  %v3455_v57 = vld [vmem:[%s6627_s1 + $0x568] sm:$0xff]  ;;  %v3358_v41 = vld [vmem:[%s6627_s1 + $0x498] sm:$0xff]  ;;  %v3454_v43 = vld [vmem:[%s6627_s1 + $0x560] sm:$0xff] }
0x1b9b   :  { %4711 = vmatpush3.msra.mxu1 %v3187_v45  ;;  %4688 = vmatmul.mubr.f32.vlgmr.msra.gmra.mxu0 %v2799_v49  ;;  %v3014_v17 = vmul.f32 %v3013_v56, %v6164_v47  ;;  %v3357_v2 = vld [vmem:[%s6627_s1 + $0x490] sm:$0xff]  ;;  %v3453_v45 = vld [vmem:[%s6627_s1 + $0x558] sm:$0xff]  ;;  %v3356_v59 = vld [vmem:[%s6627_s1 + $0x488] sm:$0xff] }
0x1b9c   :  { %4712 = vmatprep.subr.mxu1 %v5044_v46  ;;  %4726 = vmatpush3.msra.mxu0 %v3284_v24  ;;  %v3451_v51 = vld [vmem:[%s6627_s1 + $0x548] sm:$0xff]  ;;  %v3545_v50 = vld [vmem:[%s6627_s1 + $0x600] sm:$0xff]  ;;  %v3544_v49 = vld [vmem:[%s6627_s1 + $0x5f8] sm:$0xff] }
0x1b9d   :  { %4713 = vmatpush3.msra.mxu1 %v3186_v37  ;;  %4727 = vmatprep.subr.mxu0 %v5044_v46  ;;  %v6184_v13 = vadd.f32 %v3014_v17, %v3012_v48  ;;  %v3452_v48 = vld [vmem:[%s6627_s1 + $0x550] sm:$0xff]  ;;  %v3450_v37 = vld [vmem:[%s6627_s1 + $0x540] sm:$0xff]  ;;  %v3540_v3 = vld [vmem:[%s6627_s1 + $0x5d8] sm:$0xff] }
0x1b9e   :  { %4714 = vmatprep.subr.mxu1 %v5044_v46  ;;  %4728 = vmatpush3.msra.mxu0 %v3283_v52  ;;  %v3543_v24 = vld [vmem:[%s6627_s1 + $0x5f0] sm:$0xff]  ;;  %v3447_v52 = vld [vmem:[%s6627_s1 + $0x528] sm:$0xff]  ;;  %v3541_v17 = vld [vmem:[%s6627_s1 + $0x5e0] sm:$0xff] }
0x1b9f   :  { %4715 = vmatpush3.msra.mxu1 %v3185_v29  ;;  %4729 = vmatprep.subr.mxu0 %v5044_v46  ;;  %v3448_v56 = vld [vmem:[%s6627_s1 + $0x530] sm:$0xff]  ;;  %v3542_v29 = vld [vmem:[%s6627_s1 + $0x5e8] sm:$0xff]  ;;  %v3445_v7 = vld [vmem:[%s6627_s1 + $0x518] sm:$0xff] }
0x1ba0   :  { %4716 = vmatprep.subr.mxu1 %v5044_v46  ;;  %4730 = vmatpush3.msra.mxu0 %v3282_v33  ;;  %v3539_v33 = vld [vmem:[%s6627_s1 + $0x5d0] sm:$0xff]  ;;  %v3538_v40 = vld [vmem:[%s6627_s1 + $0x5c8] sm:$0xff]  ;;  %vm2863_vm6 = vmand %vm2861_vm4, %vm2862_vm5 }
0x1ba1   :  { %4717 = vmatpush3.msra.mxu1 %v3184_v15  ;;  %4731 = vmatprep.subr.mxu0 %v5044_v46  ;;  %v3446_v15 = vld [vmem:[%s6627_s1 + $0x520] sm:$0xff]  ;;  %v3443_v44 = vld [vmem:[%s6627_s1 + $0x508] sm:$0xff]  ;;  %vm2868_vm8 = vmand %vm2866_vm1, %vm2867_vm7 }
0x1ba2   :  { %4718 = vmatprep.subr.mxu1 %v5044_v46  ;;  %4732 = vmatpush3.msra.mxu0 %v3281_v14  ;;  %v3537_v14 = vld [vmem:[%s6627_s1 + $0x5c0] sm:$0xff] }
0x1ba3   :  { %4719 = vmatpush3.msra.mxu1 %v3183_v31  ;;  %4733 = vmatprep.subr.mxu0 %v5044_v46  ;;  %v3444_v31 = vld [vmem:[%s6627_s1 + $0x510] sm:$0xff] }
0x1ba4   :  { %4720 = vmatprep.subr.mxu1 %v5044_v46  ;;  %4734 = vmatpush3.msra.mxu0 %v3280_v12  ;;  %v3632_v12 = vld [vmem:[%s6627_s1 + $0x680] sm:$0xff] }
0x1ba5   :  { %4721 = vmatpush3.msra.mxu1 %v3182_v38  ;;  %4735 = vmatprep.subr.mxu0 %v5044_v46  ;;  %v3536_v38 = vld [vmem:[%s6627_s1 + $0x5b8] sm:$0xff] }
0x1ba6   :  { %4723 = vmatmul.mubr.f32.vlgmr.msra.gmra.mxu1 %v2995_v39  ;;  %4760 = vmatprep.subr.mxu1 %v5044_v46  ;;  %v3535_v39 = vld [vmem:[%s6627_s1 + $0x5b0] sm:$0xff] }
0x1ba7   :  { %4736 = vmatpush3.msra.mxu0 %v3279_v60  ;;  %4761 = vmatpush3.msra.mxu1 %v3371_v1  ;;  %v3631_v60 = vld [vmem:[%s6627_s1 + $0x678] sm:$0xff]  ;;  %v3630_v1 = vld [vmem:[%s6627_s1 + $0x670] sm:$0xff] }
0x1ba8   :  { %4737 = vmatprep.subr.mxu0 %v5044_v46  ;;  %4762 = vmatprep.subr.mxu1 %v5044_v46 }
0x1ba9   :  { %4738 = vmatpush3.msra.mxu0 %v3278_v22  ;;  %4763 = vmatpush3.msra.mxu1 %v3370_v63  ;;  %v6448_v22 = vadd.f32 -1.0, %v6016_v42  ;;  %v6451_v63 = vsub.f32 1.8, %v6016_v42 }
0x1baa   :  { %4739 = vmatprep.subr.mxu0 %v5044_v46  ;;  %4764 = vmatprep.subr.mxu1 %v5044_v46 }
0x1bab   :  { %4740 = vmatpush3.msra.mxu0 %v3277_v8  ;;  %4765 = vmatpush3.msra.mxu1 %v3369_v26  ;;  %v3533_v8 = vld [vmem:[%s6627_s1 + $0x5a0] sm:$0xff]  ;;  %v3629_v26 = vld [vmem:[%s6627_s1 + $0x668] sm:$0xff] }
0x1bac   :  { %4741 = vmatprep.subr.mxu0 %v5044_v46  ;;  %4766 = vmatprep.subr.mxu1 %v5044_v46 }
0x1bad   :  { %4742 = vmatpush3.msra.mxu0 %v3276_v58  ;;  %4767 = vmatpush3.msra.mxu1 %v3368_v10  ;;  %v3532_v58 = vld [vmem:[%s6627_s1 + $0x598] sm:$0xff]  ;;  %v3628_v10 = vld [vmem:[%s6627_s1 + $0x660] sm:$0xff] }
0x1bae   :  { %4743 = vmatprep.subr.mxu0 %v5044_v46  ;;  %4768 = vmatprep.subr.mxu1 %v5044_v46 }
0x1baf   :  { %4744 = vmatpush3.msra.mxu0 %v3275_v4  ;;  %4769 = vmatpush3.msra.mxu1 %v3367_v5  ;;  %v2928_v4 = vmul.f32 2.5, %v6448_v22  ;;  %v2931_v5 = vmul.f32 2.5, %v6451_v63 }
0x1bb0   :  { %4745 = vmatprep.subr.mxu0 %v5044_v46  ;;  %4770 = vmatprep.subr.mxu1 %v5044_v46 }
0x1bb1   :  { %4746 = vmatpush3.msra.mxu0 %v3274_v11  ;;  %4771 = vmatpush3.msra.mxu1 %v3366_v19  ;;  %v3531_v11 = vld [vmem:[%s6627_s1 + $0x590] sm:$0xff]  ;;  %v3627_v19 = vld [vmem:[%s6627_s1 + $0x658] sm:$0xff] }
0x1bb2   :  { %4747 = vmatprep.subr.mxu0 %v5044_v46  ;;  %4772 = vmatprep.subr.mxu1 %v5044_v46 }
0x1bb3   :  { %4748 = vmatpush3.msra.mxu0 %v3273_v16  ;;  %4773 = vmatpush3.msra.mxu1 %v3365_v20  ;;  %v6480_v16 = vsel %vm2863_vm6, 1.0, %v5044_v46  ;;  %v3530_v20 = vld [vmem:[%s6627_s1 + $0x588] sm:$0xff] }
0x1bb4   :  { %4749 = vmatprep.subr.mxu0 %v5044_v46  ;;  %4774 = vmatprep.subr.mxu1 %v5044_v46 }
0x1bb5   :  { %4750 = vmatpush3.msra.mxu0 %v3272_v61  ;;  %4775 = vmatpush3.msra.mxu1 %v3364_v21  ;;  %v3626_v61 = vld [vmem:[%s6627_s1 + $0x650] sm:$0xff]  ;;  %v2929_v21 = vmul.f32 %v6131_v23, %v2928_v4  ;;  %v3624_v23 = vld [vmem:[%s6627_s1 + $0x640] sm:$0xff] }
0x1bb6   :  { %4751 = vmatprep.subr.mxu0 %v5044_v46  ;;  %4776 = vmatprep.subr.mxu1 %v5044_v46 }
0x1bb7   :  { %4752 = vmatpush3.msra.mxu0 %v3271_v9  ;;  %4757 = vmatprep.mubr.msk.f32.mxu0 %vm5045_vm0, %v5044_v46  ;;  %v2932_v9 = vmul.f32 %v6480_v16, %v2931_v5 }
0x1bb8   :  { %4753 = vmatprep.subr.mxu0 %v5044_v46  ;;  %4777 = vmatpush3.msra.mxu1 %v3363_v25  ;;  %v3625_v25 = vld [vmem:[%s6627_s1 + $0x648] sm:$0xff] }
0x1bb9   :  { %4754 = vmatpush3.msra.mxu0 %v3270_v55  ;;  %4778 = vmatprep.subr.mxu1 %v5044_v46  ;;  %v3719_v55 = vld [vmem:[%s6627_s1 + $0x700] sm:$0xff] }
0x1bba   :  { %4755 = vmatprep.subr.mxu0 %v5044_v46  ;;  %4779 = vmatpush3.msra.mxu1 %v3362_v27  ;;  %v3718_v27 = vld [vmem:[%s6627_s1 + $0x6f8] sm:$0xff] }
0x1bbb   :  { %4756 = vmatpush3.msra.mxu0 %v3269_v30  ;;  %4780 = vmatprep.subr.mxu1 %v5044_v46  ;;  %v6511_v30 = vadd.f32 %v2932_v9, %v2929_v21 }
0x1bbc   :  { %4758 = vmatmul.mubr.f32.vlgmr.msra.gmra.mxu0 %v6113_v6  ;;  %4795 = vmatprep.subr.mxu0 %v5044_v46  ;;  %v3456_v6 = vld [vmem:[%s6627_s1 + $0x570] sm:$0xff] }
0x1bbd   :  { %4796 = vmatpush3.msra.mxu0 %v3458_v32  ;;  %4781 = vmatpush3.msra.mxu1 %v3361_v35  ;;  %v3717_v32 = vld [vmem:[%s6627_s1 + $0x6f0] sm:$0xff]  ;;  %v2976_v35 = vmul.f32 1.25, %v6123_v18 }
0x1bbe   :  { %4797 = vmatprep.subr.mxu0 %v5044_v46  ;;  %4782 = vmatprep.subr.mxu1 %v5044_v46 }
0x1bbf   :  { %4798 = vmatpush3.msra.mxu0 %v3457_v36  ;;  %4783 = vmatpush3.msra.mxu1 %v3360_v34  ;;  %v2978_v36 = vmul.f32 1.25, %v6451_v63  ;;  %v3902_v34 = vadd.f32 -1.4, %v6016_v42 }
0x1bc0   :  { %4799 = vmatprep.subr.mxu0 %v5044_v46  ;;  %4784 = vmatprep.subr.mxu1 %v5044_v46 }
0x1bc1   :  { %4800 = vmatpush3.msra.mxu0 %v3456_v6  ;;  %4785 = vmatpush3.msra.mxu1 %v3359_v62  ;;  %v6527_v6 = vsub.f32 2.2, %v6016_v42  ;;  %v3622_v62 = vld [vmem:[%s6627_s1 + $0x630] sm:$0xff]  ;;  %v3621_v42 = vld [vmem:[%s6627_s1 + $0x628] sm:$0xff] }
0x1bc2   :  { %4801 = vmatprep.subr.mxu0 %v5044_v46  ;;  %4786 = vmatprep.subr.mxu1 %v5044_v46 }
0x1bc3   :  { %4802 = vmatpush3.msra.mxu0 %v3455_v57  ;;  %4787 = vmatpush3.msra.mxu1 %v3358_v41  ;;  %v3716_v57 = vld [vmem:[%s6627_s1 + $0x6e8] sm:$0xff]  ;;  %v2977_v41 = vmul.f32 %v2976_v35, %v6147_v53  ;;  %v2935_v53 = vmul.f32 2.5, %v3902_v34 }
0x1bc4   :  { %4803 = vmatprep.subr.mxu0 %v5044_v46  ;;  %4788 = vmatprep.subr.mxu1 %v5044_v46 }
0x1bc5   :  { %4804 = vmatpush3.msra.mxu0 %v3454_v43  ;;  %4789 = vmatpush3.msra.mxu1 %v3357_v2  ;;  %v2979_v43 = vmul.f32 %v2978_v36, %v6511_v30  ;;  %v3715_v2 = vld [vmem:[%s6627_s1 + $0x6e0] sm:$0xff] }
0x1bc6   :  { %4805 = vmatprep.subr.mxu0 %v5044_v46  ;;  %4790 = vmatprep.subr.mxu1 %v5044_v46 }
0x1bc7   :  { %4806 = vmatpush3.msra.mxu0 %v3453_v45  ;;  %4791 = vmatpush3.msra.mxu1 %v3356_v59  ;;  %v2938_v45 = vmul.f32 2.5, %v6527_v6  ;;  %v3620_v59 = vld [vmem:[%s6627_s1 + $0x620] sm:$0xff] }
0x1bc8   :  { %4807 = vmatprep.subr.mxu0 %v5044_v46  ;;  %4792 = vmatprep.mubr.msk.f32.mxu1 %vm5045_vm0, %v5044_v46 }
0x1bc9   :  { %4808 = vmatpush3.msra.mxu0 %v3452_v48  ;;  %4793 = vmatmul.mubr.f32.vlgmr.msra.gmra.mxu1 %v6138_v28  ;;  %v3449_v28 = vld [vmem:[%s6627_s1 + $0x538] sm:$0xff] }
0x1bca   :  { %4809 = vmatprep.subr.mxu0 %v5044_v46  ;;  %4830 = vmatprep.subr.mxu1 %v5044_v46  ;;  %v3714_v48 = vld [vmem:[%s6627_s1 + $0x6d8] sm:$0xff] }
0x1bcb   :  { %4810 = vmatpush3.msra.mxu0 %v3451_v51  ;;  %4831 = vmatpush3.msra.mxu1 %v3545_v50  ;;  %v2980_v51 = vadd.f32 %v2979_v43, %v2977_v41  ;;  %v3892_v50 = vsel %vm2868_vm8, 1.0, %v5044_v46 }
0x1bcc   :  { %4811 = vmatprep.subr.mxu0 %v5044_v46  ;;  %4832 = vmatprep.subr.mxu1 %v5044_v46 }
0x1bcd   :  { %4812 = vmatpush3.msra.mxu0 %v3450_v37  ;;  %4833 = vmatpush3.msra.mxu1 %v3544_v49  ;;  %v3619_v37 = vld [vmem:[%s6627_s1 + $0x618] sm:$0xff]  ;;  %v3713_v49 = vld [vmem:[%s6627_s1 + $0x6d0] sm:$0xff] }
0x1bce   :  { %4813 = vmatprep.subr.mxu0 %v5044_v46  ;;  %4834 = vmatprep.subr.mxu1 %v5044_v46 }
0x1bcf   :  { %4814 = vmatpush3.msra.mxu0 %v3449_v28  ;;  %4835 = vmatpush3.msra.mxu1 %v3543_v24  ;;  %v3016_v28 = vmul.f32 0.8333333, %v6102_v0  ;;  %v3018_v24 = vmul.f32 0.8333333, %v6451_v63  ;;  %v3023_v63 = vmul.f32 0.8333333, %v6527_v6 }
0x1bd0   :  { %4815 = vmatprep.subr.mxu0 %v5044_v46  ;;  %4836 = vmatprep.subr.mxu1 %v5044_v46 }
0x1bd1   :  { %4816 = vmatpush3.msra.mxu0 %v3448_v56  ;;  %4837 = vmatpush3.msra.mxu1 %v3542_v29  ;;  %v2936_v56 = vmul.f32 %v6480_v16, %v2935_v53  ;;  %v2939_v29 = vmul.f32 %v3892_v50, %v2938_v45  ;;  %v3017_v0 = vmul.f32 %v3016_v28, %v6164_v47 }
0x1bd2   :  { %4817 = vmatprep.subr.mxu0 %v5044_v46  ;;  %4838 = vmatprep.subr.mxu1 %v5044_v46 }
0x1bd3   :  { %4818 = vmatpush3.msra.mxu0 %v3447_v52  ;;  %4839 = vmatpush3.msra.mxu1 %v3541_v17  ;;  %v3618_v52 = vld [vmem:[%s6627_s1 + $0x610] sm:$0xff]  ;;  %v3712_v17 = vld [vmem:[%s6627_s1 + $0x6c8] sm:$0xff] }
0x1bd4   :  { %4819 = vmatprep.subr.mxu0 %v5044_v46  ;;  %4840 = vmatprep.subr.mxu1 %v5044_v46 }
0x1bd5   :  { %4820 = vmatpush3.msra.mxu0 %v3446_v15  ;;  %4841 = vmatpush3.msra.mxu1 %v3540_v3  ;;  %v3019_v15 = vmul.f32 %v3018_v24, %v2980_v51  ;;  %v3617_v3 = vld [vmem:[%s6627_s1 + $0x608] sm:$0xff] }
0x1bd6   :  { %4821 = vmatprep.subr.mxu0 %v5044_v46  ;;  %4842 = vmatprep.subr.mxu1 %v5044_v46 }
0x1bd7   :  { %4822 = vmatpush3.msra.mxu0 %v3445_v7  ;;  %4843 = vmatpush3.msra.mxu1 %v3539_v33  ;;  %v3711_v7 = vld [vmem:[%s6627_s1 + $0x6c0] sm:$0xff]  ;;  %v2940_v33 = vadd.f32 %v2939_v29, %v2936_v56  ;;  %v3020_v47 = vadd.f32 %v3019_v15, %v3017_v0 }
0x1bd8   :  { %4823 = vmatprep.subr.mxu0 %v5044_v46  ;;  %4844 = vmatprep.subr.mxu1 %v5044_v46 }
0x1bd9   :  { %4824 = vmatpush3.msra.mxu0 %v3444_v31  ;;  %4845 = vmatpush3.msra.mxu1 %v3538_v40  ;;  %v3710_v31 = vld [vmem:[%s6627_s1 + $0x6b8] sm:$0xff]  ;;  %v2981_v40 = vmul.f32 1.25, %v6448_v22  ;;  %v3021_v22 = vmul.f32 0.8333333, %v6123_v18 }
0x1bda   :  { %4825 = vmatprep.subr.mxu0 %v5044_v46  ;;  %4846 = vmatprep.subr.mxu1 %v5044_v46 }
0x1bdb   :  { %4826 = vmatpush3.msra.mxu0 %v3443_v44  ;;  %4827 = vmatprep.mubr.msk.f32.mxu0 %vm5045_vm0, %v5044_v46  ;;  %v2983_v44 = vmul.f32 1.25, %v6527_v6 }
0x1bdc   :  { %4847 = vmatpush3.msra.mxu1 %v3537_v14  ;;  %4828 = vmatmul.mubr.f32.vlgmr.msra.gmra.mxu0 %v6158_v54  ;;  %v3534_v54 = vld [vmem:[%s6627_s1 + $0x5a8] sm:$0xff]  ;;  %v3709_v14 = vld [vmem:[%s6627_s1 + $0x6b0] sm:$0xff] }
0x1bdd   :  { %4848 = vmatprep.subr.mxu1 %v5044_v46  ;;  %4865 = vmatprep.subr.mxu0 %v5044_v46 }
0x1bde   :  { %4849 = vmatpush3.msra.mxu1 %v3536_v38  ;;  %4866 = vmatpush3.msra.mxu0 %v3632_v12  ;;  %v2982_v38 = vmul.f32 %v2981_v40, %v6511_v30  ;;  %v2984_v12 = vmul.f32 %v2983_v44, %v2940_v33 }
0x1bdf   :  { %4850 = vmatprep.subr.mxu1 %v5044_v46  ;;  %4867 = vmatprep.subr.mxu0 %v5044_v46 }
0x1be0   :  { %4851 = vmatpush3.msra.mxu1 %v3535_v39  ;;  %4868 = vmatpush3.msra.mxu0 %v3631_v60  ;;  %v3708_v39 = vld [vmem:[%s6627_s1 + $0x6a8] sm:$0xff]  ;;  %v3707_v60 = vld [vmem:[%s6627_s1 + $0x6a0] sm:$0xff] }
0x1be1   :  { %4852 = vmatprep.subr.mxu1 %v5044_v46  ;;  %4869 = vmatprep.subr.mxu0 %v5044_v46 }
0x1be2   :  { %4853 = vmatpush3.msra.mxu1 %v3534_v54  ;;  %4870 = vmatpush3.msra.mxu0 %v3630_v1  ;;  %v2985_v54 = vadd.f32 %v2984_v12, %v2982_v38  ;;  %v3706_v1 = vld [vmem:[%s6627_s1 + $0x698] sm:$0xff] }
0x1be3   :  { %4854 = vmatprep.subr.mxu1 %v5044_v46  ;;  %4871 = vmatprep.subr.mxu0 %v5044_v46 }
0x1be4   :  { %4855 = vmatpush3.msra.mxu1 %v3533_v8  ;;  %4872 = vmatpush3.msra.mxu0 %v3629_v26  ;;  %v3705_v8 = vld [vmem:[%s6627_s1 + $0x690] sm:$0xff]  ;;  %v3022_v26 = vmul.f32 %v3021_v22, %v2980_v51 }
0x1be5   :  { %4856 = vmatprep.subr.mxu1 %v5044_v46  ;;  %4873 = vmatprep.subr.mxu0 %v5044_v46 }
0x1be6   :  { %4857 = vmatpush3.msra.mxu1 %v3532_v58  ;;  %4874 = vmatpush3.msra.mxu0 %v3628_v10  ;;  %v3024_v58 = vmul.f32 %v3023_v63, %v2985_v54  ;;  %v3704_v10 = vld [vmem:[%s6627_s1 + $0x688] sm:$0xff] }
0x1be7   :  { %4858 = vmatprep.subr.mxu1 %v5044_v46  ;;  %4875 = vmatprep.subr.mxu0 %v5044_v46 }
0x1be8   :  { %4859 = vmatpush3.msra.mxu1 %v3531_v11  ;;  %4876 = vmatpush3.msra.mxu0 %v3627_v19  ;;  %v3025_v18 = vadd.f32 %v3024_v58, %v3022_v26 }
0x1be9   :  { %4860 = vmatprep.subr.mxu1 %v5044_v46  ;;  %4877 = vmatprep.subr.mxu0 %v5044_v46 }
0x1bea   :  { %4861 = vmatpush3.msra.mxu1 %v3530_v20  ;;  %4862 = vmatprep.mubr.msk.f32.mxu1 %vm5045_vm0, %v5044_v46 }
0x1beb   :  { %4878 = vmatpush3.msra.mxu0 %v3626_v61  ;;  %4863 = vmatmul.mubr.f32.vlgmr.msra.gmra.mxu1 %v6184_v13  ;;  %v3623_v13 = vld [vmem:[%s6627_s1 + $0x638] sm:$0xff] }
0x1bec   :  { %4879 = vmatprep.subr.mxu0 %v5044_v46  ;;  %4900 = vmatprep.subr.mxu1 %v5044_v46 }
0x1bed   :  { %4880 = vmatpush3.msra.mxu0 %v3625_v25  ;;  %4901 = vmatpush3.msra.mxu1 %v3719_v55 }
0x1bee   :  { %4881 = vmatprep.subr.mxu0 %v5044_v46  ;;  %4902 = vmatprep.subr.mxu1 %v5044_v46 }
0x1bef   :  { %4882 = vmatpush3.msra.mxu0 %v3624_v23  ;;  %4903 = vmatpush3.msra.mxu1 %v3718_v27 }
0x1bf0   :  { %4883 = vmatprep.subr.mxu0 %v5044_v46  ;;  %4904 = vmatprep.subr.mxu1 %v5044_v46 }
0x1bf1   :  { %4884 = vmatpush3.msra.mxu0 %v3623_v13  ;;  %4905 = vmatpush3.msra.mxu1 %v3717_v32 }
0x1bf2   :  { %4885 = vmatprep.subr.mxu0 %v5044_v46  ;;  %4906 = vmatprep.subr.mxu1 %v5044_v46 }
0x1bf3   :  { %4886 = vmatpush3.msra.mxu0 %v3622_v62  ;;  %4907 = vmatpush3.msra.mxu1 %v3716_v57 }
0x1bf4   :  { %4887 = vmatprep.subr.mxu0 %v5044_v46  ;;  %4908 = vmatprep.subr.mxu1 %v5044_v46 }
0x1bf5   :  { %4888 = vmatpush3.msra.mxu0 %v3621_v42  ;;  %4909 = vmatpush3.msra.mxu1 %v3715_v2 }
0x1bf6   :  { %4889 = vmatprep.subr.mxu0 %v5044_v46  ;;  %4910 = vmatprep.subr.mxu1 %v5044_v46 }
0x1bf7   :  { %4890 = vmatpush3.msra.mxu0 %v3620_v59  ;;  %4911 = vmatpush3.msra.mxu1 %v3714_v48 }
0x1bf8   :  { %4891 = vmatprep.subr.mxu0 %v5044_v46  ;;  %4912 = vmatprep.subr.mxu1 %v5044_v46 }
0x1bf9   :  { %4892 = vmatpush3.msra.mxu0 %v3619_v37  ;;  %4913 = vmatpush3.msra.mxu1 %v3713_v49 }
0x1bfa   :  { %4893 = vmatprep.subr.mxu0 %v5044_v46  ;;  %4914 = vmatprep.subr.mxu1 %v5044_v46 }
0x1bfb   :  { %4894 = vmatpush3.msra.mxu0 %v3618_v52  ;;  %4915 = vmatpush3.msra.mxu1 %v3712_v17 }
0x1bfc   :  { %4895 = vmatprep.subr.mxu0 %v5044_v46  ;;  %4916 = vmatprep.subr.mxu1 %v5044_v46 }
0x1bfd   :  { %4896 = vmatpush3.msra.mxu0 %v3617_v3  ;;  %4897 = vmatprep.mubr.msk.f32.mxu0 %vm5045_vm0, %v5044_v46 }
0x1bfe   :  { %4917 = vmatpush3.msra.mxu1 %v3711_v7  ;;  %4898 = vmatmul.mubr.f32.vlgmr.msra.gmra.mxu0 %v3020_v47 }
0x1bff   :  { %4918 = vmatprep.subr.mxu1 %v5044_v46  ;;  %4932 = vmatprep.mubr.msk.f32.mxu1 %vm5045_vm0, %v5044_v46 }
0x1c00   :  { %4919 = vmatpush3.msra.mxu1 %v3710_v31 }
0x1c01   :  { %4920 = vmatprep.subr.mxu1 %v5044_v46 }
0x1c02   :  { %4921 = vmatpush3.msra.mxu1 %v3709_v14 }
0x1c03   :  { %4922 = vmatprep.subr.mxu1 %v5044_v46 }
0x1c04   :  { %4923 = vmatpush3.msra.mxu1 %v3708_v39 }
0x1c05   :  { %4924 = vmatprep.subr.mxu1 %v5044_v46 }
0x1c06   :  { %4925 = vmatpush3.msra.mxu1 %v3707_v60 }
0x1c07   :  { %4926 = vmatprep.subr.mxu1 %v5044_v46 }
0x1c08   :  { %4927 = vmatpush3.msra.mxu1 %v3706_v1 }
0x1c09   :  { %4928 = vmatprep.subr.mxu1 %v5044_v46 }
0x1c0a   :  { %4929 = vmatpush3.msra.mxu1 %v3705_v8 }
0x1c0b   :  { %4930 = vmatprep.subr.mxu1 %v5044_v46 }
0x1c0c   :  { %4931 = vmatpush3.msra.mxu1 %v3704_v10 }
0x1c0d   :  { %4933 = vmatmul.mubr.f32.vlgmr.msra.gmra.mxu1 %v3025_v18 }
0x1c46   :  { %v3108_v4 = vpop.f32.mrf.mxu1 }
0x1c48   :  { %v4654_v5 = vpop.f32.mrf.mxu1 }
0x1c5b   :  { %v3178_v11 = vpop.f32.mrf.mxu0 }
0x1c5c   :  { %v3179_v19 = vadd.f32 %v3178_v11, %v3108_v4 }
0x1c5d   :  { %v4689_v16 = vpop.f32.mrf.mxu0 }
0x1c66   :  { %v3264_v20 = vpop.f32.mrf.mxu1 }
0x1c67   :  { %v3268_v61 = vadd.f32 %v3264_v20, %v3179_v19 }
0x1c68   :  { %v4724_v21 = vpop.f32.mrf.mxu1 }
0x1c7c   :  { %v3351_v9 = vpop.f32.mrf.mxu0 }
0x1c7d   :  { %v3355_v25 = vadd.f32 %v3351_v9, %v3268_v61 }
0x1c7e   :  { %v4759_v55 = vpop.f32.mrf.mxu0 }
0x1c89   :  { %v3438_v23 = vpop.f32.mrf.mxu1 }
0x1c8a   :  { %v3442_v34 = vadd.f32 %v3438_v23, %v3355_v25 }
0x1c8b   :  { %v4794_v27 = vpop.f32.mrf.mxu1 }
0x1c9c   :  { %v3525_v30 = vpop.f32.mrf.mxu0 }
0x1c9d   :  { %v3529_v6 = vadd.f32 %v3525_v30, %v3442_v34 }
0x1c9e   :  { %v4829_v13 = vpop.f32.mrf.mxu0 }
0x1cab   :  { %v3612_v32 = vpop.f32.mrf.mxu1 }
0x1cac   :  { %v3616_v62 = vadd.f32 %v3612_v32, %v3529_v6 }
0x1cad   :  { %v4864_v46 = vpop.f32.mrf.mxu1 }
0x1cbe   :  { %v3699_v35 = vpop.f32.mrf.mxu0 }
0x1cbf   :  { %v3703_v57 = vadd.f32 %v3699_v35, %v3616_v62 }
0x1cc0   :  { %v4899_v36 = vpop.f32.mrf.mxu0 }
0x1ccd   :  { %v3786_v41 = vpop.f32.mrf.mxu1 }
0x1cce   :  { %v3790_v43 = vadd.f32 %v3786_v41, %v3703_v57 }
0x1ccf   :  { %v4934_v42 = vpop.f32.mrf.mxu1 }
0x1cd0   :  { %3791 = vst [vmem:[%s6629_s2] sm:$0xff] %v3790_v43 }

</bundles_post_ra>
